<compile_context>
chip_gen: v6e
topology: v6e:2x2x1
jax: 0.10.0
libtpu: 0.0.40
codegen_flags: <defaults>
</compile_context>

<pallas_src>
import math

import jax
import jax.numpy as jnp
from jax.experimental import pallas as pl

# ---------------- config (small shapes consistent with the module) -----------
N_LAYERS = 2
D_INPUT = 3
D_INPUT_PAD = 8                          # zero-padded feature dim (sublane-friendly)
D_MODEL = 32
N_HEADS = 4
HEAD_DIM = D_MODEL // N_HEADS            # 8
N_EXPERTS = 4
EXPERT_SIZE = 16
EXP_TOTAL = N_EXPERTS * EXPERT_SIZE      # 64
TOP_K = 2
SEQ = 8
BATCH = 2
TOKENS = BATCH * SEQ                     # 16
N_OUTPUTS = 2
ROPE_BASE = 10000
ENTROPY_REG = 0.01
LN_EPS = 1e-5
SCALE = HEAD_DIM ** -0.5
NEG_INF = -1e9

# ---------------- parameter-slab layout (all 8-row aligned) -------------------
WPAD = 5 * D_MODEL                       # 160 lanes = [Wq | Wq_rot | Wk | Wk_rot | Wv]

# per-layer (relative to layer base = l * LAYER_STRIDE)
OFF_WATT = 0                             # 32 rows x 160  fused attention weights
OFF_BATT = 32                            # 1  row  x 160  fused attention bias
OFF_WO = 40                              # 32 rows x 32   out_proj weight (transposed)
OFF_WMOE = 72                            # 32 rows x 68   [keys_all | w_sel]
OFF_VALS = 104                           # 64 rows x 32   expert values
OFF_LVEC = 168                           # 8  rows x 32   ln1_g, ln1_b, bo, ln2_g, ln2_b
LAYER_STRIDE = 176

GLOBAL_BASE = N_LAYERS * LAYER_STRIDE    # 352
OFF_WIN = GLOBAL_BASE + 0                # 8  rows x 32   input projection (padded rows)
OFF_GVEC = GLOBAL_BASE + 8               # 8  rows x 32   b_in, lnf_g/b, lnd_g/b, b_out
OFF_WOUT = GLOBAL_BASE + 16              # 32 rows x 2    output projection
OFF_COS = GLOBAL_BASE + 48               # 16 rows x 32   RoPE cos (per token row)
OFF_SIN = GLOBAL_BASE + 64               # 16 rows x 32   RoPE sin (signs folded in)
OFF_MASK = GLOBAL_BASE + 80              # 16 rows x 16   block-diag batch mask
OFF_GX = GLOBAL_BASE + 96                # 4  rows x 64   gate expansion (E -> E*F)
SLAB_ROWS = GLOBAL_BASE + 104            # 456


# ------------------------------ kernel helpers --------------------------------
def _layernorm(x, g, b):
    mu = jnp.mean(x, axis=-1, keepdims=True)
    var = jnp.mean((x - mu) ** 2, axis=-1, keepdims=True)
    return (x - mu) * jax.lax.rsqrt(var + LN_EPS) * g + b


def _softmax_lastdim(x):
    m = jnp.max(x, axis=-1, keepdims=True)
    e = jnp.exp(x - m)
    return e * pl.reciprocal(jnp.sum(e, axis=-1, keepdims=True), approx=True)


# ------------------------------ fused kernel ----------------------------------
def moeut_decoder_kernel(x_ref, p_ref, out_ref):
    # ------- global constants / weights (static slices of the one slab) -------
    w_in = p_ref[OFF_WIN:OFF_WIN + D_INPUT_PAD, 0:D_MODEL]              # (8, 32)
    gvec = p_ref[OFF_GVEC:OFF_GVEC + 8, 0:D_MODEL]                      # (8, 32)
    b_in = gvec[0:1, :]
    lnf_g, lnf_b = gvec[1:2, :], gvec[2:3, :]
    lnd_g, lnd_b = gvec[3:4, :], gvec[4:5, :]
    b_out = gvec[5:6, 0:N_OUTPUTS]
    w_out = p_ref[OFF_WOUT:OFF_WOUT + D_MODEL, 0:N_OUTPUTS]             # (32, 2)
    cos = p_ref[OFF_COS:OFF_COS + TOKENS, 0:D_MODEL]                    # (16, 32)
    sin = p_ref[OFF_SIN:OFF_SIN + TOKENS, 0:D_MODEL]                    # (16, 32)
    mask = p_ref[OFF_MASK:OFF_MASK + TOKENS, 0:TOKENS]                  # (16, 16)
    gx = p_ref[OFF_GX:OFF_GX + N_EXPERTS, 0:EXP_TOTAL]                  # (4, 64)

    # ---- input projection (nn.Linear(d_input, d_model)); dropout == identity ----
    h = jnp.dot(x_ref[...], w_in, preferred_element_type=jnp.float32) + b_in  # (T, D)

    reg = jnp.zeros((1, 1), jnp.float32)

    for l in range(N_LAYERS):                          # static unroll (L = 2)
        base = l * LAYER_STRIDE
        lvec = p_ref[base + OFF_LVEC:base + OFF_LVEC + 8, 0:D_MODEL]    # (8, 32)
        ln1_g, ln1_b, bo = lvec[0:1, :], lvec[1:2, :], lvec[2:3, :]
        ln2_g, ln2_b = lvec[3:4, :], lvec[4:5, :]

        # ================= attention sublayer: h = h + MHA(LN1(h)) ==============
        xn = _layernorm(h, ln1_g, ln1_b)
        w_att = p_ref[base + OFF_WATT:base + OFF_WATT + D_MODEL, :]     # (32, 160)
        b_att = p_ref[base + OFF_BATT:base + OFF_BATT + 1, :]           # (1, 160)
        qkv = jnp.dot(xn, w_att, preferred_element_type=jnp.float32) + b_att  # (16,160)

        q = qkv[:, 0:D_MODEL]
        q_rot = qkv[:, D_MODEL:2 * D_MODEL]            # (xn @ Wq) @ P, folded on host
        k = qkv[:, 2 * D_MODEL:3 * D_MODEL]
        k_rot = qkv[:, 3 * D_MODEL:4 * D_MODEL]
        v = qkv[:, 4 * D_MODEL:5 * D_MODEL]

        # RoPE: pure VPU multiply-add (signs folded into sin table).
        q = q * cos + q_rot * sin
        k = k * cos + k_rot * sin

        attn = jnp.zeros((TOKENS, D_MODEL), jnp.float32)
        for hh in range(N_HEADS):                      # static unroll (H = 4)
            c0 = hh * HEAD_DIM
            qh = q[:, c0:c0 + HEAD_DIM]                # (16, 8)
            kh = k[:, c0:c0 + HEAD_DIM]
            vh = v[:, c0:c0 + HEAD_DIM]
            # flattened 2-D attention; block-diagonal mask kills cross-batch terms
            s = jax.lax.dot_general(qh, kh, (((1,), (1,)), ((), ())),
                                    preferred_element_type=jnp.float32)
            s = s * SCALE + mask                                       # (16, 16)
            p = _softmax_lastdim(s)
            oh = jnp.dot(p, vh, preferred_element_type=jnp.float32)    # (16, 8)
            # fold the head concat into the output projection:
            #   concat_h(O_h) @ Wo^T == sum_h O_h @ (Wo^T)[h-rows]
            wo_rows = p_ref[base + OFF_WO + c0:base + OFF_WO + c0 + HEAD_DIM,
                            0:D_MODEL]                                  # (8, 32)
            attn = attn + jnp.dot(oh, wo_rows, preferred_element_type=jnp.float32)
        h = h + attn + bo

        # ================= SigmaMoE sublayer: h = h + MoE(LN2(h)) ===============
        xn = _layernorm(h, ln2_g, ln2_b)
        w_moe = p_ref[base + OFF_WMOE:base + OFF_WMOE + D_MODEL,
                      0:EXP_TOTAL + N_EXPERTS]                          # (32, 68)
        mo = jnp.dot(xn, w_moe, preferred_element_type=jnp.float32)    # (16, 68)
        pre = mo[:, 0:EXP_TOTAL]                                       # expert keys
        logits = mo[:, EXP_TOTAL:EXP_TOTAL + N_EXPERTS]                # selector

        # entropy regularization of the mean selection distribution (exact
        # softmax here; off the hot path).
        # TODO(synk): exact SigmaMoE.get_reg_loss() not in the provided source.
        m = jnp.max(logits, axis=-1, keepdims=True)
        e = jnp.exp(logits - m)
        probs = e / jnp.sum(e, axis=-1, keepdims=True)
        pm = jnp.mean(probs, axis=0, keepdims=True)                    # (1, E)
        reg = reg + ENTROPY_REG * jnp.sum(pm * jnp.log(pm + 1e-10),
                                          axis=-1, keepdims=True)

        # sigmoid gate, top-k selection (ties broken towards the lowest index)
        sel = 1.0 / (1.0 + jnp.exp(-logits))
        gate = jnp.zeros_like(sel)
        work = sel
        iota = jax.lax.broadcasted_iota(jnp.int32, sel.shape, 1)
        for _ in range(TOP_K):
            mx = jnp.max(work, axis=-1, keepdims=True)
            hits = work == mx
            min_idx = jnp.min(jnp.where(hits, iota, N_EXPERTS),
                              axis=-1, keepdims=True)
            onehot = iota == min_idx
            gate = jnp.where(onehot, sel, gate)
            work = jnp.where(onehot, jnp.float32(-1e30), work)

        # gate broadcast along the expert-size axis via a tiny (4,64) matmul;
        # zero gates kill unselected experts.
        he = jnp.maximum(pre, 0.0) * jnp.dot(gate, gx,
                                             preferred_element_type=jnp.float32)
        vals = p_ref[base + OFF_VALS:base + OFF_VALS + EXP_TOTAL, 0:D_MODEL]
        h = h + jnp.dot(he, vals, preferred_element_type=jnp.float32)

    # ===================== MoEUT final LayerNorm (transformer.ln_f) =============
    h = _layernorm(h, lnf_g, lnf_b)

    # ============ decoder head: output_projection(ln_f(h[:, -1, :])) ============
    # last timestep of each batch = rows b*SEQ + (SEQ-1) -> two static row slices
    x_last = jnp.concatenate(
        [h[b * SEQ + SEQ - 1:b * SEQ + SEQ, :] for b in range(BATCH)], axis=0)
    x_last = _layernorm(x_last, lnd_g, lnd_b)
    y = jnp.dot(x_last, w_out, preferred_element_type=jnp.float32) + b_out  # (B, 2)

    # pack y and the reg scalar into ONE lane-dense output
    reg_col = reg + jnp.zeros((BATCH, 1), jnp.float32)
    out_ref[...] = jnp.concatenate([y, reg_col], axis=-1)                   # (B, 3)


# ------------------------------ wrapper ----------------------------------------
def moeut_decoder_forward(x, slab):
    """Full MoEUTTimeSeriesDecoder forward (inference mode).

    Returns (y, reg_loss).  The PyTorch module computes but discards reg_loss;
    it is returned here because it is produced in-kernel anyway.
    """
    B, T, C = x.shape
    x2 = x.reshape(B * T, C)
    x2 = jnp.pad(x2, ((0, 0), (0, D_INPUT_PAD - C)))        # pad feature dim 3 -> 8

    out = pl.pallas_call(
        moeut_decoder_kernel,
        out_shape=jax.ShapeDtypeStruct((BATCH, N_OUTPUTS + 1), jnp.float32),
    )(x2, slab)
    return out[:, :N_OUTPUTS], out[0, N_OUTPUTS]


# ------------------------------ parameters --------------------------------------
def _xavier(key, shape):
    fan_in, fan_out = shape[-2], shape[-1]
    limit = math.sqrt(6.0 / (fan_in + fan_out))
    return jax.random.uniform(key, shape, jnp.float32, -limit, limit)


def _linear_default(key, out_f, in_f):
    bound = 1.0 / math.sqrt(in_f)
    return jax.random.uniform(key, (out_f, in_f), jnp.float32, -bound, bound)


def _rope_tables():
    half = HEAD_DIM // 2
    inv_freq = 1.0 / (ROPE_BASE ** (jnp.arange(0, HEAD_DIM, 2, dtype=jnp.float32)
                                    / HEAD_DIM))
    pos = jnp.arange(SEQ, dtype=jnp.float32)
    freqs = pos[:, None] * inv_freq[None, :]                                # (S, half)
    cos_h = jnp.concatenate([jnp.cos(freqs), jnp.cos(freqs)], axis=-1)      # (S, hd)
    sin_h = jnp.concatenate([-jnp.sin(freqs), jnp.sin(freqs)], axis=-1)     # signed
    cos_full = jnp.tile(jnp.tile(cos_h, (1, N_HEADS)), (BATCH, 1))          # (B*S, D)
    sin_full = jnp.tile(jnp.tile(sin_h, (1, N_HEADS)), (BATCH, 1))
    # (q @ P) swaps the two halves of every head (rotate-half, signs in sin table)
    eye_h = jnp.eye(half, dtype=jnp.float32)
    blk = jnp.zeros((HEAD_DIM, HEAD_DIM), jnp.float32)
    blk = blk.at[half:, :half].set(eye_h).at[:half, half:].set(eye_h)
    rope_perm = jnp.kron(jnp.eye(N_HEADS, dtype=jnp.float32), blk)          # (D, D)
    return cos_full, sin_full, rope_perm


def pack_params(key):
    """Build all module parameters and pack them into ONE (456, 160) f32 slab."""
    k_in, k_out, *k_layers = jax.random.split(key, 2 + N_LAYERS)
    cos_full, sin_full, rope_perm = _rope_tables()

    slab = jnp.zeros((SLAB_ROWS, WPAD), jnp.float32)

    def put(s, row, arr):
        r, c = arr.shape
        return s.at[row:row + r, 0:c].set(arr)

    for l, kl in enumerate(k_layers):
        ks = jax.random.split(kl, 7)
        # F.linear(x, W.t(), b) == x @ W + b  -> used untransposed
        wq = _xavier(ks[0], (D_MODEL, D_MODEL))
        wk = _xavier(ks[1], (D_MODEL, D_MODEL))
        wv = _xavier(ks[2], (D_MODEL, D_MODEL))
        bq = jnp.zeros((1, D_MODEL), jnp.float32)
        bk = jnp.zeros((1, D_MODEL), jnp.float32)
        bv = jnp.zeros((1, D_MODEL), jnp.float32)
        # out_proj is nn.Linear (x @ W.T + b) -> pre-transpose
        wo_t = _xavier(ks[3], (D_MODEL, D_MODEL)).T
        bo = jnp.zeros((1, D_MODEL), jnp.float32)
        w_sel = _xavier(ks[4], (D_MODEL, N_EXPERTS))
        keys_e = _xavier(ks[5], (N_EXPERTS, D_MODEL, EXPERT_SIZE))
        vals_e = _xavier(ks[6], (N_EXPERTS, EXPERT_SIZE, D_MODEL))
        # expert weights packed for two stacked matmuls:
        #   keys (E, D, F) -> (D, E*F);  values (E, F, D) -> (E*F, D)
        keys_all = jnp.transpose(keys_e, (1, 0, 2)).reshape(D_MODEL, EXP_TOTAL)
        vals_all = vals_e.reshape(EXP_TOTAL, D_MODEL)

        # fold the rotate-half permutation into Q/K weights and fuse Q/K/V into
        # one wide (32, 160) projection: [Wq | Wq@P | Wk | Wk@P | Wv]
        w_att = jnp.concatenate([wq, wq @ rope_perm, wk, wk @ rope_perm, wv], axis=1)
        b_att = jnp.concatenate([bq, bq @ rope_perm, bk, bk @ rope_perm, bv], axis=1)

        base = l * LAYER_STRIDE
        slab = put(slab, base + OFF_WATT, w_att)
        slab = put(slab, base + OFF_BATT, b_att)
        slab = put(slab, base + OFF_WO, wo_t)
        slab = put(slab, base + OFF_WMOE, jnp.concatenate([keys_all, w_sel], axis=1))
        slab = put(slab, base + OFF_VALS, vals_all)
        ln1_g = jnp.ones((1, D_MODEL), jnp.float32)
        ln1_b = jnp.zeros((1, D_MODEL), jnp.float32)
        ln2_g = jnp.ones((1, D_MODEL), jnp.float32)
        ln2_b = jnp.zeros((1, D_MODEL), jnp.float32)
        slab = put(slab, base + OFF_LVEC,
                   jnp.concatenate([ln1_g, ln1_b, bo, ln2_g, ln2_b], axis=0))

    # ---- globals ----
    # input_projection: nn.Linear(d_input, d_model) -> x @ W.T + b
    w_in = _linear_default(k_in, D_MODEL, D_INPUT)                  # torch layout
    w_in_t = jnp.pad(w_in.T, ((0, D_INPUT_PAD - D_INPUT), (0, 0)))  # (8, D), zero rows
    # output_projection: nn.Linear(d_model, n_outputs)
    w_out = _linear_default(k_out, N_OUTPUTS, D_MODEL)
    b_in = jnp.zeros((1, D_MODEL), jnp.float32)
    b_out = jnp.zeros((1, N_OUTPUTS), jnp.float32)
    lnf_g = jnp.ones((1, D_MODEL), jnp.float32)
    lnf_b = jnp.zeros((1, D_MODEL), jnp.float32)
    lnd_g = jnp.ones((1, D_MODEL), jnp.float32)
    lnd_b = jnp.zeros((1, D_MODEL), jnp.float32)

    slab = put(slab, OFF_WIN, w_in_t)
    gvec = jnp.concatenate(
        [b_in, lnf_g, lnf_b, lnd_g, lnd_b,
         jnp.pad(b_out, ((0, 0), (0, D_MODEL - N_OUTPUTS)))], axis=0)     # (6, 32)
    slab = put(slab, OFF_GVEC, gvec)
    slab = put(slab, OFF_WOUT, w_out.T)                                    # (32, 2)
    slab = put(slab, OFF_COS, cos_full)
    slab = put(slab, OFF_SIN, sin_full)
    # block-diagonal batch mask for the flattened (16, 16) attention scores
    bid = jnp.arange(TOKENS) // SEQ
    mask = jnp.where(bid[:, None] == bid[None, :], 0.0, NEG_INF).astype(jnp.float32)
    slab = put(slab, OFF_MASK, mask)
    # (gate @ G)[:, e*F + j] == gate[:, e]
    gate_expand = jnp.kron(jnp.eye(N_EXPERTS, dtype=jnp.float32),
                           jnp.ones((1, EXPERT_SIZE), jnp.float32))        # (E, E*F)
    slab = put(slab, OFF_GX, gate_expand)
    return slab


# ------------------------------ main --------------------------------------------
if __name__ == "__main__":
    key = jax.random.PRNGKey(0)
    k_x, k_p = jax.random.split(key)

    x = jax.random.normal(k_x, (BATCH, SEQ, D_INPUT), jnp.float32)
    slab = pack_params(k_p)

    fwd = jax.jit(moeut_decoder_forward)
    y, reg_loss = fwd(x, slab)
    y = jax.block_until_ready(y)
    reg_loss = jax.block_until_ready(reg_loss)

    assert y.shape == (BATCH, N_OUTPUTS)
    assert bool(jnp.all(jnp.isfinite(y))) and bool(jnp.isfinite(reg_loss))
    print("KERNEL_OK")
</pallas_src>

<mosaic_0001>
module attributes {stable_mosaic.version = 11 : i64} {
  func.func @moeut_decoder_kernel(%arg0: memref<16x8xf32, #tpu.memory_space<vmem>>, %arg1: memref<456x160xf32, #tpu.memory_space<vmem>>, %arg2: memref<2x3xf32, #tpu.memory_space<vmem>>) attributes {dimension_semantics = [], scalar_prefetch = 0 : i64, scratch_operands = 0 : i64, tpu.core_type = #tpu.core_type<tc>} {
    %c352 = arith.constant 352 : index
    %c0 = arith.constant 0 : index
    %0 = vector.load %arg1[%c352, %c0] : memref<456x160xf32, #tpu.memory_space<vmem>>, vector<8x32xf32>
    %c360 = arith.constant 360 : index
    %c0_0 = arith.constant 0 : index
    %1 = vector.load %arg1[%c360, %c0_0] : memref<456x160xf32, #tpu.memory_space<vmem>>, vector<8x32xf32>
    %2 = vector.extract_strided_slice %1 {offsets = [0, 0], sizes = [1, 32], strides = [1, 1]} : vector<8x32xf32> to vector<1x32xf32>
    %3 = vector.extract_strided_slice %1 {offsets = [1, 0], sizes = [1, 32], strides = [1, 1]} : vector<8x32xf32> to vector<1x32xf32>
    %4 = vector.extract_strided_slice %1 {offsets = [2, 0], sizes = [1, 32], strides = [1, 1]} : vector<8x32xf32> to vector<1x32xf32>
    %5 = vector.extract_strided_slice %1 {offsets = [3, 0], sizes = [1, 32], strides = [1, 1]} : vector<8x32xf32> to vector<1x32xf32>
    %6 = vector.extract_strided_slice %1 {offsets = [4, 0], sizes = [1, 32], strides = [1, 1]} : vector<8x32xf32> to vector<1x32xf32>
    %7 = vector.extract_strided_slice %1 {offsets = [5, 0], sizes = [1, 2], strides = [1, 1]} : vector<8x32xf32> to vector<1x2xf32>
    %c368 = arith.constant 368 : index
    %c0_1 = arith.constant 0 : index
    %8 = vector.load %arg1[%c368, %c0_1] : memref<456x160xf32, #tpu.memory_space<vmem>>, vector<32x2xf32>
    %c400 = arith.constant 400 : index
    %c0_2 = arith.constant 0 : index
    %9 = vector.load %arg1[%c400, %c0_2] : memref<456x160xf32, #tpu.memory_space<vmem>>, vector<16x32xf32>
    %c416 = arith.constant 416 : index
    %c0_3 = arith.constant 0 : index
    %10 = vector.load %arg1[%c416, %c0_3] : memref<456x160xf32, #tpu.memory_space<vmem>>, vector<16x32xf32>
    %c432 = arith.constant 432 : index
    %c0_4 = arith.constant 0 : index
    %11 = vector.load %arg1[%c432, %c0_4] : memref<456x160xf32, #tpu.memory_space<vmem>>, vector<16x16xf32>
    %c448 = arith.constant 448 : index
    %c0_5 = arith.constant 0 : index
    %12 = vector.load %arg1[%c448, %c0_5] : memref<456x160xf32, #tpu.memory_space<vmem>>, vector<4x64xf32>
    %c0_6 = arith.constant 0 : index
    %c0_7 = arith.constant 0 : index
    %13 = vector.load %arg0[%c0_6, %c0_7] : memref<16x8xf32, #tpu.memory_space<vmem>>, vector<16x8xf32>
    %cst = arith.constant dense<0.000000e+00> : vector<16x32xf32>
    %14 = tpu.matmul %13, %0, %cst {dimension_numbers = #tpu.dot_dimension_numbers<[1], [0], [0], [1], [0, 0, 1, 1], [], []>} : vector<16x8xf32>, vector<8x32xf32>, vector<16x32xf32> -> vector<16x32xf32>
    %15 = vector.broadcast %2 : vector<1x32xf32> to vector<16x32xf32>
    %16 = arith.addf %14, %15 : vector<16x32xf32>
    %cst_8 = arith.constant 0.000000e+00 : f32
    %17 = vector.broadcast %cst_8 : f32 to vector<1x1xf32>
    %c168 = arith.constant 168 : index
    %c0_9 = arith.constant 0 : index
    %18 = vector.load %arg1[%c168, %c0_9] : memref<456x160xf32, #tpu.memory_space<vmem>>, vector<8x32xf32>
    %19 = vector.extract_strided_slice %18 {offsets = [0, 0], sizes = [1, 32], strides = [1, 1]} : vector<8x32xf32> to vector<1x32xf32>
    %20 = vector.extract_strided_slice %18 {offsets = [1, 0], sizes = [1, 32], strides = [1, 1]} : vector<8x32xf32> to vector<1x32xf32>
    %21 = vector.extract_strided_slice %18 {offsets = [2, 0], sizes = [1, 32], strides = [1, 1]} : vector<8x32xf32> to vector<1x32xf32>
    %22 = vector.extract_strided_slice %18 {offsets = [3, 0], sizes = [1, 32], strides = [1, 1]} : vector<8x32xf32> to vector<1x32xf32>
    %23 = vector.extract_strided_slice %18 {offsets = [4, 0], sizes = [1, 32], strides = [1, 1]} : vector<8x32xf32> to vector<1x32xf32>
    %cst_10 = arith.constant dense<0.000000e+00> : vector<16xf32>
    %24 = vector.multi_reduction <add>, %16, %cst_10 [1] : vector<16x32xf32> to vector<16xf32>
    %25 = vector.shape_cast %24 : vector<16xf32> to vector<16x1xf32>
    %cst_11 = arith.constant 3.200000e+01 : f32
    %26 = vector.broadcast %cst_11 : f32 to vector<16x1xf32>
    %27 = arith.divf %25, %26 : vector<16x1xf32>
    %28 = vector.broadcast %27 : vector<16x1xf32> to vector<16x32xf32>
    %29 = arith.subf %16, %28 : vector<16x32xf32>
    %30 = arith.mulf %29, %29 : vector<16x32xf32>
    %cst_12 = arith.constant dense<0.000000e+00> : vector<16xf32>
    %31 = vector.multi_reduction <add>, %30, %cst_12 [1] : vector<16x32xf32> to vector<16xf32>
    %32 = vector.shape_cast %31 : vector<16xf32> to vector<16x1xf32>
    %cst_13 = arith.constant 3.200000e+01 : f32
    %33 = vector.broadcast %cst_13 : f32 to vector<16x1xf32>
    %34 = arith.divf %32, %33 : vector<16x1xf32>
    %35 = vector.broadcast %27 : vector<16x1xf32> to vector<16x32xf32>
    %36 = arith.subf %16, %35 : vector<16x32xf32>
    %cst_14 = arith.constant 9.99999974E-6 : f32
    %37 = vector.broadcast %cst_14 : f32 to vector<16x1xf32>
    %38 = arith.addf %34, %37 : vector<16x1xf32>
    %39 = math.rsqrt %38 : vector<16x1xf32>
    %40 = vector.broadcast %39 : vector<16x1xf32> to vector<16x32xf32>
    %41 = arith.mulf %36, %40 : vector<16x32xf32>
    %42 = vector.broadcast %19 : vector<1x32xf32> to vector<16x32xf32>
    %43 = arith.mulf %41, %42 : vector<16x32xf32>
    %44 = vector.broadcast %20 : vector<1x32xf32> to vector<16x32xf32>
    %45 = arith.addf %43, %44 : vector<16x32xf32>
    %c0_15 = arith.constant 0 : index
    %c0_16 = arith.constant 0 : index
    %46 = vector.load %arg1[%c0_15, %c0_16] : memref<456x160xf32, #tpu.memory_space<vmem>>, vector<32x160xf32>
    %c32 = arith.constant 32 : index
    %c0_17 = arith.constant 0 : index
    %47 = vector.load %arg1[%c32, %c0_17] : memref<456x160xf32, #tpu.memory_space<vmem>>, vector<1x160xf32>
    %cst_18 = arith.constant dense<0.000000e+00> : vector<16x160xf32>
    %48 = tpu.matmul %45, %46, %cst_18 {dimension_numbers = #tpu.dot_dimension_numbers<[1], [0], [0], [1], [0, 0, 1, 1], [], []>} : vector<16x32xf32>, vector<32x160xf32>, vector<16x160xf32> -> vector<16x160xf32>
    %49 = vector.broadcast %47 : vector<1x160xf32> to vector<16x160xf32>
    %50 = arith.addf %48, %49 : vector<16x160xf32>
    %51 = vector.extract_strided_slice %50 {offsets = [0, 0], sizes = [16, 32], strides = [1, 1]} : vector<16x160xf32> to vector<16x32xf32>
    %52 = vector.extract_strided_slice %50 {offsets = [0, 32], sizes = [16, 32], strides = [1, 1]} : vector<16x160xf32> to vector<16x32xf32>
    %53 = vector.extract_strided_slice %50 {offsets = [0, 64], sizes = [16, 32], strides = [1, 1]} : vector<16x160xf32> to vector<16x32xf32>
    %54 = vector.extract_strided_slice %50 {offsets = [0, 96], sizes = [16, 32], strides = [1, 1]} : vector<16x160xf32> to vector<16x32xf32>
    %55 = vector.extract_strided_slice %50 {offsets = [0, 128], sizes = [16, 32], strides = [1, 1]} : vector<16x160xf32> to vector<16x32xf32>
    %56 = arith.mulf %51, %9 : vector<16x32xf32>
    %57 = arith.mulf %52, %10 : vector<16x32xf32>
    %58 = arith.addf %56, %57 : vector<16x32xf32>
    %59 = arith.mulf %53, %9 : vector<16x32xf32>
    %60 = arith.mulf %54, %10 : vector<16x32xf32>
    %61 = arith.addf %59, %60 : vector<16x32xf32>
    %cst_19 = arith.constant 0.000000e+00 : f32
    %62 = vector.broadcast %cst_19 : f32 to vector<16x32xf32>
    %63 = vector.extract_strided_slice %58 {offsets = [0, 0], sizes = [16, 8], strides = [1, 1]} : vector<16x32xf32> to vector<16x8xf32>
    %64 = vector.extract_strided_slice %61 {offsets = [0, 0], sizes = [16, 8], strides = [1, 1]} : vector<16x32xf32> to vector<16x8xf32>
    %65 = vector.extract_strided_slice %55 {offsets = [0, 0], sizes = [16, 8], strides = [1, 1]} : vector<16x32xf32> to vector<16x8xf32>
    %cst_20 = arith.constant dense<0.000000e+00> : vector<16x16xf32>
    %66 = tpu.matmul %63, %64, %cst_20 {dimension_numbers = #tpu.dot_dimension_numbers<[1], [1], [0], [0], [0, 0, 1, 0], [], []>} : vector<16x8xf32>, vector<16x8xf32>, vector<16x16xf32> -> vector<16x16xf32>
    %cst_21 = arith.constant 0.353553385 : f32
    %67 = vector.broadcast %cst_21 : f32 to vector<16x16xf32>
    %68 = arith.mulf %66, %67 : vector<16x16xf32>
    %69 = arith.addf %68, %11 : vector<16x16xf32>
    %cst_22 = arith.constant dense<0xFF800000> : vector<16xf32>
    %70 = vector.multi_reduction <maximumf>, %69, %cst_22 [1] : vector<16x16xf32> to vector<16xf32>
    %71 = vector.shape_cast %70 : vector<16xf32> to vector<16x1xf32>
    %72 = vector.broadcast %71 : vector<16x1xf32> to vector<16x16xf32>
    %73 = arith.subf %69, %72 : vector<16x16xf32>
    %74 = math.exp %73 : vector<16x16xf32>
    %cst_23 = arith.constant dense<0.000000e+00> : vector<16xf32>
    %75 = vector.multi_reduction <add>, %74, %cst_23 [1] : vector<16x16xf32> to vector<16xf32>
    %76 = vector.shape_cast %75 : vector<16xf32> to vector<16x1xf32>
    %77 = tpu.reciprocal %76 {approx = true} : vector<16x1xf32> -> vector<16x1xf32>
    %78 = vector.broadcast %77 : vector<16x1xf32> to vector<16x16xf32>
    %79 = arith.mulf %74, %78 : vector<16x16xf32>
    %cst_24 = arith.constant dense<0.000000e+00> : vector<16x8xf32>
    %80 = tpu.matmul %79, %65, %cst_24 {dimension_numbers = #tpu.dot_dimension_numbers<[1], [0], [0], [1], [0, 0, 1, 1], [], []>} : vector<16x16xf32>, vector<16x8xf32>, vector<16x8xf32> -> vector<16x8xf32>
    %c40 = arith.constant 40 : index
    %c0_25 = arith.constant 0 : index
    %81 = vector.load %arg1[%c40, %c0_25] : memref<456x160xf32, #tpu.memory_space<vmem>>, vector<8x32xf32>
    %cst_26 = arith.constant dense<0.000000e+00> : vector<16x32xf32>
    %82 = tpu.matmul %80, %81, %cst_26 {dimension_numbers = #tpu.dot_dimension_numbers<[1], [0], [0], [1], [0, 0, 1, 1], [], []>} : vector<16x8xf32>, vector<8x32xf32>, vector<16x32xf32> -> vector<16x32xf32>
    %83 = arith.addf %62, %82 : vector<16x32xf32>
    %84 = vector.extract_strided_slice %58 {offsets = [0, 8], sizes = [16, 8], strides = [1, 1]} : vector<16x32xf32> to vector<16x8xf32>
    %85 = vector.extract_strided_slice %61 {offsets = [0, 8], sizes = [16, 8], strides = [1, 1]} : vector<16x32xf32> to vector<16x8xf32>
    %86 = vector.extract_strided_slice %55 {offsets = [0, 8], sizes = [16, 8], strides = [1, 1]} : vector<16x32xf32> to vector<16x8xf32>
    %cst_27 = arith.constant dense<0.000000e+00> : vector<16x16xf32>
    %87 = tpu.matmul %84, %85, %cst_27 {dimension_numbers = #tpu.dot_dimension_numbers<[1], [1], [0], [0], [0, 0, 1, 0], [], []>} : vector<16x8xf32>, vector<16x8xf32>, vector<16x16xf32> -> vector<16x16xf32>
    %cst_28 = arith.constant 0.353553385 : f32
    %88 = vector.broadcast %cst_28 : f32 to vector<16x16xf32>
    %89 = arith.mulf %87, %88 : vector<16x16xf32>
    %90 = arith.addf %89, %11 : vector<16x16xf32>
    %cst_29 = arith.constant dense<0xFF800000> : vector<16xf32>
    %91 = vector.multi_reduction <maximumf>, %90, %cst_29 [1] : vector<16x16xf32> to vector<16xf32>
    %92 = vector.shape_cast %91 : vector<16xf32> to vector<16x1xf32>
    %93 = vector.broadcast %92 : vector<16x1xf32> to vector<16x16xf32>
    %94 = arith.subf %90, %93 : vector<16x16xf32>
    %95 = math.exp %94 : vector<16x16xf32>
    %cst_30 = arith.constant dense<0.000000e+00> : vector<16xf32>
    %96 = vector.multi_reduction <add>, %95, %cst_30 [1] : vector<16x16xf32> to vector<16xf32>
    %97 = vector.shape_cast %96 : vector<16xf32> to vector<16x1xf32>
    %98 = tpu.reciprocal %97 {approx = true} : vector<16x1xf32> -> vector<16x1xf32>
    %99 = vector.broadcast %98 : vector<16x1xf32> to vector<16x16xf32>
    %100 = arith.mulf %95, %99 : vector<16x16xf32>
    %cst_31 = arith.constant dense<0.000000e+00> : vector<16x8xf32>
    %101 = tpu.matmul %100, %86, %cst_31 {dimension_numbers = #tpu.dot_dimension_numbers<[1], [0], [0], [1], [0, 0, 1, 1], [], []>} : vector<16x16xf32>, vector<16x8xf32>, vector<16x8xf32> -> vector<16x8xf32>
    %c48 = arith.constant 48 : index
    %c0_32 = arith.constant 0 : index
    %102 = vector.load %arg1[%c48, %c0_32] : memref<456x160xf32, #tpu.memory_space<vmem>>, vector<8x32xf32>
    %cst_33 = arith.constant dense<0.000000e+00> : vector<16x32xf32>
    %103 = tpu.matmul %101, %102, %cst_33 {dimension_numbers = #tpu.dot_dimension_numbers<[1], [0], [0], [1], [0, 0, 1, 1], [], []>} : vector<16x8xf32>, vector<8x32xf32>, vector<16x32xf32> -> vector<16x32xf32>
    %104 = arith.addf %83, %103 : vector<16x32xf32>
    %105 = vector.extract_strided_slice %58 {offsets = [0, 16], sizes = [16, 8], strides = [1, 1]} : vector<16x32xf32> to vector<16x8xf32>
    %106 = vector.extract_strided_slice %61 {offsets = [0, 16], sizes = [16, 8], strides = [1, 1]} : vector<16x32xf32> to vector<16x8xf32>
    %107 = vector.extract_strided_slice %55 {offsets = [0, 16], sizes = [16, 8], strides = [1, 1]} : vector<16x32xf32> to vector<16x8xf32>
    %cst_34 = arith.constant dense<0.000000e+00> : vector<16x16xf32>
    %108 = tpu.matmul %105, %106, %cst_34 {dimension_numbers = #tpu.dot_dimension_numbers<[1], [1], [0], [0], [0, 0, 1, 0], [], []>} : vector<16x8xf32>, vector<16x8xf32>, vector<16x16xf32> -> vector<16x16xf32>
    %cst_35 = arith.constant 0.353553385 : f32
    %109 = vector.broadcast %cst_35 : f32 to vector<16x16xf32>
    %110 = arith.mulf %108, %109 : vector<16x16xf32>
    %111 = arith.addf %110, %11 : vector<16x16xf32>
    %cst_36 = arith.constant dense<0xFF800000> : vector<16xf32>
    %112 = vector.multi_reduction <maximumf>, %111, %cst_36 [1] : vector<16x16xf32> to vector<16xf32>
    %113 = vector.shape_cast %112 : vector<16xf32> to vector<16x1xf32>
    %114 = vector.broadcast %113 : vector<16x1xf32> to vector<16x16xf32>
    %115 = arith.subf %111, %114 : vector<16x16xf32>
    %116 = math.exp %115 : vector<16x16xf32>
    %cst_37 = arith.constant dense<0.000000e+00> : vector<16xf32>
    %117 = vector.multi_reduction <add>, %116, %cst_37 [1] : vector<16x16xf32> to vector<16xf32>
    %118 = vector.shape_cast %117 : vector<16xf32> to vector<16x1xf32>
    %119 = tpu.reciprocal %118 {approx = true} : vector<16x1xf32> -> vector<16x1xf32>
    %120 = vector.broadcast %119 : vector<16x1xf32> to vector<16x16xf32>
    %121 = arith.mulf %116, %120 : vector<16x16xf32>
    %cst_38 = arith.constant dense<0.000000e+00> : vector<16x8xf32>
    %122 = tpu.matmul %121, %107, %cst_38 {dimension_numbers = #tpu.dot_dimension_numbers<[1], [0], [0], [1], [0, 0, 1, 1], [], []>} : vector<16x16xf32>, vector<16x8xf32>, vector<16x8xf32> -> vector<16x8xf32>
    %c56 = arith.constant 56 : index
    %c0_39 = arith.constant 0 : index
    %123 = vector.load %arg1[%c56, %c0_39] : memref<456x160xf32, #tpu.memory_space<vmem>>, vector<8x32xf32>
    %cst_40 = arith.constant dense<0.000000e+00> : vector<16x32xf32>
    %124 = tpu.matmul %122, %123, %cst_40 {dimension_numbers = #tpu.dot_dimension_numbers<[1], [0], [0], [1], [0, 0, 1, 1], [], []>} : vector<16x8xf32>, vector<8x32xf32>, vector<16x32xf32> -> vector<16x32xf32>
    %125 = arith.addf %104, %124 : vector<16x32xf32>
    %126 = vector.extract_strided_slice %58 {offsets = [0, 24], sizes = [16, 8], strides = [1, 1]} : vector<16x32xf32> to vector<16x8xf32>
    %127 = vector.extract_strided_slice %61 {offsets = [0, 24], sizes = [16, 8], strides = [1, 1]} : vector<16x32xf32> to vector<16x8xf32>
    %128 = vector.extract_strided_slice %55 {offsets = [0, 24], sizes = [16, 8], strides = [1, 1]} : vector<16x32xf32> to vector<16x8xf32>
    %cst_41 = arith.constant dense<0.000000e+00> : vector<16x16xf32>
    %129 = tpu.matmul %126, %127, %cst_41 {dimension_numbers = #tpu.dot_dimension_numbers<[1], [1], [0], [0], [0, 0, 1, 0], [], []>} : vector<16x8xf32>, vector<16x8xf32>, vector<16x16xf32> -> vector<16x16xf32>
    %cst_42 = arith.constant 0.353553385 : f32
    %130 = vector.broadcast %cst_42 : f32 to vector<16x16xf32>
    %131 = arith.mulf %129, %130 : vector<16x16xf32>
    %132 = arith.addf %131, %11 : vector<16x16xf32>
    %cst_43 = arith.constant dense<0xFF800000> : vector<16xf32>
    %133 = vector.multi_reduction <maximumf>, %132, %cst_43 [1] : vector<16x16xf32> to vector<16xf32>
    %134 = vector.shape_cast %133 : vector<16xf32> to vector<16x1xf32>
    %135 = vector.broadcast %134 : vector<16x1xf32> to vector<16x16xf32>
    %136 = arith.subf %132, %135 : vector<16x16xf32>
    %137 = math.exp %136 : vector<16x16xf32>
    %cst_44 = arith.constant dense<0.000000e+00> : vector<16xf32>
    %138 = vector.multi_reduction <add>, %137, %cst_44 [1] : vector<16x16xf32> to vector<16xf32>
    %139 = vector.shape_cast %138 : vector<16xf32> to vector<16x1xf32>
    %140 = tpu.reciprocal %139 {approx = true} : vector<16x1xf32> -> vector<16x1xf32>
    %141 = vector.broadcast %140 : vector<16x1xf32> to vector<16x16xf32>
    %142 = arith.mulf %137, %141 : vector<16x16xf32>
    %cst_45 = arith.constant dense<0.000000e+00> : vector<16x8xf32>
    %143 = tpu.matmul %142, %128, %cst_45 {dimension_numbers = #tpu.dot_dimension_numbers<[1], [0], [0], [1], [0, 0, 1, 1], [], []>} : vector<16x16xf32>, vector<16x8xf32>, vector<16x8xf32> -> vector<16x8xf32>
    %c64 = arith.constant 64 : index
    %c0_46 = arith.constant 0 : index
    %144 = vector.load %arg1[%c64, %c0_46] : memref<456x160xf32, #tpu.memory_space<vmem>>, vector<8x32xf32>
    %cst_47 = arith.constant dense<0.000000e+00> : vector<16x32xf32>
    %145 = tpu.matmul %143, %144, %cst_47 {dimension_numbers = #tpu.dot_dimension_numbers<[1], [0], [0], [1], [0, 0, 1, 1], [], []>} : vector<16x8xf32>, vector<8x32xf32>, vector<16x32xf32> -> vector<16x32xf32>
    %146 = arith.addf %125, %145 : vector<16x32xf32>
    %147 = arith.addf %16, %146 : vector<16x32xf32>
    %148 = vector.broadcast %21 : vector<1x32xf32> to vector<16x32xf32>
    %149 = arith.addf %147, %148 : vector<16x32xf32>
    %cst_48 = arith.constant dense<0.000000e+00> : vector<16xf32>
    %150 = vector.multi_reduction <add>, %149, %cst_48 [1] : vector<16x32xf32> to vector<16xf32>
    %151 = vector.shape_cast %150 : vector<16xf32> to vector<16x1xf32>
    %cst_49 = arith.constant 3.200000e+01 : f32
    %152 = vector.broadcast %cst_49 : f32 to vector<16x1xf32>
    %153 = arith.divf %151, %152 : vector<16x1xf32>
    %154 = vector.broadcast %153 : vector<16x1xf32> to vector<16x32xf32>
    %155 = arith.subf %149, %154 : vector<16x32xf32>
    %156 = arith.mulf %155, %155 : vector<16x32xf32>
    %cst_50 = arith.constant dense<0.000000e+00> : vector<16xf32>
    %157 = vector.multi_reduction <add>, %156, %cst_50 [1] : vector<16x32xf32> to vector<16xf32>
    %158 = vector.shape_cast %157 : vector<16xf32> to vector<16x1xf32>
    %cst_51 = arith.constant 3.200000e+01 : f32
    %159 = vector.broadcast %cst_51 : f32 to vector<16x1xf32>
    %160 = arith.divf %158, %159 : vector<16x1xf32>
    %161 = vector.broadcast %153 : vector<16x1xf32> to vector<16x32xf32>
    %162 = arith.subf %149, %161 : vector<16x32xf32>
    %cst_52 = arith.constant 9.99999974E-6 : f32
    %163 = vector.broadcast %cst_52 : f32 to vector<16x1xf32>
    %164 = arith.addf %160, %163 : vector<16x1xf32>
    %165 = math.rsqrt %164 : vector<16x1xf32>
    %166 = vector.broadcast %165 : vector<16x1xf32> to vector<16x32xf32>
    %167 = arith.mulf %162, %166 : vector<16x32xf32>
    %168 = vector.broadcast %22 : vector<1x32xf32> to vector<16x32xf32>
    %169 = arith.mulf %167, %168 : vector<16x32xf32>
    %170 = vector.broadcast %23 : vector<1x32xf32> to vector<16x32xf32>
    %171 = arith.addf %169, %170 : vector<16x32xf32>
    %c72 = arith.constant 72 : index
    %c0_53 = arith.constant 0 : index
    %172 = vector.load %arg1[%c72, %c0_53] : memref<456x160xf32, #tpu.memory_space<vmem>>, vector<32x68xf32>
    %cst_54 = arith.constant dense<0.000000e+00> : vector<16x68xf32>
    %173 = tpu.matmul %171, %172, %cst_54 {dimension_numbers = #tpu.dot_dimension_numbers<[1], [0], [0], [1], [0, 0, 1, 1], [], []>} : vector<16x32xf32>, vector<32x68xf32>, vector<16x68xf32> -> vector<16x68xf32>
    %174 = vector.extract_strided_slice %173 {offsets = [0, 0], sizes = [16, 64], strides = [1, 1]} : vector<16x68xf32> to vector<16x64xf32>
    %175 = vector.extract_strided_slice %173 {offsets = [0, 64], sizes = [16, 4], strides = [1, 1]} : vector<16x68xf32> to vector<16x4xf32>
    %cst_55 = arith.constant dense<0xFF800000> : vector<16xf32>
    %176 = vector.multi_reduction <maximumf>, %175, %cst_55 [1] : vector<16x4xf32> to vector<16xf32>
    %177 = vector.shape_cast %176 : vector<16xf32> to vector<16x1xf32>
    %178 = vector.broadcast %177 : vector<16x1xf32> to vector<16x4xf32>
    %179 = arith.subf %175, %178 : vector<16x4xf32>
    %180 = math.exp %179 : vector<16x4xf32>
    %cst_56 = arith.constant dense<0.000000e+00> : vector<16xf32>
    %181 = vector.multi_reduction <add>, %180, %cst_56 [1] : vector<16x4xf32> to vector<16xf32>
    %182 = vector.shape_cast %181 : vector<16xf32> to vector<16x1xf32>
    %183 = vector.broadcast %182 : vector<16x1xf32> to vector<16x4xf32>
    %184 = arith.divf %180, %183 : vector<16x4xf32>
    %cst_57 = arith.constant dense<0.000000e+00> : vector<4xf32>
    %185 = vector.multi_reduction <add>, %184, %cst_57 [0] : vector<16x4xf32> to vector<4xf32>
    %186 = vector.shape_cast %185 : vector<4xf32> to vector<1x4xf32>
    %cst_58 = arith.constant 1.600000e+01 : f32
    %187 = vector.broadcast %cst_58 : f32 to vector<1x4xf32>
    %188 = arith.divf %186, %187 : vector<1x4xf32>
    %cst_59 = arith.constant 1.000000e-10 : f32
    %189 = vector.broadcast %cst_59 : f32 to vector<1x4xf32>
    %190 = arith.addf %188, %189 : vector<1x4xf32>
    %191 = math.log %190 : vector<1x4xf32>
    %192 = arith.mulf %188, %191 : vector<1x4xf32>
    %cst_60 = arith.constant dense<0.000000e+00> : vector<1xf32>
    %193 = vector.multi_reduction <add>, %192, %cst_60 [1] : vector<1x4xf32> to vector<1xf32>
    %194 = vector.shape_cast %193 : vector<1xf32> to vector<1x1xf32>
    %cst_61 = arith.constant 0.00999999977 : f32
    %195 = vector.broadcast %cst_61 : f32 to vector<1x1xf32>
    %196 = arith.mulf %195, %194 : vector<1x1xf32>
    %197 = arith.addf %17, %196 : vector<1x1xf32>
    %cst_62 = arith.constant 0.000000e+00 : f32
    %198 = vector.broadcast %cst_62 : f32 to vector<16x4xf32>
    %199 = arith.subf %198, %175 : vector<16x4xf32>
    %200 = math.exp %199 : vector<16x4xf32>
    %cst_63 = arith.constant 1.000000e+00 : f32
    %201 = vector.broadcast %cst_63 : f32 to vector<16x4xf32>
    %202 = arith.addf %201, %200 : vector<16x4xf32>
    %cst_64 = arith.constant 1.000000e+00 : f32
    %203 = vector.broadcast %cst_64 : f32 to vector<16x4xf32>
    %204 = arith.divf %203, %202 : vector<16x4xf32>
    %cst_65 = arith.constant 0.000000e+00 : f32
    %205 = vector.broadcast %cst_65 : f32 to vector<16x4xf32>
    %206 = tpu.iota {dimensions = array<i32: 1>} : vector<16x4xi32>
    %cst_66 = arith.constant dense<0xFF800000> : vector<16xf32>
    %207 = vector.multi_reduction <maximumf>, %204, %cst_66 [1] : vector<16x4xf32> to vector<16xf32>
    %208 = vector.shape_cast %207 : vector<16xf32> to vector<16x1xf32>
    %209 = vector.broadcast %208 : vector<16x1xf32> to vector<16x4xf32>
    %210 = arith.cmpf oeq, %204, %209 : vector<16x4xf32>
    %c4_i32 = arith.constant 4 : i32
    %211 = vector.broadcast %c4_i32 : i32 to vector<16x4xi32>
    %212 = arith.select %210, %206, %211 : vector<16x4xi1>, vector<16x4xi32>
    %cst_67 = arith.constant dense<2147483647> : vector<16xi32>
    %213 = vector.multi_reduction <minsi>, %212, %cst_67 [1] : vector<16x4xi32> to vector<16xi32>
    %214 = vector.shape_cast %213 : vector<16xi32> to vector<16x1xi32>
    %215 = vector.broadcast %214 : vector<16x1xi32> to vector<16x4xi32>
    %216 = arith.cmpi eq, %206, %215 : vector<16x4xi32>
    %217 = arith.select %216, %204, %205 : vector<16x4xi1>, vector<16x4xf32>
    %cst_68 = arith.constant -1.000000e+30 : f32
    %218 = vector.broadcast %cst_68 : f32 to vector<16x4xf32>
    %219 = arith.select %216, %218, %204 : vector<16x4xi1>, vector<16x4xf32>
    %cst_69 = arith.constant dense<0xFF800000> : vector<16xf32>
    %220 = vector.multi_reduction <maximumf>, %219, %cst_69 [1] : vector<16x4xf32> to vector<16xf32>
    %221 = vector.shape_cast %220 : vector<16xf32> to vector<16x1xf32>
    %222 = vector.broadcast %221 : vector<16x1xf32> to vector<16x4xf32>
    %223 = arith.cmpf oeq, %219, %222 : vector<16x4xf32>
    %c4_i32_70 = arith.constant 4 : i32
    %224 = vector.broadcast %c4_i32_70 : i32 to vector<16x4xi32>
    %225 = arith.select %223, %206, %224 : vector<16x4xi1>, vector<16x4xi32>
    %cst_71 = arith.constant dense<2147483647> : vector<16xi32>
    %226 = vector.multi_reduction <minsi>, %225, %cst_71 [1] : vector<16x4xi32> to vector<16xi32>
    %227 = vector.shape_cast %226 : vector<16xi32> to vector<16x1xi32>
    %228 = vector.broadcast %227 : vector<16x1xi32> to vector<16x4xi32>
    %229 = arith.cmpi eq, %206, %228 : vector<16x4xi32>
    %230 = arith.select %229, %204, %217 : vector<16x4xi1>, vector<16x4xf32>
    %cst_72 = arith.constant 0.000000e+00 : f32
    %231 = vector.broadcast %cst_72 : f32 to vector<16x64xf32>
    %232 = arith.maximumf %174, %231 : vector<16x64xf32>
    %cst_73 = arith.constant dense<0.000000e+00> : vector<16x64xf32>
    %233 = tpu.matmul %230, %12, %cst_73 {dimension_numbers = #tpu.dot_dimension_numbers<[1], [0], [0], [1], [0, 0, 1, 1], [], []>} : vector<16x4xf32>, vector<4x64xf32>, vector<16x64xf32> -> vector<16x64xf32>
    %234 = arith.mulf %232, %233 : vector<16x64xf32>
    %c104 = arith.constant 104 : index
    %c0_74 = arith.constant 0 : index
    %235 = vector.load %arg1[%c104, %c0_74] : memref<456x160xf32, #tpu.memory_space<vmem>>, vector<64x32xf32>
    %cst_75 = arith.constant dense<0.000000e+00> : vector<16x32xf32>
    %236 = tpu.matmul %234, %235, %cst_75 {dimension_numbers = #tpu.dot_dimension_numbers<[1], [0], [0], [1], [0, 0, 1, 1], [], []>} : vector<16x64xf32>, vector<64x32xf32>, vector<16x32xf32> -> vector<16x32xf32>
    %237 = arith.addf %149, %236 : vector<16x32xf32>
    %c344 = arith.constant 344 : index
    %c0_76 = arith.constant 0 : index
    %238 = vector.load %arg1[%c344, %c0_76] : memref<456x160xf32, #tpu.memory_space<vmem>>, vector<8x32xf32>
    %239 = vector.extract_strided_slice %238 {offsets = [0, 0], sizes = [1, 32], strides = [1, 1]} : vector<8x32xf32> to vector<1x32xf32>
    %240 = vector.extract_strided_slice %238 {offsets = [1, 0], sizes = [1, 32], strides = [1, 1]} : vector<8x32xf32> to vector<1x32xf32>
    %241 = vector.extract_strided_slice %238 {offsets = [2, 0], sizes = [1, 32], strides = [1, 1]} : vector<8x32xf32> to vector<1x32xf32>
    %242 = vector.extract_strided_slice %238 {offsets = [3, 0], sizes = [1, 32], strides = [1, 1]} : vector<8x32xf32> to vector<1x32xf32>
    %243 = vector.extract_strided_slice %238 {offsets = [4, 0], sizes = [1, 32], strides = [1, 1]} : vector<8x32xf32> to vector<1x32xf32>
    %cst_77 = arith.constant dense<0.000000e+00> : vector<16xf32>
    %244 = vector.multi_reduction <add>, %237, %cst_77 [1] : vector<16x32xf32> to vector<16xf32>
    %245 = vector.shape_cast %244 : vector<16xf32> to vector<16x1xf32>
    %cst_78 = arith.constant 3.200000e+01 : f32
    %246 = vector.broadcast %cst_78 : f32 to vector<16x1xf32>
    %247 = arith.divf %245, %246 : vector<16x1xf32>
    %248 = vector.broadcast %247 : vector<16x1xf32> to vector<16x32xf32>
    %249 = arith.subf %237, %248 : vector<16x32xf32>
    %250 = arith.mulf %249, %249 : vector<16x32xf32>
    %cst_79 = arith.constant dense<0.000000e+00> : vector<16xf32>
    %251 = vector.multi_reduction <add>, %250, %cst_79 [1] : vector<16x32xf32> to vector<16xf32>
    %252 = vector.shape_cast %251 : vector<16xf32> to vector<16x1xf32>
    %cst_80 = arith.constant 3.200000e+01 : f32
    %253 = vector.broadcast %cst_80 : f32 to vector<16x1xf32>
    %254 = arith.divf %252, %253 : vector<16x1xf32>
    %255 = vector.broadcast %247 : vector<16x1xf32> to vector<16x32xf32>
    %256 = arith.subf %237, %255 : vector<16x32xf32>
    %cst_81 = arith.constant 9.99999974E-6 : f32
    %257 = vector.broadcast %cst_81 : f32 to vector<16x1xf32>
    %258 = arith.addf %254, %257 : vector<16x1xf32>
    %259 = math.rsqrt %258 : vector<16x1xf32>
    %260 = vector.broadcast %259 : vector<16x1xf32> to vector<16x32xf32>
    %261 = arith.mulf %256, %260 : vector<16x32xf32>
    %262 = vector.broadcast %239 : vector<1x32xf32> to vector<16x32xf32>
    %263 = arith.mulf %261, %262 : vector<16x32xf32>
    %264 = vector.broadcast %240 : vector<1x32xf32> to vector<16x32xf32>
    %265 = arith.addf %263, %264 : vector<16x32xf32>
    %c176 = arith.constant 176 : index
    %c0_82 = arith.constant 0 : index
    %266 = vector.load %arg1[%c176, %c0_82] : memref<456x160xf32, #tpu.memory_space<vmem>>, vector<32x160xf32>
    %c208 = arith.constant 208 : index
    %c0_83 = arith.constant 0 : index
    %267 = vector.load %arg1[%c208, %c0_83] : memref<456x160xf32, #tpu.memory_space<vmem>>, vector<1x160xf32>
    %cst_84 = arith.constant dense<0.000000e+00> : vector<16x160xf32>
    %268 = tpu.matmul %265, %266, %cst_84 {dimension_numbers = #tpu.dot_dimension_numbers<[1], [0], [0], [1], [0, 0, 1, 1], [], []>} : vector<16x32xf32>, vector<32x160xf32>, vector<16x160xf32> -> vector<16x160xf32>
    %269 = vector.broadcast %267 : vector<1x160xf32> to vector<16x160xf32>
    %270 = arith.addf %268, %269 : vector<16x160xf32>
    %271 = vector.extract_strided_slice %270 {offsets = [0, 0], sizes = [16, 32], strides = [1, 1]} : vector<16x160xf32> to vector<16x32xf32>
    %272 = vector.extract_strided_slice %270 {offsets = [0, 32], sizes = [16, 32], strides = [1, 1]} : vector<16x160xf32> to vector<16x32xf32>
    %273 = vector.extract_strided_slice %270 {offsets = [0, 64], sizes = [16, 32], strides = [1, 1]} : vector<16x160xf32> to vector<16x32xf32>
    %274 = vector.extract_strided_slice %270 {offsets = [0, 96], sizes = [16, 32], strides = [1, 1]} : vector<16x160xf32> to vector<16x32xf32>
    %275 = vector.extract_strided_slice %270 {offsets = [0, 128], sizes = [16, 32], strides = [1, 1]} : vector<16x160xf32> to vector<16x32xf32>
    %276 = arith.mulf %271, %9 : vector<16x32xf32>
    %277 = arith.mulf %272, %10 : vector<16x32xf32>
    %278 = arith.addf %276, %277 : vector<16x32xf32>
    %279 = arith.mulf %273, %9 : vector<16x32xf32>
    %280 = arith.mulf %274, %10 : vector<16x32xf32>
    %281 = arith.addf %279, %280 : vector<16x32xf32>
    %cst_85 = arith.constant 0.000000e+00 : f32
    %282 = vector.broadcast %cst_85 : f32 to vector<16x32xf32>
    %283 = vector.extract_strided_slice %278 {offsets = [0, 0], sizes = [16, 8], strides = [1, 1]} : vector<16x32xf32> to vector<16x8xf32>
    %284 = vector.extract_strided_slice %281 {offsets = [0, 0], sizes = [16, 8], strides = [1, 1]} : vector<16x32xf32> to vector<16x8xf32>
    %285 = vector.extract_strided_slice %275 {offsets = [0, 0], sizes = [16, 8], strides = [1, 1]} : vector<16x32xf32> to vector<16x8xf32>
    %cst_86 = arith.constant dense<0.000000e+00> : vector<16x16xf32>
    %286 = tpu.matmul %283, %284, %cst_86 {dimension_numbers = #tpu.dot_dimension_numbers<[1], [1], [0], [0], [0, 0, 1, 0], [], []>} : vector<16x8xf32>, vector<16x8xf32>, vector<16x16xf32> -> vector<16x16xf32>
    %cst_87 = arith.constant 0.353553385 : f32
    %287 = vector.broadcast %cst_87 : f32 to vector<16x16xf32>
    %288 = arith.mulf %286, %287 : vector<16x16xf32>
    %289 = arith.addf %288, %11 : vector<16x16xf32>
    %cst_88 = arith.constant dense<0xFF800000> : vector<16xf32>
    %290 = vector.multi_reduction <maximumf>, %289, %cst_88 [1] : vector<16x16xf32> to vector<16xf32>
    %291 = vector.shape_cast %290 : vector<16xf32> to vector<16x1xf32>
    %292 = vector.broadcast %291 : vector<16x1xf32> to vector<16x16xf32>
    %293 = arith.subf %289, %292 : vector<16x16xf32>
    %294 = math.exp %293 : vector<16x16xf32>
    %cst_89 = arith.constant dense<0.000000e+00> : vector<16xf32>
    %295 = vector.multi_reduction <add>, %294, %cst_89 [1] : vector<16x16xf32> to vector<16xf32>
    %296 = vector.shape_cast %295 : vector<16xf32> to vector<16x1xf32>
    %297 = tpu.reciprocal %296 {approx = true} : vector<16x1xf32> -> vector<16x1xf32>
    %298 = vector.broadcast %297 : vector<16x1xf32> to vector<16x16xf32>
    %299 = arith.mulf %294, %298 : vector<16x16xf32>
    %cst_90 = arith.constant dense<0.000000e+00> : vector<16x8xf32>
    %300 = tpu.matmul %299, %285, %cst_90 {dimension_numbers = #tpu.dot_dimension_numbers<[1], [0], [0], [1], [0, 0, 1, 1], [], []>} : vector<16x16xf32>, vector<16x8xf32>, vector<16x8xf32> -> vector<16x8xf32>
    %c216 = arith.constant 216 : index
    %c0_91 = arith.constant 0 : index
    %301 = vector.load %arg1[%c216, %c0_91] : memref<456x160xf32, #tpu.memory_space<vmem>>, vector<8x32xf32>
    %cst_92 = arith.constant dense<0.000000e+00> : vector<16x32xf32>
    %302 = tpu.matmul %300, %301, %cst_92 {dimension_numbers = #tpu.dot_dimension_numbers<[1], [0], [0], [1], [0, 0, 1, 1], [], []>} : vector<16x8xf32>, vector<8x32xf32>, vector<16x32xf32> -> vector<16x32xf32>
    %303 = arith.addf %282, %302 : vector<16x32xf32>
    %304 = vector.extract_strided_slice %278 {offsets = [0, 8], sizes = [16, 8], strides = [1, 1]} : vector<16x32xf32> to vector<16x8xf32>
    %305 = vector.extract_strided_slice %281 {offsets = [0, 8], sizes = [16, 8], strides = [1, 1]} : vector<16x32xf32> to vector<16x8xf32>
    %306 = vector.extract_strided_slice %275 {offsets = [0, 8], sizes = [16, 8], strides = [1, 1]} : vector<16x32xf32> to vector<16x8xf32>
    %cst_93 = arith.constant dense<0.000000e+00> : vector<16x16xf32>
    %307 = tpu.matmul %304, %305, %cst_93 {dimension_numbers = #tpu.dot_dimension_numbers<[1], [1], [0], [0], [0, 0, 1, 0], [], []>} : vector<16x8xf32>, vector<16x8xf32>, vector<16x16xf32> -> vector<16x16xf32>
    %cst_94 = arith.constant 0.353553385 : f32
    %308 = vector.broadcast %cst_94 : f32 to vector<16x16xf32>
    %309 = arith.mulf %307, %308 : vector<16x16xf32>
    %310 = arith.addf %309, %11 : vector<16x16xf32>
    %cst_95 = arith.constant dense<0xFF800000> : vector<16xf32>
    %311 = vector.multi_reduction <maximumf>, %310, %cst_95 [1] : vector<16x16xf32> to vector<16xf32>
    %312 = vector.shape_cast %311 : vector<16xf32> to vector<16x1xf32>
    %313 = vector.broadcast %312 : vector<16x1xf32> to vector<16x16xf32>
    %314 = arith.subf %310, %313 : vector<16x16xf32>
    %315 = math.exp %314 : vector<16x16xf32>
    %cst_96 = arith.constant dense<0.000000e+00> : vector<16xf32>
    %316 = vector.multi_reduction <add>, %315, %cst_96 [1] : vector<16x16xf32> to vector<16xf32>
    %317 = vector.shape_cast %316 : vector<16xf32> to vector<16x1xf32>
    %318 = tpu.reciprocal %317 {approx = true} : vector<16x1xf32> -> vector<16x1xf32>
    %319 = vector.broadcast %318 : vector<16x1xf32> to vector<16x16xf32>
    %320 = arith.mulf %315, %319 : vector<16x16xf32>
    %cst_97 = arith.constant dense<0.000000e+00> : vector<16x8xf32>
    %321 = tpu.matmul %320, %306, %cst_97 {dimension_numbers = #tpu.dot_dimension_numbers<[1], [0], [0], [1], [0, 0, 1, 1], [], []>} : vector<16x16xf32>, vector<16x8xf32>, vector<16x8xf32> -> vector<16x8xf32>
    %c224 = arith.constant 224 : index
    %c0_98 = arith.constant 0 : index
    %322 = vector.load %arg1[%c224, %c0_98] : memref<456x160xf32, #tpu.memory_space<vmem>>, vector<8x32xf32>
    %cst_99 = arith.constant dense<0.000000e+00> : vector<16x32xf32>
    %323 = tpu.matmul %321, %322, %cst_99 {dimension_numbers = #tpu.dot_dimension_numbers<[1], [0], [0], [1], [0, 0, 1, 1], [], []>} : vector<16x8xf32>, vector<8x32xf32>, vector<16x32xf32> -> vector<16x32xf32>
    %324 = arith.addf %303, %323 : vector<16x32xf32>
    %325 = vector.extract_strided_slice %278 {offsets = [0, 16], sizes = [16, 8], strides = [1, 1]} : vector<16x32xf32> to vector<16x8xf32>
    %326 = vector.extract_strided_slice %281 {offsets = [0, 16], sizes = [16, 8], strides = [1, 1]} : vector<16x32xf32> to vector<16x8xf32>
    %327 = vector.extract_strided_slice %275 {offsets = [0, 16], sizes = [16, 8], strides = [1, 1]} : vector<16x32xf32> to vector<16x8xf32>
    %cst_100 = arith.constant dense<0.000000e+00> : vector<16x16xf32>
    %328 = tpu.matmul %325, %326, %cst_100 {dimension_numbers = #tpu.dot_dimension_numbers<[1], [1], [0], [0], [0, 0, 1, 0], [], []>} : vector<16x8xf32>, vector<16x8xf32>, vector<16x16xf32> -> vector<16x16xf32>
    %cst_101 = arith.constant 0.353553385 : f32
    %329 = vector.broadcast %cst_101 : f32 to vector<16x16xf32>
    %330 = arith.mulf %328, %329 : vector<16x16xf32>
    %331 = arith.addf %330, %11 : vector<16x16xf32>
    %cst_102 = arith.constant dense<0xFF800000> : vector<16xf32>
    %332 = vector.multi_reduction <maximumf>, %331, %cst_102 [1] : vector<16x16xf32> to vector<16xf32>
    %333 = vector.shape_cast %332 : vector<16xf32> to vector<16x1xf32>
    %334 = vector.broadcast %333 : vector<16x1xf32> to vector<16x16xf32>
    %335 = arith.subf %331, %334 : vector<16x16xf32>
    %336 = math.exp %335 : vector<16x16xf32>
    %cst_103 = arith.constant dense<0.000000e+00> : vector<16xf32>
    %337 = vector.multi_reduction <add>, %336, %cst_103 [1] : vector<16x16xf32> to vector<16xf32>
    %338 = vector.shape_cast %337 : vector<16xf32> to vector<16x1xf32>
    %339 = tpu.reciprocal %338 {approx = true} : vector<16x1xf32> -> vector<16x1xf32>
    %340 = vector.broadcast %339 : vector<16x1xf32> to vector<16x16xf32>
    %341 = arith.mulf %336, %340 : vector<16x16xf32>
    %cst_104 = arith.constant dense<0.000000e+00> : vector<16x8xf32>
    %342 = tpu.matmul %341, %327, %cst_104 {dimension_numbers = #tpu.dot_dimension_numbers<[1], [0], [0], [1], [0, 0, 1, 1], [], []>} : vector<16x16xf32>, vector<16x8xf32>, vector<16x8xf32> -> vector<16x8xf32>
    %c232 = arith.constant 232 : index
    %c0_105 = arith.constant 0 : index
    %343 = vector.load %arg1[%c232, %c0_105] : memref<456x160xf32, #tpu.memory_space<vmem>>, vector<8x32xf32>
    %cst_106 = arith.constant dense<0.000000e+00> : vector<16x32xf32>
    %344 = tpu.matmul %342, %343, %cst_106 {dimension_numbers = #tpu.dot_dimension_numbers<[1], [0], [0], [1], [0, 0, 1, 1], [], []>} : vector<16x8xf32>, vector<8x32xf32>, vector<16x32xf32> -> vector<16x32xf32>
    %345 = arith.addf %324, %344 : vector<16x32xf32>
    %346 = vector.extract_strided_slice %278 {offsets = [0, 24], sizes = [16, 8], strides = [1, 1]} : vector<16x32xf32> to vector<16x8xf32>
    %347 = vector.extract_strided_slice %281 {offsets = [0, 24], sizes = [16, 8], strides = [1, 1]} : vector<16x32xf32> to vector<16x8xf32>
    %348 = vector.extract_strided_slice %275 {offsets = [0, 24], sizes = [16, 8], strides = [1, 1]} : vector<16x32xf32> to vector<16x8xf32>
    %cst_107 = arith.constant dense<0.000000e+00> : vector<16x16xf32>
    %349 = tpu.matmul %346, %347, %cst_107 {dimension_numbers = #tpu.dot_dimension_numbers<[1], [1], [0], [0], [0, 0, 1, 0], [], []>} : vector<16x8xf32>, vector<16x8xf32>, vector<16x16xf32> -> vector<16x16xf32>
    %cst_108 = arith.constant 0.353553385 : f32
    %350 = vector.broadcast %cst_108 : f32 to vector<16x16xf32>
    %351 = arith.mulf %349, %350 : vector<16x16xf32>
    %352 = arith.addf %351, %11 : vector<16x16xf32>
    %cst_109 = arith.constant dense<0xFF800000> : vector<16xf32>
    %353 = vector.multi_reduction <maximumf>, %352, %cst_109 [1] : vector<16x16xf32> to vector<16xf32>
    %354 = vector.shape_cast %353 : vector<16xf32> to vector<16x1xf32>
    %355 = vector.broadcast %354 : vector<16x1xf32> to vector<16x16xf32>
    %356 = arith.subf %352, %355 : vector<16x16xf32>
    %357 = math.exp %356 : vector<16x16xf32>
    %cst_110 = arith.constant dense<0.000000e+00> : vector<16xf32>
    %358 = vector.multi_reduction <add>, %357, %cst_110 [1] : vector<16x16xf32> to vector<16xf32>
    %359 = vector.shape_cast %358 : vector<16xf32> to vector<16x1xf32>
    %360 = tpu.reciprocal %359 {approx = true} : vector<16x1xf32> -> vector<16x1xf32>
    %361 = vector.broadcast %360 : vector<16x1xf32> to vector<16x16xf32>
    %362 = arith.mulf %357, %361 : vector<16x16xf32>
    %cst_111 = arith.constant dense<0.000000e+00> : vector<16x8xf32>
    %363 = tpu.matmul %362, %348, %cst_111 {dimension_numbers = #tpu.dot_dimension_numbers<[1], [0], [0], [1], [0, 0, 1, 1], [], []>} : vector<16x16xf32>, vector<16x8xf32>, vector<16x8xf32> -> vector<16x8xf32>
    %c240 = arith.constant 240 : index
    %c0_112 = arith.constant 0 : index
    %364 = vector.load %arg1[%c240, %c0_112] : memref<456x160xf32, #tpu.memory_space<vmem>>, vector<8x32xf32>
    %cst_113 = arith.constant dense<0.000000e+00> : vector<16x32xf32>
    %365 = tpu.matmul %363, %364, %cst_113 {dimension_numbers = #tpu.dot_dimension_numbers<[1], [0], [0], [1], [0, 0, 1, 1], [], []>} : vector<16x8xf32>, vector<8x32xf32>, vector<16x32xf32> -> vector<16x32xf32>
    %366 = arith.addf %345, %365 : vector<16x32xf32>
    %367 = arith.addf %237, %366 : vector<16x32xf32>
    %368 = vector.broadcast %241 : vector<1x32xf32> to vector<16x32xf32>
    %369 = arith.addf %367, %368 : vector<16x32xf32>
    %cst_114 = arith.constant dense<0.000000e+00> : vector<16xf32>
    %370 = vector.multi_reduction <add>, %369, %cst_114 [1] : vector<16x32xf32> to vector<16xf32>
    %371 = vector.shape_cast %370 : vector<16xf32> to vector<16x1xf32>
    %cst_115 = arith.constant 3.200000e+01 : f32
    %372 = vector.broadcast %cst_115 : f32 to vector<16x1xf32>
    %373 = arith.divf %371, %372 : vector<16x1xf32>
    %374 = vector.broadcast %373 : vector<16x1xf32> to vector<16x32xf32>
    %375 = arith.subf %369, %374 : vector<16x32xf32>
    %376 = arith.mulf %375, %375 : vector<16x32xf32>
    %cst_116 = arith.constant dense<0.000000e+00> : vector<16xf32>
    %377 = vector.multi_reduction <add>, %376, %cst_116 [1] : vector<16x32xf32> to vector<16xf32>
    %378 = vector.shape_cast %377 : vector<16xf32> to vector<16x1xf32>
    %cst_117 = arith.constant 3.200000e+01 : f32
    %379 = vector.broadcast %cst_117 : f32 to vector<16x1xf32>
    %380 = arith.divf %378, %379 : vector<16x1xf32>
    %381 = vector.broadcast %373 : vector<16x1xf32> to vector<16x32xf32>
    %382 = arith.subf %369, %381 : vector<16x32xf32>
    %cst_118 = arith.constant 9.99999974E-6 : f32
    %383 = vector.broadcast %cst_118 : f32 to vector<16x1xf32>
    %384 = arith.addf %380, %383 : vector<16x1xf32>
    %385 = math.rsqrt %384 : vector<16x1xf32>
    %386 = vector.broadcast %385 : vector<16x1xf32> to vector<16x32xf32>
    %387 = arith.mulf %382, %386 : vector<16x32xf32>
    %388 = vector.broadcast %242 : vector<1x32xf32> to vector<16x32xf32>
    %389 = arith.mulf %387, %388 : vector<16x32xf32>
    %390 = vector.broadcast %243 : vector<1x32xf32> to vector<16x32xf32>
    %391 = arith.addf %389, %390 : vector<16x32xf32>
    %c248 = arith.constant 248 : index
    %c0_119 = arith.constant 0 : index
    %392 = vector.load %arg1[%c248, %c0_119] : memref<456x160xf32, #tpu.memory_space<vmem>>, vector<32x68xf32>
    %cst_120 = arith.constant dense<0.000000e+00> : vector<16x68xf32>
    %393 = tpu.matmul %391, %392, %cst_120 {dimension_numbers = #tpu.dot_dimension_numbers<[1], [0], [0], [1], [0, 0, 1, 1], [], []>} : vector<16x32xf32>, vector<32x68xf32>, vector<16x68xf32> -> vector<16x68xf32>
    %394 = vector.extract_strided_slice %393 {offsets = [0, 0], sizes = [16, 64], strides = [1, 1]} : vector<16x68xf32> to vector<16x64xf32>
    %395 = vector.extract_strided_slice %393 {offsets = [0, 64], sizes = [16, 4], strides = [1, 1]} : vector<16x68xf32> to vector<16x4xf32>
    %cst_121 = arith.constant dense<0xFF800000> : vector<16xf32>
    %396 = vector.multi_reduction <maximumf>, %395, %cst_121 [1] : vector<16x4xf32> to vector<16xf32>
    %397 = vector.shape_cast %396 : vector<16xf32> to vector<16x1xf32>
    %398 = vector.broadcast %397 : vector<16x1xf32> to vector<16x4xf32>
    %399 = arith.subf %395, %398 : vector<16x4xf32>
    %400 = math.exp %399 : vector<16x4xf32>
    %cst_122 = arith.constant dense<0.000000e+00> : vector<16xf32>
    %401 = vector.multi_reduction <add>, %400, %cst_122 [1] : vector<16x4xf32> to vector<16xf32>
    %402 = vector.shape_cast %401 : vector<16xf32> to vector<16x1xf32>
    %403 = vector.broadcast %402 : vector<16x1xf32> to vector<16x4xf32>
    %404 = arith.divf %400, %403 : vector<16x4xf32>
    %cst_123 = arith.constant dense<0.000000e+00> : vector<4xf32>
    %405 = vector.multi_reduction <add>, %404, %cst_123 [0] : vector<16x4xf32> to vector<4xf32>
    %406 = vector.shape_cast %405 : vector<4xf32> to vector<1x4xf32>
    %cst_124 = arith.constant 1.600000e+01 : f32
    %407 = vector.broadcast %cst_124 : f32 to vector<1x4xf32>
    %408 = arith.divf %406, %407 : vector<1x4xf32>
    %cst_125 = arith.constant 1.000000e-10 : f32
    %409 = vector.broadcast %cst_125 : f32 to vector<1x4xf32>
    %410 = arith.addf %408, %409 : vector<1x4xf32>
    %411 = math.log %410 : vector<1x4xf32>
    %412 = arith.mulf %408, %411 : vector<1x4xf32>
    %cst_126 = arith.constant dense<0.000000e+00> : vector<1xf32>
    %413 = vector.multi_reduction <add>, %412, %cst_126 [1] : vector<1x4xf32> to vector<1xf32>
    %414 = vector.shape_cast %413 : vector<1xf32> to vector<1x1xf32>
    %cst_127 = arith.constant 0.00999999977 : f32
    %415 = vector.broadcast %cst_127 : f32 to vector<1x1xf32>
    %416 = arith.mulf %415, %414 : vector<1x1xf32>
    %417 = arith.addf %197, %416 : vector<1x1xf32>
    %cst_128 = arith.constant 0.000000e+00 : f32
    %418 = vector.broadcast %cst_128 : f32 to vector<16x4xf32>
    %419 = arith.subf %418, %395 : vector<16x4xf32>
    %420 = math.exp %419 : vector<16x4xf32>
    %cst_129 = arith.constant 1.000000e+00 : f32
    %421 = vector.broadcast %cst_129 : f32 to vector<16x4xf32>
    %422 = arith.addf %421, %420 : vector<16x4xf32>
    %cst_130 = arith.constant 1.000000e+00 : f32
    %423 = vector.broadcast %cst_130 : f32 to vector<16x4xf32>
    %424 = arith.divf %423, %422 : vector<16x4xf32>
    %cst_131 = arith.constant 0.000000e+00 : f32
    %425 = vector.broadcast %cst_131 : f32 to vector<16x4xf32>
    %426 = tpu.iota {dimensions = array<i32: 1>} : vector<16x4xi32>
    %cst_132 = arith.constant dense<0xFF800000> : vector<16xf32>
    %427 = vector.multi_reduction <maximumf>, %424, %cst_132 [1] : vector<16x4xf32> to vector<16xf32>
    %428 = vector.shape_cast %427 : vector<16xf32> to vector<16x1xf32>
    %429 = vector.broadcast %428 : vector<16x1xf32> to vector<16x4xf32>
    %430 = arith.cmpf oeq, %424, %429 : vector<16x4xf32>
    %c4_i32_133 = arith.constant 4 : i32
    %431 = vector.broadcast %c4_i32_133 : i32 to vector<16x4xi32>
    %432 = arith.select %430, %426, %431 : vector<16x4xi1>, vector<16x4xi32>
    %cst_134 = arith.constant dense<2147483647> : vector<16xi32>
    %433 = vector.multi_reduction <minsi>, %432, %cst_134 [1] : vector<16x4xi32> to vector<16xi32>
    %434 = vector.shape_cast %433 : vector<16xi32> to vector<16x1xi32>
    %435 = vector.broadcast %434 : vector<16x1xi32> to vector<16x4xi32>
    %436 = arith.cmpi eq, %426, %435 : vector<16x4xi32>
    %437 = arith.select %436, %424, %425 : vector<16x4xi1>, vector<16x4xf32>
    %cst_135 = arith.constant -1.000000e+30 : f32
    %438 = vector.broadcast %cst_135 : f32 to vector<16x4xf32>
    %439 = arith.select %436, %438, %424 : vector<16x4xi1>, vector<16x4xf32>
    %cst_136 = arith.constant dense<0xFF800000> : vector<16xf32>
    %440 = vector.multi_reduction <maximumf>, %439, %cst_136 [1] : vector<16x4xf32> to vector<16xf32>
    %441 = vector.shape_cast %440 : vector<16xf32> to vector<16x1xf32>
    %442 = vector.broadcast %441 : vector<16x1xf32> to vector<16x4xf32>
    %443 = arith.cmpf oeq, %439, %442 : vector<16x4xf32>
    %c4_i32_137 = arith.constant 4 : i32
    %444 = vector.broadcast %c4_i32_137 : i32 to vector<16x4xi32>
    %445 = arith.select %443, %426, %444 : vector<16x4xi1>, vector<16x4xi32>
    %cst_138 = arith.constant dense<2147483647> : vector<16xi32>
    %446 = vector.multi_reduction <minsi>, %445, %cst_138 [1] : vector<16x4xi32> to vector<16xi32>
    %447 = vector.shape_cast %446 : vector<16xi32> to vector<16x1xi32>
    %448 = vector.broadcast %447 : vector<16x1xi32> to vector<16x4xi32>
    %449 = arith.cmpi eq, %426, %448 : vector<16x4xi32>
    %450 = arith.select %449, %424, %437 : vector<16x4xi1>, vector<16x4xf32>
    %cst_139 = arith.constant 0.000000e+00 : f32
    %451 = vector.broadcast %cst_139 : f32 to vector<16x64xf32>
    %452 = arith.maximumf %394, %451 : vector<16x64xf32>
    %cst_140 = arith.constant dense<0.000000e+00> : vector<16x64xf32>
    %453 = tpu.matmul %450, %12, %cst_140 {dimension_numbers = #tpu.dot_dimension_numbers<[1], [0], [0], [1], [0, 0, 1, 1], [], []>} : vector<16x4xf32>, vector<4x64xf32>, vector<16x64xf32> -> vector<16x64xf32>
    %454 = arith.mulf %452, %453 : vector<16x64xf32>
    %c280 = arith.constant 280 : index
    %c0_141 = arith.constant 0 : index
    %455 = vector.load %arg1[%c280, %c0_141] : memref<456x160xf32, #tpu.memory_space<vmem>>, vector<64x32xf32>
    %cst_142 = arith.constant dense<0.000000e+00> : vector<16x32xf32>
    %456 = tpu.matmul %454, %455, %cst_142 {dimension_numbers = #tpu.dot_dimension_numbers<[1], [0], [0], [1], [0, 0, 1, 1], [], []>} : vector<16x64xf32>, vector<64x32xf32>, vector<16x32xf32> -> vector<16x32xf32>
    %457 = arith.addf %369, %456 : vector<16x32xf32>
    %cst_143 = arith.constant dense<0.000000e+00> : vector<16xf32>
    %458 = vector.multi_reduction <add>, %457, %cst_143 [1] : vector<16x32xf32> to vector<16xf32>
    %459 = vector.shape_cast %458 : vector<16xf32> to vector<16x1xf32>
    %cst_144 = arith.constant 3.200000e+01 : f32
    %460 = vector.broadcast %cst_144 : f32 to vector<16x1xf32>
    %461 = arith.divf %459, %460 : vector<16x1xf32>
    %462 = vector.broadcast %461 : vector<16x1xf32> to vector<16x32xf32>
    %463 = arith.subf %457, %462 : vector<16x32xf32>
    %464 = arith.mulf %463, %463 : vector<16x32xf32>
    %cst_145 = arith.constant dense<0.000000e+00> : vector<16xf32>
    %465 = vector.multi_reduction <add>, %464, %cst_145 [1] : vector<16x32xf32> to vector<16xf32>
    %466 = vector.shape_cast %465 : vector<16xf32> to vector<16x1xf32>
    %cst_146 = arith.constant 3.200000e+01 : f32
    %467 = vector.broadcast %cst_146 : f32 to vector<16x1xf32>
    %468 = arith.divf %466, %467 : vector<16x1xf32>
    %469 = vector.broadcast %461 : vector<16x1xf32> to vector<16x32xf32>
    %470 = arith.subf %457, %469 : vector<16x32xf32>
    %cst_147 = arith.constant 9.99999974E-6 : f32
    %471 = vector.broadcast %cst_147 : f32 to vector<16x1xf32>
    %472 = arith.addf %468, %471 : vector<16x1xf32>
    %473 = math.rsqrt %472 : vector<16x1xf32>
    %474 = vector.broadcast %473 : vector<16x1xf32> to vector<16x32xf32>
    %475 = arith.mulf %470, %474 : vector<16x32xf32>
    %476 = vector.broadcast %3 : vector<1x32xf32> to vector<16x32xf32>
    %477 = arith.mulf %475, %476 : vector<16x32xf32>
    %478 = vector.broadcast %4 : vector<1x32xf32> to vector<16x32xf32>
    %479 = arith.addf %477, %478 : vector<16x32xf32>
    %480 = vector.extract_strided_slice %479 {offsets = [7, 0], sizes = [1, 32], strides = [1, 1]} : vector<16x32xf32> to vector<1x32xf32>
    %481 = vector.extract_strided_slice %479 {offsets = [15, 0], sizes = [1, 32], strides = [1, 1]} : vector<16x32xf32> to vector<1x32xf32>
    %482 = tpu.concatenate %480, %481 in 0 : vector<1x32xf32>, vector<1x32xf32> -> vector<2x32xf32>
    %cst_148 = arith.constant dense<0.000000e+00> : vector<2xf32>
    %483 = vector.multi_reduction <add>, %482, %cst_148 [1] : vector<2x32xf32> to vector<2xf32>
    %484 = vector.shape_cast %483 : vector<2xf32> to vector<2x1xf32>
    %cst_149 = arith.constant 3.200000e+01 : f32
    %485 = vector.broadcast %cst_149 : f32 to vector<2x1xf32>
    %486 = arith.divf %484, %485 : vector<2x1xf32>
    %487 = vector.broadcast %486 : vector<2x1xf32> to vector<2x32xf32>
    %488 = arith.subf %482, %487 : vector<2x32xf32>
    %489 = arith.mulf %488, %488 : vector<2x32xf32>
    %cst_150 = arith.constant dense<0.000000e+00> : vector<2xf32>
    %490 = vector.multi_reduction <add>, %489, %cst_150 [1] : vector<2x32xf32> to vector<2xf32>
    %491 = vector.shape_cast %490 : vector<2xf32> to vector<2x1xf32>
    %cst_151 = arith.constant 3.200000e+01 : f32
    %492 = vector.broadcast %cst_151 : f32 to vector<2x1xf32>
    %493 = arith.divf %491, %492 : vector<2x1xf32>
    %494 = vector.broadcast %486 : vector<2x1xf32> to vector<2x32xf32>
    %495 = arith.subf %482, %494 : vector<2x32xf32>
    %cst_152 = arith.constant 9.99999974E-6 : f32
    %496 = vector.broadcast %cst_152 : f32 to vector<2x1xf32>
    %497 = arith.addf %493, %496 : vector<2x1xf32>
    %498 = math.rsqrt %497 : vector<2x1xf32>
    %499 = vector.broadcast %498 : vector<2x1xf32> to vector<2x32xf32>
    %500 = arith.mulf %495, %499 : vector<2x32xf32>
    %501 = vector.broadcast %5 : vector<1x32xf32> to vector<2x32xf32>
    %502 = arith.mulf %500, %501 : vector<2x32xf32>
    %503 = vector.broadcast %6 : vector<1x32xf32> to vector<2x32xf32>
    %504 = arith.addf %502, %503 : vector<2x32xf32>
    %cst_153 = arith.constant dense<0.000000e+00> : vector<2x2xf32>
    %505 = tpu.matmul %504, %8, %cst_153 {dimension_numbers = #tpu.dot_dimension_numbers<[1], [0], [0], [1], [0, 0, 1, 1], [], []>} : vector<2x32xf32>, vector<32x2xf32>, vector<2x2xf32> -> vector<2x2xf32>
    %506 = vector.broadcast %7 : vector<1x2xf32> to vector<2x2xf32>
    %507 = arith.addf %505, %506 : vector<2x2xf32>
    %cst_154 = arith.constant 0.000000e+00 : f32
    %508 = vector.broadcast %cst_154 : f32 to vector<2x1xf32>
    %509 = vector.broadcast %417 : vector<1x1xf32> to vector<2x1xf32>
    %510 = arith.addf %509, %508 : vector<2x1xf32>
    %511 = tpu.concatenate %507, %510 in 1 : vector<2x2xf32>, vector<2x1xf32> -> vector<2x3xf32>
    %c0_155 = arith.constant 0 : index
    %c0_156 = arith.constant 0 : index
    %512 = vector.load %arg2[%c0_155, %c0_156] : memref<2x3xf32, #tpu.memory_space<vmem>>, vector<2x3xf32>
    tpu.vector_store %arg2[%c0_155, %c0_156], %511 {strides = array<i32>} : memref<2x3xf32, #tpu.memory_space<vmem>>, vector<2x3xf32>,
    return
  }
}

</mosaic_0001>

<bundles_post_ra>
// kernel: moeut_decoder_forward.1
= control target key start
LH: loop header
LB: loop body
LE: loop exit
PB: predicated region body
PF: predicated region fallthrough
CT: control target
= control target key end

     0   :  { %vm30_vm0 = vcmask 64512   ;;  %v26_v3 = vlaneseq  ;;  %vm113_vm1 = vcmask 261120   ;;  %v4472_v28 = vmov 0.0   ;;  %s4473_s8 = smov 96   ;;  %s4474_s11 = smov 64   ;;  %s5290_s1 = inlined_call_operand.vmem [shape: f32[456,160], index: 1, kind: input, shape index: {}]   ;;  %s5291_s0 = inlined_call_operand.vmem [shape: f32[16,8], index: 0, kind: input, shape index: {}]   ;;  %s5292_s2 = inlined_call_operand.vmem [shape: f32[2,3], index: 2, kind: output, shape index: {}]  }
   0x1   :  { %v11_v0 = vld [vmem:[%s5290_s1 + $0x2c0] sm:$0xff]  ;;  %v25_v2 = vld [vmem:[%s5291_s0 + $0x8] sm:$0xff]  ;;  %v12_v6 = vld [vmem:[%s5290_s1 + $0x2d0] sm:$0xff]  ;;  %244 = vmatprep.mubr.f32.mxu1 %v4472_v28  ;;  %s4475_s12 = smov 32   ;;  %s4476_s18 = smov 56   ;;  %vm402_vm2 = vcmask 130048  }
   0x2   :  { %v24_v1 = vld [vmem:[%s5291_s0] sm:$0xff]  ;;  %4096 = vmatprep.subr.mxu0 %v11_v0  ;;  %v4510_v4 = vshrl.u32 %v26_v3, 7  ;;  %v160_v24 = vld [vmem:[%s5290_s1 + $0x38] sm:$0xff]  ;;  %v159_v25 = vld [vmem:[%s5290_s1 + $0x30] sm:$0xff]  ;;  %s4477_s19 = smov 120   ;;  %s4478_s20 = smov 48  }
   0x3   :  { %4098 = vmatprep.mubr.msk.f32.mxu0 %vm30_vm0, %v24_v1  ;;  %4097 = vmatpush3.msra.mxu0 %v11_v0  ;;  %v158_v26 = vld [vmem:[%s5290_s1 + $0x28] sm:$0xff]  ;;  %v157_v27 = vld [vmem:[%s5290_s1 + $0x20] sm:$0xff]  ;;  %v156_v29 = vld [vmem:[%s5290_s1 + $0x18] sm:$0xff]  ;;  %s4479_s21 = smov 112   ;;  %s4480_s26 = smov 40   ;;  %vm1583_vm3 = vcmask 556544  }
   0x4   :  { %4099 = vmatmul.mubr.msk.f32.vlgmr.msra.gmra.mxu0 %vm30_vm0, %v25_v2  ;;  %v4513_v5 = vsub.s32 0, %v4510_v4  ;;  %204 = vmatprep.subr.mxu1 %v160_v24  ;;  %v155_v30 = vld [vmem:[%s5290_s1 + $0x10] sm:$0xff]  ;;  %v154_v31 = vld [vmem:[%s5290_s1 + $0x8] sm:$0xff]  ;;  %v153_v32 = vld [vmem:[%s5290_s1] sm:$0xff]  ;;  %v4581_v44 = vsub.s32 1, %v4510_v4  ;;  %s4481_s27 = smov 104  }
   0x5   :  { %205 = vmatpush1.msra.mxu1 %v159_v25  ;;  %v20_v33 = vld [vmem:[%s5290_s1 + $0x350] sm:$0xff]  ;;  %v19_v34 = vld [vmem:[%s5290_s1 + $0x340] sm:$0xff]  ;;  %vm1604_vm8 = vcmask 31744   ;;  %vm1761_vm15 = vcmask 1043456  }
   0x6   :  { %v29_v8 = vrot.slane %v12_v6, %v4513_v5  ;;  %206 = vmatprep.subr.mxu1 %v158_v26  ;;  %v4567_v35 = vld [vmem:[%s5290_s1 + $0x330] sm:$0xff]  ;;  %v17_v36 = vld [vmem:[%s5290_s1 + $0x320] sm:$0xff] }
   0x7   :  { %207 = vmatpush1.msra.mxu1 %v157_v27  ;;  %v4578_v43 = vld [vmem:[%s5290_s1 + $0x150] sm:$0xff]  ;;  %v3877_v56 = vld [vmem:[%s5290_s1 + $0x40] ss:$8 sm:$0x3] }
   0x8   :  { %208 = vmatprep.subr.mxu1 %v156_v29  ;;  %v144_v45 = vrot.slane %v4578_v43, %v4513_v5  ;;  %v150_v48 = vrot.slane %v4578_v43, %v4581_v44  ;;  %v167_v57 = vrot.slane %v3877_v56, %v4513_v5  ;;  %v171_v27 = vrot.slane %v3877_v56, %v4581_v44 }
   0x9   :  { %209 = vmatpush1.msra.mxu1 %v155_v30 }
   0xa   :  { %210 = vmatprep.subr.mxu1 %v154_v31 }
   0xb   :  { %211 = vmatpush1.msra.mxu1 %v153_v32 }
  0xc4   :  { %v4100_v7 = vpop.f32.mrf.mxu0 }
  0xc5   :  { %v4521_v11 = vadd.f32 %v4100_v7, %v29_v8 }
  0xc6   :  { %v103_v9 = vpop.f32.mrf.mxu0 }
  0xc7   :  { %v4519_v10 = vadd.f32 %v103_v9, %v29_v8  ;;  %v117_v13 = vsel %vm113_vm1, %v4521_v11, 0.0 }
  0xc9   :  { %v114_v12 = vsel %vm113_vm1, %v4519_v10, 0.0 }
  0xca   :  { %115 = vadd.xlane.f32.xlu0 %v114_v12 }
  0xce   :  { %118 = vadd.xlane.f32.xlu0 %v117_v13 }
  0xe4   :  { %291 = vrot.lane.b32.xlu0 %v20_v33, %s4473_s8 }
  0xe8   :  { %283 = vrot.lane.b32.xlu0 %v4567_v35, %s4474_s11 }
  0xec   :  { %281 = vrot.lane.b32.xlu0 %v17_v36, %s4474_s11 }
 0x153   :  { %v116_v14 = vpop.xlane.xlu0 %115 }
 0x154   :  { %v121_v15 = vmul.f32 0.03125, %v116_v14 }
 0x156   :  { %v123_v16 = vsub.f32 %v4519_v10, %v121_v15 }
 0x157   :  { %v119_v17 = vpop.xlane.xlu0 %118 }
 0x158   :  { %v122_v18 = vmul.f32 0.03125, %v119_v17  ;;  %v125_v19 = vmul.f32 %v123_v16, %v123_v16 }
 0x15a   :  { %v124_v20 = vsub.f32 %v4521_v11, %v122_v18  ;;  %v127_v21 = vsel %vm113_vm1, %v125_v19, 0.0 }
 0x15b   :  { %128 = vadd.xlane.f32.xlu1 %v127_v21  ;;  %v4600_v1 = vpop.permute.xlu0 %291 }
 0x15c   :  { %v126_v22 = vmul.f32 %v124_v20, %v124_v20 }
 0x15e   :  { %v130_v23 = vsel %vm113_vm1, %v126_v22, 0.0 }
 0x15f   :  { %131 = vadd.xlane.f32.xlu1 %v130_v23  ;;  %v4610_v9 = vpop.permute.xlu0 %283 }
 0x163   :  { %v4612_v12 = vpop.permute.xlu0 %281 }
 0x170   :  { %289 = vrot.lane.b32.xlu1 %v19_v34, %s4473_s8 }
 0x174   :  { %261 = vrot.lane.b32.xlu1 %v19_v34, %s4475_s12 }
 0x178   :  { %263 = vrot.lane.b32.xlu1 %v20_v33, %s4475_s12 }
 0x1e4   :  { %v129_v37 = vpop.xlane.xlu1 %128 }
 0x1e5   :  { %v133_v38 = vmul.f32 0.03125, %v129_v37 }
 0x1e7   :  { %v135_v39 = vadd.f32 1e-05, %v133_v38 }
 0x1e8   :  { %v132_v40 = vpop.xlane.xlu1 %131 }
 0x1e9   :  { %4345 = vrsqrt.f32 %v135_v39  ;;  %v134_v41 = vmul.f32 0.03125, %v132_v40 }
 0x1eb   :  { %v136_v42 = vadd.f32 1e-05, %v134_v41  ;;  %v4677_v41 = vld [vmem:[%s5290_s1 + $0x370] sm:$0xff] }
 0x1ec   :  { %v4590_v55 = vpop.permute.xlu1 %289 }
 0x1ed   :  { %4347 = vrsqrt.f32 %v136_v42 }
 0x1f0   :  { %v4596_v59 = vpop.permute.xlu1 %261 }
 0x1f4   :  { %v4605_v7 = vpop.permute.xlu1 %263 }
 0x1f6   :  { %v4346_v46 = vpop.eup %4345 }
 0x1f7   :  { %v139_v47 = vmul.f32 %v4346_v46, %v123_v16  ;;  %v4682_v46 = vld [vmem:[%s5290_s1 + $0x360] sm:$0xff] }
 0x1f9   :  { %v145_v49 = vmul.f32 %v144_v45, %v139_v47 }
 0x1fa   :  { %v4348_v50 = vpop.eup %4347 }
 0x1fb   :  { %v151_v51 = vadd.f32 %v150_v48, %v145_v49  ;;  %v140_v52 = vmul.f32 %v4348_v50, %v124_v20 }
 0x1fd   :  { %3878 = vmatmul.mubr.msk.f32.vlgmr.msra.gmra.mxu1 %vm113_vm1, %v151_v51  ;;  %v146_v53 = vmul.f32 %v144_v45, %v140_v52 }
 0x1fe   :  { %250 = vmatprep.mubr.f32.mxu1 %v4472_v28 }
 0x1ff   :  { %v152_v54 = vadd.f32 %v150_v48, %v146_v53 }
 0x201   :  { %3879 = vmatmul.mubr.msk.f32.gmra.mxu1 %vm113_vm1, %v152_v54 }
 0x2bd   :  { %v246_v58 = vpop.f32.mrf.mxu1 }
 0x2be   :  { %v247_v60 = vadd.f32 %v246_v58, %v167_v57 }
 0x2bf   :  { %v248_v61 = vpop.f32.mrf.mxu1 }
 0x2c0   :  { %v267_v62 = vmul.f32 %v4596_v59, %v247_v60  ;;  %v295_v6 = vmul.f32 %v4590_v55, %v247_v60  ;;  %v257_v13 = vmul.f32 %v247_v60, %v17_v36  ;;  %v287_v19 = vmul.f32 %v4612_v12, %v247_v60 }
 0x2c1   :  { %v252_v63 = vpop.f32.mrf.mxu1  ;;  %v4657_v34 = vadd.f32 %v248_v61, %v171_v27 }
 0x2c2   :  { %v253_v0 = vadd.f32 %v252_v63, %v167_v57  ;;  %271 = vrot.lane.b32.xlu0 %v267_v62, %s4473_s8 }
 0x2c3   :  { %v254_v26 = vpop.f32.mrf.mxu1 }
 0x2c4   :  { %v296_v2 = vmul.f32 %v4600_v1, %v253_v0  ;;  %v268_v8 = vmul.f32 %v4605_v7, %v253_v0  ;;  %v288_v16 = vmul.f32 %v4610_v9, %v253_v0  ;;  %v258_v23 = vmul.f32 %v253_v0, %v4567_v35 }
 0x2c5   :  { %v4650_v31 = vadd.f32 %v254_v26, %v171_v27 }
 0x2c6   :  { %301 = vrot.lane.b32.xlu1 %v296_v2, %s4473_s8 }
 0x2ca   :  { %299 = vrot.lane.b32.xlu1 %v295_v6, %s4473_s8 }
 0x2ce   :  { %273 = vrot.lane.b32.xlu1 %v268_v8, %s4473_s8 }
 0x334   :  { %v272_v14 = vpop.permute.xlu0 %271 }
 0x335   :  { %v4614_v15 = vadd.f32 %v272_v14, %v257_v13 }
 0x337   :  { %4105 = vmatprep.mubr.msk.f32.mxu0 %vm30_vm0, %v4614_v15 }
 0x338   :  { %v302_v17 = vpop.permute.xlu1 %301 }
 0x339   :  { %v4619_v18 = vadd.f32 %v302_v17, %v288_v16 }
 0x33b   :  { %311 = vrot.lane.b32.xlu0 %v4619_v18, %s4474_s11 }
 0x33c   :  { %v300_v20 = vpop.permute.xlu1 %299 }
 0x33d   :  { %v4624_v21 = vadd.f32 %v300_v20, %v287_v19 }
 0x33f   :  { %513 = vrot.lane.b32.xlu0 %v4619_v18, %s4476_s18  ;;  %309 = vrot.lane.b32.xlu1 %v4624_v21, %s4474_s11 }
 0x340   :  { %v274_v22 = vpop.permute.xlu1 %273 }
 0x341   :  { %v4635_v24 = vadd.f32 %v274_v22, %v258_v23 }
 0x343   :  { %511 = vrot.lane.b32.xlu1 %v4624_v21, %s4476_s18  ;;  %507 = vrot.lane.b32.xlu0 %v4614_v15, %s4477_s19 }
 0x347   :  { %509 = vrot.lane.b32.xlu1 %v4635_v24, %s4477_s19  ;;  %882 = vrot.lane.b32.xlu0 %v4619_v18, %s4478_s20 }
 0x34b   :  { %880 = vrot.lane.b32.xlu1 %v4624_v21, %s4478_s20  ;;  %876 = vrot.lane.b32.xlu0 %v4614_v15, %s4479_s21 }
 0x34f   :  { %878 = vrot.lane.b32.xlu1 %v4635_v24, %s4479_s21 }
 0x3ad   :  { %v312_v25 = vpop.permute.xlu0 %311 }
 0x3ae   :  { %4101 = vmatprep.subr.msk.mxu0 %vm30_vm0, %v312_v25 }
 0x3af   :  { %4102 = vmatpush3.xpose.msk.msra.mxu0 %vm30_vm0, %v312_v25 }
 0x3b1   :  { %v310_v29 = vpop.permute.xlu1 %309  ;;  %v514_v30 = vpop.permute.xlu0 %513 }
 0x3b2   :  { %4103 = vmatprep.subr.msk.mxu0 %vm30_vm0, %v310_v29  ;;  %4115 = vmatprep.subr.msk.mxu1 %vm30_vm0, %v514_v30 }
 0x3b3   :  { %4104 = vmatpush3.xpose.msk.msra.mxu0 %vm30_vm0, %v310_v29  ;;  %4116 = vmatpush3.xpose.msk.msra.mxu1 %vm30_vm0, %v514_v30 }
 0x3b4   :  { %4108 = vmatprep.subr.mxu0 %v4650_v31 }
 0x3b5   :  { %v512_v32 = vpop.permute.xlu1 %511  ;;  %v508_v33 = vpop.permute.xlu0 %507 }
 0x3b6   :  { %4106 = vmatmul.mubr.msk.f32.vlgmr.msra.gmra.mxu0 %vm30_vm0, %v4635_v24  ;;  %4117 = vmatprep.subr.msk.mxu1 %vm30_vm0, %v512_v32 }
 0x3b7   :  { %4119 = vmatprep.mubr.msk.f32.mxu1 %vm30_vm0, %v508_v33  ;;  %4109 = vmatpush3.msra.mxu0 %v4650_v31 }
 0x3b8   :  { %4118 = vmatpush3.xpose.msk.msra.mxu1 %vm30_vm0, %v512_v32  ;;  %4110 = vmatprep.subr.mxu0 %v4657_v34 }
 0x3b9   :  { %v510_v35 = vpop.permute.xlu1 %509  ;;  %4111 = vmatpush3.msra.mxu0 %v4657_v34  ;;  %v883_v36 = vpop.permute.xlu0 %882 }
 0x3ba   :  { %4139 = vmatprep.subr.msk.mxu1 %vm30_vm0, %v883_v36 }
 0x3bb   :  { %4120 = vmatmul.mubr.msk.f32.vlgmr.msra.gmra.mxu1 %vm30_vm0, %v510_v35 }
 0x3bc   :  { %4140 = vmatpush3.xpose.msk.msra.mxu1 %vm30_vm0, %v883_v36 }
 0x3bd   :  { %v881_v37 = vpop.permute.xlu1 %880  ;;  %v877_v38 = vpop.permute.xlu0 %876 }
 0x3be   :  { %4141 = vmatprep.subr.msk.mxu1 %vm30_vm0, %v881_v37  ;;  %4143 = vmatprep.mubr.msk.f32.mxu1 %vm30_vm0, %v877_v38 }
 0x3c0   :  { %4142 = vmatpush3.xpose.msk.msra.mxu1 %vm30_vm0, %v881_v37 }
 0x3c1   :  { %v879_v39 = vpop.permute.xlu1 %878 }
 0x3c3   :  { %4144 = vmatmul.mubr.msk.f32.vlgmr.msra.gmra.mxu1 %vm30_vm0, %v879_v39 }
 0x476   :  { %v4107_v40 = vpop.f32.mrf.mxu0 }
 0x477   :  { %v399_v42 = vmul.f32 0.35355338, %v4107_v40 }
 0x478   :  { %v389_v45 = vpop.f32.mrf.mxu0 }
 0x479   :  { %v398_v47 = vmul.f32 0.35355338, %v389_v45  ;;  %v401_v48 = vadd.f32 %v399_v42, %v4677_v41 }
 0x47b   :  { %v4121_v49 = vpop.f32.mrf.mxu1  ;;  %v406_v50 = vsel %vm402_vm2, %v401_v48, -inf  ;;  %v400_v51 = vadd.f32 %v398_v47, %v4682_v46 }
 0x47c   :  { %407 = vmax.xlane.f32.xlu1 %v406_v50  ;;  %v599_v54 = vmul.f32 0.35355338, %v4121_v49 }
 0x47d   :  { %v589_v52 = vpop.f32.mrf.mxu1  ;;  %v403_v53 = vsel %vm402_vm2, %v400_v51, -inf }
 0x47e   :  { %v598_v56 = vmul.f32 0.35355338, %v589_v52  ;;  %404 = vmax.xlane.f32.xlu0 %v403_v53  ;;  %v601_v60 = vadd.f32 %v599_v54, %v4677_v41 }
 0x480   :  { %v600_v57 = vadd.f32 %v598_v56, %v4682_v46  ;;  %v605_v61 = vsel %vm402_vm2, %v601_v60, -inf }
 0x482   :  { %v602_v58 = vsel %vm402_vm2, %v600_v57, -inf }
 0x483   :  { %603 = vmax.xlane.f32.xlu0 %v602_v58  ;;  %v4145_v33 = vpop.f32.mrf.mxu1 }
 0x484   :  { %v968_v39 = vmul.f32 0.35355338, %v4145_v33 }
 0x485   :  { %v958_v35 = vpop.f32.mrf.mxu1 }
 0x486   :  { %v967_v36 = vmul.f32 0.35355338, %v958_v35 }
 0x487   :  { %606 = vmax.xlane.f32.xlu0 %v605_v61 }
 0x488   :  { %v969_v37 = vadd.f32 %v967_v36, %v4682_v46 }
 0x48a   :  { %v971_v38 = vsel %vm402_vm2, %v969_v37, -inf }
 0x505   :  { %v408_v62 = vpop.xlane.xlu1 %407 }
 0x506   :  { %v410_v63 = vsub.f32 %v401_v48, %v408_v62 }
 0x507   :  { %v405_v0 = vpop.xlane.xlu0 %404 }
 0x508   :  { %v413_v2 = vmul.f32 1.442695, %v410_v63  ;;  %v409_v6 = vsub.f32 %v400_v51, %v405_v0 }
 0x50a   :  { %4349 = vpow2.f32 %v413_v2  ;;  %v411_v8 = vmul.f32 1.442695, %v409_v6 }
 0x50c   :  { %4351 = vpow2.f32 %v411_v8  ;;  %v604_v13 = vpop.xlane.xlu0 %603 }
 0x50d   :  { %v608_v14 = vsub.f32 %v600_v57, %v604_v13  ;;  %v713_v13 = vld [vmem:[%s5290_s1 + $0x60] sm:$0xff] }
 0x50f   :  { %v610_v16 = vmul.f32 1.442695, %v608_v14 }
 0x510   :  { %v607_v17 = vpop.xlane.xlu0 %606 }
 0x511   :  { %4353 = vpow2.f32 %v610_v16  ;;  %v609_v19 = vsub.f32 %v601_v60, %v607_v17 }
 0x513   :  { %v612_v20 = vmul.f32 1.442695, %v609_v19  ;;  %v506_v19 = vld [vmem:[%s5290_s1 + $0x50] sm:$0xff] }
 0x515   :  { %4355 = vpow2.f32 %v612_v20 }
 0x517   :  { %v4350_v22 = vpop.eup %4349 }
 0x518   :  { %v418_v23 = vsel %vm402_vm2, %v4350_v22, 0.0 }
 0x519   :  { %v4352_v25 = vpop.eup %4351  ;;  %419 = vadd.xlane.f32.xlu1 %v418_v23 }
 0x51a   :  { %v415_v26 = vsel %vm402_vm2, %v4352_v25, 0.0 }
 0x51b   :  { %416 = vadd.xlane.f32.xlu0 %v415_v26 }
 0x51e   :  { %v4354_v27 = vpop.eup %4353 }
 0x51f   :  { %v614_v29 = vsel %vm402_vm2, %v4354_v27, 0.0 }
 0x520   :  { %615 = vadd.xlane.f32.xlu0 %v614_v29 }
 0x522   :  { %v4356_v30 = vpop.eup %4355 }
 0x523   :  { %v617_v32 = vsel %vm402_vm2, %v4356_v30, 0.0 }
 0x524   :  { %618 = vadd.xlane.f32.xlu1 %v617_v32 }
 0x535   :  { %626 = vrot.lane.b32.xlu1 %v4657_v34, %s4477_s19 }
 0x536   :  { %628 = vrot.lane.b32.xlu0 %v4650_v31, %s4477_s19 }
 0x539   :  { %1170 = vrot.lane.b32.xlu1 %v4619_v18, %s4480_s26  ;;  %v970_v18 = vadd.f32 %v968_v39, %v4677_v41 }
 0x53a   :  { %1164 = vrot.lane.b32.xlu0 %v4614_v15, %s4481_s27 }
 0x53b   :  { %v974_v40 = vsel %vm402_vm2, %v970_v18, -inf }
 0x53d   :  { %1168 = vrot.lane.b32.xlu1 %v4624_v21, %s4480_s26 }
 0x541   :  { %1166 = vrot.lane.b32.xlu1 %v4635_v24, %s4481_s27 }
 0x559   :  { %972 = vmax.xlane.f32.xlu0 %v971_v38 }
 0x565   :  { %975 = vmax.xlane.f32.xlu1 %v974_v40 }
 0x576   :  { %993 = vrot.lane.b32.xlu1 %v4657_v34, %s4479_s21 }
 0x5a2   :  { %v420_v15 = vpop.xlane.xlu1 %419 }
 0x5a3   :  { %4357 = vrcp.f32 %v420_v15 }
 0x5a4   :  { %v417_v21 = vpop.xlane.xlu0 %416 }
 0x5a5   :  { %4359 = vrcp.f32 %v417_v21 }
 0x5a9   :  { %v616_v24 = vpop.xlane.xlu0 %615 }
 0x5aa   :  { %4361 = vrcp.f32 %v616_v24  ;;  %v1080_v24 = vld [vmem:[%s5290_s1 + $0x70] sm:$0xff] }
 0x5ad   :  { %v619_v42 = vpop.xlane.xlu1 %618  ;;  %v629_v45 = vpop.permute.xlu0 %628 }
 0x5ae   :  { %4363 = vrcp.f32 %v619_v42  ;;  %4122 = vmatprep.subr.mxu0 %v629_v45 }
 0x5b0   :  { %v4358_v47 = vpop.eup %4357 }
 0x5b1   :  { %v627_v48 = vpop.permute.xlu1 %626  ;;  %v1165_v49 = vpop.permute.xlu0 %1164  ;;  %v424_v52 = vmul.f32 %v4358_v47, %v4350_v22 }
 0x5b2   :  { %v4360_v50 = vpop.eup %4359  ;;  %4162 = vmatprep.mubr.msk.f32.mxu1 %vm30_vm0, %v1165_v49 }
 0x5b3   :  { %v423_v51 = vmul.f32 %v4360_v50, %v4352_v25 }
 0x5b5   :  { %v1171_v53 = vpop.permute.xlu1 %1170  ;;  %4112 = vmatprep.mubr.msk.f32.mxu0 %vm402_vm2, %v423_v51 }
 0x5b6   :  { %4158 = vmatprep.subr.msk.mxu1 %vm30_vm0, %v1171_v53  ;;  %4113 = vmatmul.mubr.msk.f32.vlgmr.msra.gmra.mxu0 %vm402_vm2, %v424_v52 }
 0x5b7   :  { %v4362_v54 = vpop.eup %4361  ;;  %4123 = vmatpush3.msra.mxu0 %v629_v45  ;;  %4159 = vmatpush3.xpose.msk.msra.mxu1 %vm30_vm0, %v1171_v53 }
 0x5b8   :  { %4124 = vmatprep.subr.mxu0 %v627_v48  ;;  %v622_v56 = vmul.f32 %v4362_v54, %v4354_v27 }
 0x5b9   :  { %v1169_v57 = vpop.permute.xlu1 %1168  ;;  %4125 = vmatpush3.msra.mxu0 %v627_v48 }
 0x5ba   :  { %4126 = vmatprep.mubr.msk.f32.mxu0 %vm402_vm2, %v622_v56  ;;  %4160 = vmatprep.subr.msk.mxu1 %vm30_vm0, %v1169_v57 }
 0x5bb   :  { %v4364_v58 = vpop.eup %4363  ;;  %4161 = vmatpush3.xpose.msk.msra.mxu1 %vm30_vm0, %v1169_v57  ;;  %4129 = vmatprep.subr.mxu0 %v713_v13 }
 0x5bc   :  { %v623_v60 = vmul.f32 %v4364_v58, %v4356_v30 }
 0x5bd   :  { %v1167_v61 = vpop.permute.xlu1 %1166 }
 0x5be   :  { %4127 = vmatmul.mubr.msk.f32.vlgmr.msra.gmra.mxu0 %vm402_vm2, %v623_v60  ;;  %4163 = vmatmul.mubr.msk.f32.vlgmr.msra.gmra.mxu1 %vm30_vm0, %v1167_v61 }
 0x5bf   :  { %4130 = vmatpush3.msra.mxu0 %v713_v13 }
 0x5c0   :  { %4134 = vmatprep.subr.mxu0 %v506_v19 }
 0x5e2   :  { %v973_v62 = vpop.xlane.xlu0 %972 }
 0x5e3   :  { %v977_v63 = vsub.f32 %v969_v37, %v973_v62 }
 0x5e5   :  { %v979_v6 = vmul.f32 1.442695, %v977_v63 }
 0x5ee   :  { %v976_v0 = vpop.xlane.xlu1 %975 }
 0x5ef   :  { %v978_v2 = vsub.f32 %v970_v18, %v976_v0 }
 0x5f1   :  { %v981_v8 = vmul.f32 1.442695, %v978_v2 }
 0x5f2   :  { %v994_v18 = vpop.permute.xlu1 %993 }
 0x5f3   :  { %4365 = vpow2.f32 %v981_v8 }
 0x5f4   :  { %4367 = vpow2.f32 %v979_v6 }
 0x600   :  { %v4366_v14 = vpop.eup %4365 }
 0x601   :  { %v986_v16 = vsel %vm402_vm2, %v4366_v14, 0.0  ;;  %v4368_v17 = vpop.eup %4367 }
 0x602   :  { %987 = vadd.xlane.f32.xlu0 %v986_v16  ;;  %v983_v20 = vsel %vm402_vm2, %v4368_v17, 0.0 }
 0x606   :  { %984 = vadd.xlane.f32.xlu0 %v983_v20 }
 0x61c   :  { %995 = vrot.lane.b32.xlu0 %v4650_v31, %s4479_s21 }
 0x676   :  { %v4114_v22 = vpop.f32.mrf.mxu0 }
 0x678   :  { %v497_v23 = vpop.f32.mrf.mxu0 }
 0x67e   :  { %v4128_v25 = vpop.f32.mrf.mxu0  ;;  %v4164_v26 = vpop.f32.mrf.mxu1 }
 0x67f   :  { %v1256_v27 = vmul.f32 0.35355338, %v4164_v26  ;;  %v4763_v26 = vsub.s32 2, %v4510_v4 }
 0x680   :  { %v704_v29 = vpop.f32.mrf.mxu0  ;;  %v1246_v30 = vpop.f32.mrf.mxu1 }
 0x681   :  { %v1255_v32 = vmul.f32 0.35355338, %v1246_v30  ;;  %4131 = vmatprep.mubr.msk.f32.mxu0 %vm30_vm0, %v704_v29  ;;  %v1258_v33 = vadd.f32 %v1256_v27, %v4677_v41 }
 0x682   :  { %4132 = vmatmul.mubr.msk.f32.vlgmr.msra.gmra.mxu0 %vm30_vm0, %v4128_v25 }
 0x683   :  { %4136 = vmatprep.mubr.msk.f32.mxu0 %vm30_vm0, %v497_v23  ;;  %v1262_v35 = vsel %vm402_vm2, %v1258_v33, -inf  ;;  %4135 = vmatpush3.msra.mxu0 %v506_v19  ;;  %v1257_v36 = vadd.f32 %v1255_v32, %v4682_v46  ;;  %v1457_v32 = vrot.slane %v4578_v43, %v4763_v26 }
 0x684   :  { %1263 = vmax.xlane.f32.xlu0 %v1262_v35 }
 0x685   :  { %v1259_v37 = vsel %vm402_vm2, %v1257_v36, -inf }
 0x686   :  { %4137 = vmatmul.mubr.msk.f32.vlgmr.msra.gmra.mxu0 %vm30_vm0, %v4114_v22  ;;  %1260 = vmax.xlane.f32.xlu1 %v1259_v37 }
 0x68b   :  { %v988_v38 = vpop.xlane.xlu0 %987 }
 0x68c   :  { %4369 = vrcp.f32 %v988_v38 }
 0x68f   :  { %v985_v39 = vpop.xlane.xlu0 %984 }
 0x690   :  { %4371 = vrcp.f32 %v985_v39 }
 0x693   :  { %v996_v41 = vpop.permute.xlu0 %995 }
 0x694   :  { %4146 = vmatprep.subr.mxu0 %v996_v41 }
 0x695   :  { %4147 = vmatpush3.msra.mxu0 %v996_v41 }
 0x696   :  { %4148 = vmatprep.subr.mxu0 %v994_v18 }
 0x697   :  { %4149 = vmatpush3.msra.mxu0 %v994_v18 }
 0x698   :  { %4153 = vmatprep.subr.mxu0 %v1080_v24 }
 0x699   :  { %v4370_v40 = vpop.eup %4369 }
 0x69a   :  { %v992_v46 = vmul.f32 %v4370_v40, %v4366_v14 }
 0x69d   :  { %v4372_v15 = vpop.eup %4371 }
 0x69e   :  { %v991_v21 = vmul.f32 %v4372_v15, %v4368_v17  ;;  %v1368_v17 = vld [vmem:[%s5290_s1 + $0x80] sm:$0xff] }
 0x6a0   :  { %4150 = vmatprep.mubr.msk.f32.mxu0 %vm402_vm2, %v991_v21 }
 0x6a1   :  { %4151 = vmatmul.mubr.msk.f32.vlgmr.msra.gmra.mxu0 %vm402_vm2, %v992_v46 }
 0x6a2   :  { %4154 = vmatpush3.msra.mxu0 %v1080_v24 }
 0x70d   :  { %v1264_v42 = vpop.xlane.xlu0 %1263 }
 0x70e   :  { %v1266_v45 = vsub.f32 %v1258_v33, %v1264_v42 }
 0x70f   :  { %v1261_v47 = vpop.xlane.xlu1 %1260 }
 0x710   :  { %v1269_v48 = vmul.f32 1.442695, %v1266_v45  ;;  %v1265_v49 = vsub.f32 %v1257_v36, %v1261_v47 }
 0x712   :  { %4373 = vpow2.f32 %v1269_v48  ;;  %v1267_v50 = vmul.f32 1.442695, %v1265_v49  ;;  %v1501_v48 = vld [vmem:[%s5290_s1 + $0xc0] sm:$0xff]  ;;  %v1500_v49 = vld [vmem:[%s5290_s1 + $0xb0] sm:$0xff] }
 0x713   :  { %4177 = vmatprep.subr.mxu1 %v1501_v48 }
 0x714   :  { %4375 = vpow2.f32 %v1267_v50  ;;  %4178 = vmatpush3.msra.mxu1 %v1501_v48  ;;  %v1499_v50 = vld [vmem:[%s5290_s1 + $0xa0] sm:$0xff] }
 0x715   :  { %4179 = vmatprep.subr.mxu1 %v1500_v49 }
 0x716   :  { %4180 = vmatpush3.msra.mxu1 %v1500_v49 }
 0x717   :  { %4181 = vmatprep.subr.mxu1 %v1499_v50 }
 0x718   :  { %4182 = vmatpush3.msra.mxu1 %v1499_v50 }
 0x71f   :  { %v4374_v51 = vpop.eup %4373 }
 0x720   :  { %v1274_v52 = vsel %vm402_vm2, %v4374_v51, 0.0 }
 0x721   :  { %v4376_v53 = vpop.eup %4375  ;;  %1275 = vadd.xlane.f32.xlu1 %v1274_v52 }
 0x722   :  { %v1271_v54 = vsel %vm402_vm2, %v4376_v53, 0.0 }
 0x723   :  { %1272 = vadd.xlane.f32.xlu0 %v1271_v54 }
 0x732   :  { %1281 = vrot.lane.b32.xlu1 %v4657_v34, %s4481_s27 }
 0x739   :  { %1283 = vrot.lane.b32.xlu0 %v4650_v31, %s4481_s27 }
 0x742   :  { %v4133_v56 = vpop.f32.mrf.mxu0 }
 0x744   :  { %v786_v57 = vpop.f32.mrf.mxu0 }
 0x746   :  { %v4138_v58 = vpop.f32.mrf.mxu0 }
 0x747   :  { %v873_v60 = vadd.f32 %v4138_v58, %v4133_v56 }
 0x748   :  { %v867_v61 = vpop.f32.mrf.mxu0 }
 0x749   :  { %v868_v62 = vadd.f32 %v867_v61, %v786_v57 }
 0x761   :  { %v4152_v63 = vpop.f32.mrf.mxu0 }
 0x763   :  { %v1071_v0 = vpop.f32.mrf.mxu0 }
 0x764   :  { %4155 = vmatprep.mubr.msk.f32.mxu0 %vm30_vm0, %v1071_v0 }
 0x765   :  { %4156 = vmatmul.mubr.msk.f32.vlgmr.msra.gmra.mxu0 %vm30_vm0, %v4152_v63  ;;  %v4799_v63 = vsub.s32 4, %v4510_v4 }
 0x7aa   :  { %v1276_v2 = vpop.xlane.xlu1 %1275 }
 0x7ab   :  { %4377 = vrcp.f32 %v1276_v2 }
 0x7ac   :  { %v1273_v6 = vpop.xlane.xlu0 %1272 }
 0x7ad   :  { %4379 = vrcp.f32 %v1273_v6 }
 0x7ae   :  { %v1282_v8 = vpop.permute.xlu1 %1281 }
 0x7b0   :  { %v1284_v34 = vpop.permute.xlu0 %1283 }
 0x7b1   :  { %4165 = vmatprep.subr.mxu0 %v1284_v34 }
 0x7b2   :  { %4166 = vmatpush3.msra.mxu0 %v1284_v34 }
 0x7b3   :  { %4167 = vmatprep.subr.mxu0 %v1282_v8 }
 0x7b4   :  { %4168 = vmatpush3.msra.mxu0 %v1282_v8  ;;  %v1495_v8 = vrot.slane %v4578_v43, %v4799_v63 }
 0x7b5   :  { %4172 = vmatprep.subr.mxu0 %v1368_v17 }
 0x7b8   :  { %v4378_v31 = vpop.eup %4377 }
 0x7b9   :  { %v1280_v16 = vmul.f32 %v4378_v31, %v4374_v51  ;;  %v1498_v51 = vld [vmem:[%s5290_s1 + $0x90] sm:$0xff] }
 0x7ba   :  { %v4380_v13 = vpop.eup %4379  ;;  %4183 = vmatprep.subr.mxu1 %v1498_v51 }
 0x7bb   :  { %v1279_v14 = vmul.f32 %v4380_v13, %v4376_v53  ;;  %4184 = vmatpush3.msra.mxu1 %v1498_v51 }
 0x7bd   :  { %4169 = vmatprep.mubr.msk.f32.mxu0 %vm402_vm2, %v1279_v14 }
 0x7be   :  { %4170 = vmatmul.mubr.msk.f32.vlgmr.msra.gmra.mxu0 %vm402_vm2, %v1280_v16 }
 0x7bf   :  { %4173 = vmatpush3.msra.mxu0 %v1368_v17 }
 0x825   :  { %v4157_v19 = vpop.f32.mrf.mxu0 }
 0x826   :  { %v1163_v20 = vadd.f32 %v4157_v19, %v873_v60  ;;  %v4794_v60 = vsub.s32 3, %v4510_v4 }
 0x827   :  { %v1153_v22 = vpop.f32.mrf.mxu0 }
 0x828   :  { %v1162_v29 = vadd.f32 %v1153_v22, %v868_v62  ;;  %v1489_v62 = vrot.slane %v4578_v43, %v4794_v60 }
 0x87e   :  { %v4171_v23 = vpop.f32.mrf.mxu0 }
 0x880   :  { %v1359_v25 = vpop.f32.mrf.mxu0 }
 0x881   :  { %4174 = vmatprep.mubr.msk.f32.mxu0 %vm30_vm0, %v1359_v25 }
 0x882   :  { %4175 = vmatmul.mubr.msk.f32.vlgmr.msra.gmra.mxu0 %vm30_vm0, %v4171_v23 }
 0x942   :  { %v4176_v27 = vpop.f32.mrf.mxu0 }
 0x943   :  { %v1451_v30 = vadd.f32 %v4176_v27, %v1163_v20 }
 0x944   :  { %v1441_v33 = vpop.f32.mrf.mxu0 }
 0x945   :  { %v1453_v35 = vadd.f32 %v1451_v30, %v4521_v11  ;;  %v1450_v36 = vadd.f32 %v1441_v33, %v1162_v29 }
 0x947   :  { %v4768_v37 = vadd.f32 %v1457_v32, %v1453_v35  ;;  %v1452_v38 = vadd.f32 %v1450_v36, %v4519_v10  ;;  %v4815_v36 = vand.u32 127, %v26_v3 }
 0x949   :  { %v4771_v39 = vadd.f32 %v1457_v32, %v1452_v38  ;;  %v1463_v41 = vsel %vm113_vm1, %v4768_v37, 0.0 }
 0x94a   :  { %1464 = vadd.xlane.f32.xlu0 %v1463_v41 }
 0x94b   :  { %v1460_v18 = vsel %vm113_vm1, %v4771_v39, 0.0 }
 0x94c   :  { %1461 = vadd.xlane.f32.xlu1 %v1460_v18 }
 0x9d3   :  { %v1465_v40 = vpop.xlane.xlu0 %1464 }
 0x9d4   :  { %v1467_v15 = vmul.f32 0.03125, %v1465_v40 }
 0x9d5   :  { %v1462_v21 = vpop.xlane.xlu1 %1461 }
 0x9d6   :  { %v1469_v11 = vsub.f32 %v4768_v37, %v1467_v15  ;;  %v1466_v46 = vmul.f32 0.03125, %v1462_v21 }
 0x9d8   :  { %v1468_v24 = vsub.f32 %v4771_v39, %v1466_v46  ;;  %v1471_v42 = vmul.f32 %v1469_v11, %v1469_v11 }
 0x9da   :  { %v1475_v10 = vsel %vm113_vm1, %v1471_v42, 0.0  ;;  %v1470_v45 = vmul.f32 %v1468_v24, %v1468_v24 }
 0x9db   :  { %1476 = vadd.xlane.f32.xlu1 %v1475_v10 }
 0x9dc   :  { %v1472_v47 = vsel %vm113_vm1, %v1470_v45, 0.0 }
 0x9dd   :  { %1473 = vadd.xlane.f32.xlu0 %v1472_v47 }
 0xa64   :  { %v1477_v52 = vpop.xlane.xlu1 %1476 }
 0xa65   :  { %v1479_v53 = vmul.f32 0.03125, %v1477_v52 }
 0xa66   :  { %v1474_v54 = vpop.xlane.xlu0 %1473 }
 0xa67   :  { %v1481_v56 = vadd.f32 1e-05, %v1479_v53  ;;  %v1478_v57 = vmul.f32 0.03125, %v1474_v54 }
 0xa69   :  { %4381 = vrsqrt.f32 %v1481_v56  ;;  %v1480_v58 = vadd.f32 1e-05, %v1478_v57 }
 0xa6b   :  { %4383 = vrsqrt.f32 %v1480_v58 }
 0xa76   :  { %v4382_v61 = vpop.eup %4381 }
 0xa77   :  { %v1485_v0 = vmul.f32 %v4382_v61, %v1469_v11 }
 0xa78   :  { %v4384_v2 = vpop.eup %4383 }
 0xa79   :  { %v1484_v6 = vmul.f32 %v4384_v2, %v1468_v24  ;;  %v1491_v34 = vmul.f32 %v1489_v62, %v1485_v0 }
 0xa7b   :  { %v1490_v31 = vmul.f32 %v1489_v62, %v1484_v6  ;;  %v1497_v14 = vadd.f32 %v1495_v8, %v1491_v34 }
 0xa7d   :  { %v1496_v13 = vadd.f32 %v1495_v8, %v1490_v31 }
 0xa7f   :  { %4185 = vmatprep.mubr.msk.f32.mxu1 %vm113_vm1, %v1496_v13 }
 0xa80   :  { %4186 = vmatmul.mubr.msk.f32.vlgmr.msra.gmra.mxu1 %vm113_vm1, %v1497_v14 }
 0xa81   :  { %2064 = vmatprep.mubr.f32.mxu1 %v4472_v28 }
 0xb40   :  { %v4806_v16 = vpop.f32.mrf.mxu1 }
 0xb41   :  { %v1640_v17 = vsub.f32 0.0, %v4806_v16 }
 0xb42   :  { %v4809_v19 = vpop.f32.mrf.mxu1 }
 0xb43   :  { %v1643_v20 = vmul.f32 1.442695, %v1640_v17  ;;  %v1639_v22 = vsub.f32 0.0, %v4809_v19 }
 0xb45   :  { %4385 = vpow2.f32 %v1643_v20  ;;  %v1641_v43 = vmul.f32 1.442695, %v1639_v22 }
 0xb47   :  { %4387 = vpow2.f32 %v1641_v43 }
 0xb52   :  { %v4386_v23 = vpop.eup %4385 }
 0xb53   :  { %v1646_v25 = vadd.f32 1.0, %v4386_v23 }
 0xb54   :  { %v4388_v27 = vpop.eup %4387 }
 0xb55   :  { %4389 = vrcp.f32 %v1646_v25  ;;  %v1645_v29 = vadd.f32 1.0, %v4388_v27 }
 0xb57   :  { %4391 = vrcp.f32 %v1645_v29 }
 0xb62   :  { %v4390_v30 = vpop.eup %4389 }
 0xb63   :  { %v1656_v32 = vsel %vm1583_vm3, %v4390_v30, -inf }
 0xb64   :  { %v4392_v33 = vpop.eup %4391  ;;  %1657 = vmax.xlane.f32.xlu1 %v1656_v32 }
 0xb65   :  { %v1653_v35 = vsel %vm1583_vm3, %v4392_v33, -inf }
 0xb66   :  { %1654 = vmax.xlane.f32.xlu0 %v1653_v35 }
 0xb7c   :  { %1661 = vrot.lane.b32.xlu0 %v4815_v36, %s4474_s11 }
 0xb80   :  { %1701 = vrot.lane.b32.xlu0 %v4390_v30, %s4474_s11 }
 0xbed   :  { %v1658_v41 = vpop.xlane.xlu1 %1657 }
 0xbee   :  { %vm1660_vm4 = vcmp.eq.f32.partialorder %v4390_v30, %v1658_v41 }
 0xbef   :  { %v1655_v38 = vpop.xlane.xlu0 %1654 }
 0xbf0   :  { %vm1659_vm5 = vcmp.eq.f32.partialorder %v4392_v33, %v1655_v38 }
 0xbf3   :  { %v4820_v18 = vpop.permute.xlu0 %1661 }
 0xbf4   :  { %v1663_v40 = vsel %vm1659_vm5, %v4820_v18, 4  ;;  %v1664_v15 = vsel %vm1660_vm4, %v4820_v18, 4 }
 0xbf5   :  { %v1665_v21 = vsel %vm1583_vm3, %v1663_v40, 2147483647  ;;  %v1680_v3 = vsel %vm1583_vm3, %v1664_v15, 2147483647 }
 0xbf6   :  { %v1667_v11 = vshra.s32 %v1665_v21, 16  ;;  %v1682_v24 = vshra.s32 %v1680_v3, 16  ;;  %v1681_v45 = vand.u32 65535, %v1680_v3  ;;  %v1666_v49 = vand.u32 65535, %v1665_v21 }
 0xbf7   :  { %v1702_v0 = vpop.permute.xlu0 %1701 }
 0xbf8   :  { %v1669_v46 = vcvt.s32.f32 %v1667_v11  ;;  %v1684_v42 = vcvt.s32.f32 %v1682_v24  ;;  %v1683_v48 = vcvt.s32.f32 %v1681_v45  ;;  %v1668_v51 = vcvt.s32.f32 %v1666_v49  ;;  %v1849_v24 = vld [vmem:[%s5290_s1 + $0x140] sm:$0xff] }
 0xbfa   :  { %1670 = vmin.xlane.f32.xlu1 %v1669_v46 }
 0xbfe   :  { %1685 = vmin.xlane.f32.xlu1 %v1684_v42 }
 0xc83   :  { %v1671_v10 = vpop.xlane.xlu1 %1670 }
 0xc84   :  { %vm1672_vm7 = vcmp.eq.f32.partialorder %v1669_v46, %v1671_v10  ;;  %v1677_v56 = vcvt.f32.s32 %v1671_v10  ;;  %v4846_v46 = vld [vmem:[%s5290_s1 + $0x380] sm:$0xf] }
 0xc85   :  { %v1673_v52 = vsel %vm1672_vm7, %v1668_v51, inf  ;;  %4188 = vmatprep.subr.msk.mxu0 %vm1761_vm15, %v4846_v46 }
 0xc86   :  { %v1678_v2 = vshll.u32 %v1677_v56, 16  ;;  %4189 = vmatpush3.msk.msra.mxu0 %vm1761_vm15, %v4846_v46 }
 0xc87   :  { %v1686_v47 = vpop.xlane.xlu1 %1685  ;;  %4193 = vmatprep.subr.mxu0 %v1849_v24 }
 0xc88   :  { %vm1687_vm6 = vcmp.eq.f32.partialorder %v1684_v42, %v1686_v47  ;;  %v1692_v53 = vcvt.f32.s32 %v1686_v47 }
 0xc89   :  { %v1688_v50 = vsel %vm1687_vm6, %v1683_v48, inf  ;;  %vm1850_vm6 = vcmask 523264  }
 0xc8a   :  { %1689 = vmin.xlane.f32.xlu1 %v1688_v50  ;;  %v1693_v57 = vshll.u32 %v1692_v53, 16 }
 0xc8e   :  { %1674 = vmin.xlane.f32.xlu1 %v1673_v52 }
 0xc9f   :  { %1699 = vrot.lane.b32.xlu1 %v4392_v33, %s4474_s11 }
 0xd13   :  { %v1690_v54 = vpop.xlane.xlu1 %1689 }
 0xd14   :  { %v1691_v58 = vcvt.f32.s32 %v1690_v54 }
 0xd16   :  { %v4827_v61 = vadd.s32 %v1693_v57, %v1691_v58 }
 0xd17   :  { %v1675_v62 = vpop.xlane.xlu1 %1674 }
 0xd18   :  { %v1676_v6 = vcvt.f32.s32 %v1675_v62  ;;  %vm1696_vm9 = vcmp.eq.s32.totalorder %v4815_v36, %v4827_v61  ;;  %v1848_v62 = vld [vmem:[%s5290_s1 + $0x130] sm:$0xff] }
 0xd19   :  { %v1708_v34 = vsel %vm1696_vm9, -1e+30, %v1702_v0  ;;  %v1706_v57 = vsel %vm1696_vm9, %v1702_v0, 0.0  ;;  %v1846_v61 = vld [vmem:[%s5290_s1 + $0x110] sm:$0xff] }
 0xd1a   :  { %v1679_v8 = vadd.s32 %v1678_v2, %v1676_v6  ;;  %v1712_v31 = vsel %vm1604_vm8, %v1708_v34, -inf  ;;  %v1847_v2 = vld [vmem:[%s5290_s1 + $0x120] sm:$0xff]  ;;  %v1844_v6 = vld [vmem:[%s5290_s1 + $0xf0] sm:$0xff] }
 0xd1b   :  { %v1700_v13 = vpop.permute.xlu1 %1699  ;;  %1713 = vmax.xlane.f32.xlu1 %v1712_v31 }
 0xd1c   :  { %vm1695_vm10 = vcmp.eq.s32.totalorder %v4815_v36, %v1679_v8  ;;  %v1842_v8 = vld [vmem:[%s5290_s1 + $0xd0] sm:$0xff] }
 0xd1d   :  { %v1707_v14 = vsel %vm1695_vm10, -1e+30, %v1700_v13  ;;  %v1705_v51 = vsel %vm1695_vm10, %v1700_v13, 0.0 }
 0xd1e   :  { %v1709_v17 = vsel %vm1604_vm8, %v1707_v14, -inf }
 0xd1f   :  { %1710 = vmax.xlane.f32.xlu0 %v1709_v17 }
 0xda4   :  { %v1714_v20 = vpop.xlane.xlu1 %1713 }
 0xda5   :  { %vm1716_vm11 = vcmp.eq.f32.partialorder %v1708_v34, %v1714_v20  ;;  %v1843_v34 = vld [vmem:[%s5290_s1 + $0xe0] sm:$0xff] }
 0xda6   :  { %v1718_v22 = vsel %vm1716_vm11, %v4815_v36, 4 }
 0xda7   :  { %v1734_v25 = vsel %vm1604_vm8, %v1718_v22, 2147483647 }
 0xda8   :  { %v1711_v43 = vpop.xlane.xlu0 %1710  ;;  %v1736_v32 = vshra.s32 %v1734_v25, 16  ;;  %v1735_v40 = vand.u32 65535, %v1734_v25 }
 0xda9   :  { %vm1715_vm12 = vcmp.eq.f32.partialorder %v1707_v14, %v1711_v43  ;;  %v1754_v14 = vmax.f32 %v4806_v16, 0.0 }
 0xdaa   :  { %v1717_v23 = vsel %vm1715_vm12, %v4815_v36, 4  ;;  %v1738_v33 = vcvt.s32.f32 %v1736_v32  ;;  %v1737_v3 = vcvt.s32.f32 %v1735_v40 }
 0xdab   :  { %v1719_v27 = vsel %vm1604_vm8, %v1717_v23, 2147483647 }
 0xdac   :  { %v1721_v29 = vshra.s32 %v1719_v27, 16  ;;  %v1720_v35 = vand.u32 65535, %v1719_v27 }
 0xdae   :  { %v1723_v30 = vcvt.s32.f32 %v1721_v29  ;;  %v1722_v41 = vcvt.s32.f32 %v1720_v35 }
 0xdb0   :  { %1724 = vmin.xlane.f32.xlu0 %v1723_v30 }
 0xdb4   :  { %1739 = vmin.xlane.f32.xlu0 %v1738_v33 }
 0xe39   :  { %v1725_v38 = vpop.xlane.xlu0 %1724 }
 0xe3a   :  { %vm1726_vm13 = vcmp.eq.f32.partialorder %v1723_v30, %v1725_v38  ;;  %v1731_v42 = vcvt.f32.s32 %v1725_v38 }
 0xe3b   :  { %v1727_v15 = vsel %vm1726_vm13, %v1722_v41, inf }
 0xe3c   :  { %1728 = vmin.xlane.f32.xlu0 %v1727_v15  ;;  %v1732_v45 = vshll.u32 %v1731_v42, 16  ;;  %v1977_v42 = vld [vmem:[%s5290_s1 + $0x180] sm:$0xff] }
 0xe3d   :  { %v1740_v21 = vpop.xlane.xlu0 %1739 }
 0xe3e   :  { %vm1741_vm14 = vcmp.eq.f32.partialorder %v1738_v33, %v1740_v21  ;;  %v1746_v47 = vcvt.f32.s32 %v1740_v21 }
 0xe3f   :  { %v1742_v11 = vsel %vm1741_vm14, %v1737_v3, inf  ;;  %v1980_v3 = vld [vmem:[%s5290_s1 + $0x198] sm:$0xff] }
 0xe40   :  { %1743 = vmin.xlane.f32.xlu0 %v1742_v11  ;;  %v1747_v52 = vshll.u32 %v1746_v47, 16  ;;  %2024 = vmatprep.subr.mxu1 %v1980_v3  ;;  %v1979_v11 = vld [vmem:[%s5290_s1 + $0x190] sm:$0xff]  ;;  %v1974_v47 = vld [vmem:[%s5290_s1 + $0x168] sm:$0xff] }
 0xe41   :  { %2025 = vmatpush1.msra.mxu1 %v1979_v11 }
 0xec5   :  { %v1729_v10 = vpop.xlane.xlu0 %1728 }
 0xec6   :  { %v1730_v48 = vcvt.f32.s32 %v1729_v10  ;;  %v1976_v10 = vld [vmem:[%s5290_s1 + $0x178] sm:$0xff] }
 0xec8   :  { %v1733_v49 = vadd.s32 %v1732_v45, %v1730_v48  ;;  %v1975_v45 = vld [vmem:[%s5290_s1 + $0x170] sm:$0xff]  ;;  %v1973_v48 = vld [vmem:[%s5290_s1 + $0x160] sm:$0xff] }
 0xec9   :  { %v1744_v50 = vpop.xlane.xlu0 %1743 }
 0xeca   :  { %vm1749_vm4 = vcmp.eq.s32.totalorder %v4815_v36, %v1733_v49  ;;  %v1745_v53 = vcvt.f32.s32 %v1744_v50 }
 0xecb   :  { %v1751_v54 = vsel %vm1749_vm4, %v1700_v13, %v1705_v51  ;;  %v1753_v13 = vmax.f32 %v4809_v19, 0.0 }
 0xecc   :  { %v1748_v56 = vadd.s32 %v1747_v52, %v1745_v53  ;;  %4190 = vmatprep.mubr.msk.f32.mxu0 %vm1604_vm8, %v1751_v54 }
 0xece   :  { %vm1750_vm5 = vcmp.eq.s32.totalorder %v4815_v36, %v1748_v56 }
 0xecf   :  { %v1752_v58 = vsel %vm1750_vm5, %v1702_v0, %v1706_v57  ;;  %v1845_v0 = vld [vmem:[%s5290_s1 + $0x100] sm:$0xff]  ;;  %v4930_v57 = vld [vmem:[%s5290_s1 + $0x2b0] sm:$0xff] }
 0xed0   :  { %4191 = vmatmul.mubr.msk.f32.vlgmr.msra.gmra.mxu0 %vm1604_vm8, %v1752_v58 }
 0xed1   :  { %4194 = vmatpush3.msra.mxu0 %v1849_v24  ;;  %v1978_v24 = vld [vmem:[%s5290_s1 + $0x188] sm:$0xff] }
 0xed2   :  { %4195 = vmatprep.subr.mxu0 %v1848_v62  ;;  %2026 = vmatprep.subr.mxu1 %v1978_v24 }
 0xed3   :  { %4196 = vmatpush3.msra.mxu0 %v1848_v62  ;;  %2027 = vmatpush1.msra.mxu1 %v1977_v42 }
 0xed4   :  { %4197 = vmatprep.subr.mxu0 %v1847_v2  ;;  %2028 = vmatprep.subr.mxu1 %v1976_v10 }
 0xed5   :  { %4198 = vmatpush3.msra.mxu0 %v1847_v2  ;;  %2029 = vmatpush1.msra.mxu1 %v1975_v45  ;;  %v1964_v2 = vrot.slane %v4930_v57, %v4513_v5 }
 0xed6   :  { %4199 = vmatprep.subr.mxu0 %v1846_v61  ;;  %2030 = vmatprep.subr.mxu1 %v1974_v47 }
 0xed7   :  { %4200 = vmatpush3.msra.mxu0 %v1846_v61  ;;  %2031 = vmatpush1.msra.mxu1 %v1973_v48 }
 0xed8   :  { %4201 = vmatprep.subr.mxu0 %v1845_v0 }
 0xed9   :  { %4202 = vmatpush3.msra.mxu0 %v1845_v0 }
 0xeda   :  { %4203 = vmatprep.subr.mxu0 %v1844_v6 }
 0xedb   :  { %4204 = vmatpush3.msra.mxu0 %v1844_v6  ;;  %v1970_v6 = vrot.slane %v4930_v57, %v4581_v44 }
 0xedc   :  { %4205 = vmatprep.subr.mxu0 %v1843_v34 }
 0xedd   :  { %4206 = vmatpush3.msra.mxu0 %v1843_v34 }
 0xede   :  { %4207 = vmatprep.subr.mxu0 %v1842_v8 }
 0xedf   :  { %4208 = vmatpush3.msra.mxu0 %v1842_v8 }
 0xf90   :  { %v4192_v31 = vpop.f32.mrf.mxu0 }
 0xf91   :  { %v1841_v22 = vmul.f32 %v4192_v31, %v1754_v14 }
 0xf92   :  { %v1831_v17 = vpop.f32.mrf.mxu0 }
 0xf93   :  { %v1840_v20 = vmul.f32 %v1831_v17, %v1753_v13  ;;  %v3919_v13 = vld [vmem:[%s5290_s1 + $0x1a0] ss:$8 sm:$0x3] }
 0xf94   :  { %v1987_v14 = vrot.slane %v3919_v13, %v4513_v5 }
 0xf95   :  { %4209 = vmatprep.mubr.msk.f32.mxu0 %vm1850_vm6, %v1840_v20 }
 0xf96   :  { %4210 = vmatmul.mubr.msk.f32.vlgmr.msra.gmra.mxu0 %vm1850_vm6, %v1841_v22 }
0x1056   :  { %v4211_v43 = vpop.f32.mrf.mxu0 }
0x1057   :  { %v4890_v23 = vadd.f32 %v4211_v43, %v4768_v37 }
0x1058   :  { %v1923_v25 = vpop.f32.mrf.mxu0 }
0x1059   :  { %v4893_v27 = vadd.f32 %v1923_v25, %v4771_v39  ;;  %v1938_v29 = vsel %vm113_vm1, %v4890_v23, 0.0 }
0x105a   :  { %1939 = vadd.xlane.f32.xlu0 %v1938_v29  ;;  %v1991_v29 = vrot.slane %v3919_v13, %v4581_v44 }
0x105b   :  { %v1935_v30 = vsel %vm113_vm1, %v4893_v27, 0.0 }
0x105c   :  { %1936 = vadd.xlane.f32.xlu1 %v1935_v30 }
0x10e3   :  { %v1940_v32 = vpop.xlane.xlu0 %1939 }
0x10e4   :  { %v1942_v33 = vmul.f32 0.03125, %v1940_v32 }
0x10e5   :  { %v1937_v35 = vpop.xlane.xlu1 %1936 }
0x10e6   :  { %v1944_v38 = vsub.f32 %v4890_v23, %v1942_v33  ;;  %v1941_v41 = vmul.f32 0.03125, %v1937_v35 }
0x10e8   :  { %v1943_v37 = vsub.f32 %v4893_v27, %v1941_v41  ;;  %v1946_v40 = vmul.f32 %v1944_v38, %v1944_v38 }
0x10ea   :  { %v1950_v39 = vsel %vm113_vm1, %v1946_v40, 0.0  ;;  %v1945_v15 = vmul.f32 %v1943_v37, %v1943_v37 }
0x10eb   :  { %1951 = vadd.xlane.f32.xlu0 %v1950_v39 }
0x10ec   :  { %v1947_v21 = vsel %vm113_vm1, %v1945_v15, 0.0 }
0x10ed   :  { %1948 = vadd.xlane.f32.xlu1 %v1947_v21 }
0x1174   :  { %v1952_v49 = vpop.xlane.xlu0 %1951 }
0x1175   :  { %v1954_v50 = vmul.f32 0.03125, %v1952_v49 }
0x1176   :  { %v1949_v51 = vpop.xlane.xlu1 %1948 }
0x1177   :  { %v1956_v52 = vadd.f32 1e-05, %v1954_v50  ;;  %v1953_v53 = vmul.f32 0.03125, %v1949_v51 }
0x1179   :  { %4393 = vrsqrt.f32 %v1956_v52  ;;  %v1955_v54 = vadd.f32 1e-05, %v1953_v53 }
0x117b   :  { %4395 = vrsqrt.f32 %v1955_v54  ;;  %v5005_v54 = vld [vmem:[%s5290_s1 + $0x370] sm:$0xff] }
0x1186   :  { %v4394_v56 = vpop.eup %4393 }
0x1187   :  { %v1960_v61 = vmul.f32 %v4394_v56, %v1944_v38 }
0x1188   :  { %v4396_v58 = vpop.eup %4395 }
0x1189   :  { %v1959_v62 = vmul.f32 %v4396_v58, %v1943_v37  ;;  %v1966_v8 = vmul.f32 %v1964_v2, %v1960_v61 }
0x118b   :  { %v1965_v0 = vmul.f32 %v1964_v2, %v1959_v62  ;;  %v1972_v31 = vadd.f32 %v1970_v6, %v1966_v8  ;;  %v5012_v62 = vld [vmem:[%s5290_s1 + $0x360] sm:$0xff] }
0x118d   :  { %v1971_v34 = vadd.f32 %v1970_v6, %v1965_v0 }
0x118f   :  { %3920 = vmatmul.mubr.msk.f32.vlgmr.msra.gmra.mxu1 %vm113_vm1, %v1971_v34 }
0x1190   :  { %2070 = vmatprep.mubr.f32.mxu1 %v4472_v28 }
0x1193   :  { %3921 = vmatmul.mubr.msk.f32.gmra.mxu1 %vm113_vm1, %v1972_v31 }
0x124f   :  { %v2066_v17 = vpop.f32.mrf.mxu1 }
0x1250   :  { %v2067_v20 = vadd.f32 %v2066_v17, %v1987_v14 }
0x1251   :  { %v2068_v22 = vpop.f32.mrf.mxu1 }
0x1252   :  { %v2093_v43 = vmul.f32 %v2067_v20, %v4590_v55  ;;  %v4949_v38 = vadd.f32 %v2068_v22, %v1991_v29  ;;  %v2079_v5 = vmul.f32 %v2067_v20, %v4596_v59 }
0x1253   :  { %v2072_v25 = vpop.f32.mrf.mxu1 }
0x1254   :  { %v2073_v30 = vadd.f32 %v2072_v25, %v1987_v14  ;;  %2097 = vrot.lane.b32.xlu0 %v2093_v43, %s4473_s8 }
0x1255   :  { %v2074_v32 = vpop.f32.mrf.mxu1 }
0x1256   :  { %v4946_v33 = vadd.f32 %v2074_v32, %v1991_v29  ;;  %v2094_v35 = vmul.f32 %v2073_v30, %v4600_v1  ;;  %v2080_v55 = vmul.f32 %v2073_v30, %v4605_v7  ;;  %v2091_v1 = vmul.f32 %v2067_v20, %v4612_v12  ;;  %v4467_v7 = vld [vmem:[%s5290_s1 + $0x320] sm:$0xff] }
0x1257   :  { %v2092_v40 = vmul.f32 %v2073_v30, %v4610_v9  ;;  %v2077_v12 = vmul.f32 %v4467_v7, %v2067_v20  ;;  %v4468_v9 = vld [vmem:[%s5290_s1 + $0x330] sm:$0xff] }
0x1258   :  { %4219 = vmatprep.subr.mxu0 %v4946_v33  ;;  %2099 = vrot.lane.b32.xlu1 %v2094_v35, %s4473_s8  ;;  %v2078_v3 = vmul.f32 %v4468_v9, %v2073_v30 }
0x1259   :  { %4220 = vmatpush3.msra.mxu0 %v4946_v33 }
0x125a   :  { %4221 = vmatprep.subr.mxu0 %v4949_v38 }
0x125b   :  { %4222 = vmatpush3.msra.mxu0 %v4949_v38 }
0x125c   :  { %2083 = vrot.lane.b32.xlu1 %v2079_v5, %s4473_s8 }
0x1260   :  { %2085 = vrot.lane.b32.xlu1 %v2080_v55, %s4473_s8 }
0x12c6   :  { %v2098_v41 = vpop.permute.xlu0 %2097 }
0x12c7   :  { %v4961_v37 = vadd.f32 %v2098_v41, %v2091_v1 }
0x12c9   :  { %2107 = vrot.lane.b32.xlu0 %v4961_v37, %s4474_s11 }
0x12ca   :  { %v2100_v39 = vpop.permute.xlu1 %2099 }
0x12cb   :  { %v4966_v59 = vadd.f32 %v2100_v39, %v2092_v40 }
0x12cd   :  { %2308 = vrot.lane.b32.xlu0 %v4961_v37, %s4476_s18  ;;  %2109 = vrot.lane.b32.xlu1 %v4966_v59, %s4474_s11 }
0x12ce   :  { %v2084_v15 = vpop.permute.xlu1 %2083 }
0x12cf   :  { %v4975_v21 = vadd.f32 %v2084_v15, %v2077_v12 }
0x12d1   :  { %2310 = vrot.lane.b32.xlu1 %v4966_v59, %s4476_s18  ;;  %4216 = vmatprep.mubr.msk.f32.mxu1 %vm30_vm0, %v4975_v21 }
0x12d2   :  { %v2086_v11 = vpop.permute.xlu1 %2085 }
0x12d3   :  { %v4984_v24 = vadd.f32 %v2086_v11, %v2078_v3 }
0x12d5   :  { %2306 = vrot.lane.b32.xlu0 %v4984_v24, %s4477_s19  ;;  %2304 = vrot.lane.b32.xlu1 %v4975_v21, %s4477_s19 }
0x133b   :  { %v2108_v10 = vpop.permute.xlu0 %2107 }
0x133f   :  { %v2110_v42 = vpop.permute.xlu1 %2109  ;;  %v2309_v48 = vpop.permute.xlu0 %2308 }
0x1340   :  { %4212 = vmatprep.subr.msk.mxu1 %vm30_vm0, %v2110_v42 }
0x1341   :  { %4213 = vmatpush3.xpose.msk.msra.mxu1 %vm30_vm0, %v2110_v42 }
0x1342   :  { %4214 = vmatprep.subr.msk.mxu1 %vm30_vm0, %v2108_v10 }
0x1343   :  { %v2311_v45 = vpop.permute.xlu1 %2310 }
0x1345   :  { %4215 = vmatpush3.xpose.msk.msra.mxu1 %vm30_vm0, %v2108_v10 }
0x1346   :  { %4226 = vmatprep.subr.msk.mxu1 %vm30_vm0, %v2311_v45 }
0x1347   :  { %v2305_v47 = vpop.permute.xlu1 %2304  ;;  %v2307_v49 = vpop.permute.xlu0 %2306 }
0x1348   :  { %4217 = vmatmul.mubr.msk.f32.vlgmr.msra.gmra.mxu1 %vm30_vm0, %v4984_v24 }
0x1349   :  { %4227 = vmatpush3.xpose.msk.msra.mxu1 %vm30_vm0, %v2311_v45  ;;  %4230 = vmatprep.mubr.msk.f32.mxu1 %vm30_vm0, %v2305_v47 }
0x134a   :  { %4228 = vmatprep.subr.msk.mxu1 %vm30_vm0, %v2309_v48 }
0x134d   :  { %4229 = vmatpush3.xpose.msk.msra.mxu1 %vm30_vm0, %v2309_v48 }
0x1350   :  { %4231 = vmatmul.mubr.msk.f32.vlgmr.msra.gmra.mxu1 %vm30_vm0, %v2307_v49 }
0x1408   :  { %v4218_v50 = vpop.f32.mrf.mxu1 }
0x1409   :  { %v2197_v51 = vmul.f32 0.35355338, %v4218_v50 }
0x140a   :  { %v2187_v52 = vpop.f32.mrf.mxu1 }
0x140b   :  { %v2196_v53 = vmul.f32 0.35355338, %v2187_v52  ;;  %v2199_v56 = vadd.f32 %v5005_v54, %v2197_v51 }
0x140d   :  { %v2203_v58 = vsel %vm402_vm2, %v2199_v56, -inf  ;;  %v2198_v2 = vadd.f32 %v5012_v62, %v2196_v53 }
0x140e   :  { %2204 = vmax.xlane.f32.xlu0 %v2203_v58 }
0x140f   :  { %v2200_v61 = vsel %vm402_vm2, %v2198_v2, -inf }
0x1410   :  { %v4232_v0 = vpop.f32.mrf.mxu1  ;;  %2201 = vmax.xlane.f32.xlu1 %v2200_v61 }
0x1411   :  { %v2396_v34 = vmul.f32 0.35355338, %v4232_v0 }
0x1412   :  { %v2386_v6 = vpop.f32.mrf.mxu1 }
0x1413   :  { %v2395_v8 = vmul.f32 0.35355338, %v2386_v6  ;;  %v2398_v14 = vadd.f32 %v5005_v54, %v2396_v34 }
0x1415   :  { %v2397_v31 = vadd.f32 %v5012_v62, %v2395_v8  ;;  %v2402_v17 = vsel %vm402_vm2, %v2398_v14, -inf }
0x1417   :  { %v2399_v13 = vsel %vm402_vm2, %v2397_v31, -inf }
0x1418   :  { %2400 = vmax.xlane.f32.xlu0 %v2399_v13 }
0x141c   :  { %2403 = vmax.xlane.f32.xlu0 %v2402_v17 }
0x1497   :  { %v2205_v20 = vpop.xlane.xlu0 %2204 }
0x1498   :  { %v2207_v22 = vsub.f32 %v2199_v56, %v2205_v20 }
0x1499   :  { %v2202_v43 = vpop.xlane.xlu1 %2201 }
0x149a   :  { %v2210_v25 = vmul.f32 1.442695, %v2207_v22  ;;  %v2206_v29 = vsub.f32 %v2198_v2, %v2202_v43  ;;  %v2303_v2 = vld [vmem:[%s5290_s1 + $0x1b0] sm:$0xff] }
0x149b   :  { %4245 = vmatprep.subr.mxu1 %v2303_v2 }
0x149c   :  { %4397 = vpow2.f32 %v2210_v25  ;;  %v2208_v30 = vmul.f32 1.442695, %v2206_v29  ;;  %4246 = vmatpush3.msra.mxu1 %v2303_v2 }
0x149e   :  { %4399 = vpow2.f32 %v2208_v30 }
0x14a1   :  { %v2401_v32 = vpop.xlane.xlu0 %2400 }
0x14a2   :  { %v2405_v35 = vsub.f32 %v2397_v31, %v2401_v32 }
0x14a4   :  { %v2407_v5 = vmul.f32 1.442695, %v2405_v35 }
0x14a5   :  { %v2404_v55 = vpop.xlane.xlu0 %2403 }
0x14a6   :  { %4401 = vpow2.f32 %v2407_v5  ;;  %v2406_v1 = vsub.f32 %v2398_v14, %v2404_v55 }
0x14a8   :  { %v2409_v41 = vmul.f32 1.442695, %v2406_v1 }
0x14a9   :  { %v4398_v40 = vpop.eup %4397 }
0x14aa   :  { %4403 = vpow2.f32 %v2409_v41  ;;  %v2215_v39 = vsel %vm402_vm2, %v4398_v40, 0.0 }
0x14ab   :  { %v4400_v7 = vpop.eup %4399  ;;  %2216 = vadd.xlane.f32.xlu0 %v2215_v39 }
0x14ac   :  { %v2212_v12 = vsel %vm402_vm2, %v4400_v7, 0.0 }
0x14ad   :  { %2213 = vadd.xlane.f32.xlu1 %v2212_v12 }
0x14b3   :  { %v4402_v15 = vpop.eup %4401 }
0x14b4   :  { %v2411_v9 = vsel %vm402_vm2, %v4402_v15, 0.0 }
0x14b5   :  { %2412 = vadd.xlane.f32.xlu1 %v2411_v9 }
0x14b7   :  { %v4404_v3 = vpop.eup %4403 }
0x14b8   :  { %v2414_v11 = vsel %vm402_vm2, %v4404_v3, 0.0 }
0x14b9   :  { %2415 = vadd.xlane.f32.xlu0 %v2414_v11 }
0x14c6   :  { %2425 = vrot.lane.b32.xlu1 %v4946_v33, %s4477_s19 }
0x14ca   :  { %2679 = vrot.lane.b32.xlu1 %v4966_v59, %s4478_s20 }
0x14ce   :  { %2677 = vrot.lane.b32.xlu1 %v4961_v37, %s4478_s20 }
0x14cf   :  { %2423 = vrot.lane.b32.xlu0 %v4949_v38, %s4477_s19 }
0x14d2   :  { %2673 = vrot.lane.b32.xlu1 %v4975_v21, %s4479_s21 }
0x14d3   :  { %2675 = vrot.lane.b32.xlu0 %v4984_v24, %s4479_s21 }
0x14d6   :  { %2967 = vrot.lane.b32.xlu1 %v4966_v59, %s4480_s26 }
0x14d7   :  { %2965 = vrot.lane.b32.xlu0 %v4961_v37, %s4480_s26 }
0x14da   :  { %2961 = vrot.lane.b32.xlu1 %v4975_v21, %s4481_s27 }
0x14db   :  { %2963 = vrot.lane.b32.xlu0 %v4984_v24, %s4481_s27  ;;  %v2510_v24 = vld [vmem:[%s5290_s1 + $0x1c0] sm:$0xff] }
0x1534   :  { %v2217_v42 = vpop.xlane.xlu0 %2216 }
0x1535   :  { %4405 = vrcp.f32 %v2217_v42 }
0x1536   :  { %v2214_v10 = vpop.xlane.xlu1 %2213 }
0x1537   :  { %4407 = vrcp.f32 %v2214_v10 }
0x153e   :  { %v2413_v45 = vpop.xlane.xlu1 %2412 }
0x153f   :  { %4409 = vrcp.f32 %v2413_v45 }
0x1542   :  { %v2416_v47 = vpop.xlane.xlu0 %2415  ;;  %v2426_v48 = vpop.permute.xlu1 %2425 }
0x1543   :  { %v4406_v49 = vpop.eup %4405  ;;  %4411 = vrcp.f32 %v2416_v47  ;;  %4233 = vmatprep.subr.mxu0 %v2426_v48 }
0x1544   :  { %v4408_v59 = vpop.eup %4407  ;;  %v2221_v37 = vmul.f32 %v4406_v49, %v4398_v40 }
0x1545   :  { %v2220_v50 = vmul.f32 %v4408_v59, %v4400_v7 }
0x1546   :  { %v2424_v21 = vpop.permute.xlu0 %2423  ;;  %v2680_v58 = vpop.permute.xlu1 %2679 }
0x1547   :  { %4223 = vmatprep.mubr.msk.f32.mxu0 %vm402_vm2, %v2220_v50 }
0x1548   :  { %4224 = vmatmul.mubr.msk.f32.vlgmr.msra.gmra.mxu0 %vm402_vm2, %v2221_v37 }
0x1549   :  { %4234 = vmatpush3.msra.mxu0 %v2426_v48 }
0x154a   :  { %4235 = vmatprep.subr.mxu0 %v2424_v21  ;;  %v2678_v6 = vpop.permute.xlu1 %2677  ;;  %v2676_v14 = vpop.permute.xlu0 %2675 }
0x154b   :  { %4236 = vmatpush3.msra.mxu0 %v2424_v21 }
0x154c   :  { %v4410_v51 = vpop.eup %4409  ;;  %4240 = vmatprep.subr.mxu0 %v2510_v24 }
0x154d   :  { %v2419_v52 = vmul.f32 %v4410_v51, %v4402_v15 }
0x154e   :  { %v2674_v34 = vpop.permute.xlu1 %2673  ;;  %v2966_v20 = vpop.permute.xlu0 %2965 }
0x154f   :  { %4237 = vmatprep.mubr.msk.f32.mxu0 %vm402_vm2, %v2419_v52 }
0x1550   :  { %v4412_v53 = vpop.eup %4411 }
0x1551   :  { %v2420_v56 = vmul.f32 %v4412_v53, %v4404_v3 }
0x1552   :  { %v2968_v13 = vpop.permute.xlu1 %2967  ;;  %v2964_v22 = vpop.permute.xlu0 %2963 }
0x1553   :  { %4238 = vmatmul.mubr.msk.f32.vlgmr.msra.gmra.mxu0 %vm402_vm2, %v2420_v56 }
0x1554   :  { %4241 = vmatpush3.msra.mxu0 %v2510_v24 }
0x1555   :  { %4250 = vmatprep.subr.msk.mxu0 %vm30_vm0, %v2680_v58 }
0x1556   :  { %v2962_v17 = vpop.permute.xlu1 %2961 }
0x1608   :  { %v4225_v61 = vpop.f32.mrf.mxu0 }
0x160a   :  { %v2294_v0 = vpop.f32.mrf.mxu0 }
0x160b   :  { %4247 = vmatprep.mubr.msk.f32.mxu1 %vm30_vm0, %v2294_v0 }
0x160c   :  { %4248 = vmatmul.mubr.msk.f32.vlgmr.msra.gmra.mxu1 %vm30_vm0, %v4225_v61 }
0x1613   :  { %v4239_v8 = vpop.f32.mrf.mxu0 }
0x1615   :  { %v2501_v31 = vpop.f32.mrf.mxu0 }
0x1616   :  { %4242 = vmatprep.mubr.msk.f32.mxu0 %vm30_vm0, %v2501_v31 }
0x1617   :  { %4243 = vmatmul.mubr.msk.f32.vlgmr.msra.gmra.mxu0 %vm30_vm0, %v4239_v8 }
0x1618   :  { %4251 = vmatpush3.xpose.msk.msra.mxu0 %vm30_vm0, %v2680_v58  ;;  %4254 = vmatprep.mubr.msk.f32.mxu0 %vm30_vm0, %v2674_v34  ;;  %v2877_v34 = vld [vmem:[%s5290_s1 + $0x1d0] sm:$0xff] }
0x1619   :  { %4252 = vmatprep.subr.msk.mxu0 %vm30_vm0, %v2678_v6 }
0x161c   :  { %4253 = vmatpush3.xpose.msk.msra.mxu0 %vm30_vm0, %v2678_v6 }
0x161d   :  { %4269 = vmatprep.subr.msk.mxu0 %vm30_vm0, %v2968_v13 }
0x161f   :  { %4255 = vmatmul.mubr.msk.f32.vlgmr.msra.gmra.mxu0 %vm30_vm0, %v2676_v14 }
0x1620   :  { %4270 = vmatpush3.xpose.msk.msra.mxu0 %vm30_vm0, %v2968_v13  ;;  %4273 = vmatprep.mubr.msk.f32.mxu0 %vm30_vm0, %v2962_v17 }
0x1621   :  { %4271 = vmatprep.subr.msk.mxu0 %vm30_vm0, %v2966_v20 }
0x1624   :  { %4272 = vmatpush3.xpose.msk.msra.mxu0 %vm30_vm0, %v2966_v20 }
0x1627   :  { %4274 = vmatmul.mubr.msk.f32.vlgmr.msra.gmra.mxu0 %vm30_vm0, %v2964_v22 }
0x16cc   :  { %v4249_v43 = vpop.f32.mrf.mxu1 }
0x16d7   :  { %v4244_v25 = vpop.f32.mrf.mxu0 }
0x16d8   :  { %v5070_v29 = vadd.f32 %v4249_v43, %v4244_v25 }
0x16d9   :  { %v5072_v30 = vpop.f32.mrf.mxu0 }
0x16df   :  { %v4256_v32 = vpop.f32.mrf.mxu0 }
0x16e0   :  { %v2765_v35 = vmul.f32 0.35355338, %v4256_v32  ;;  %v2664_v32 = vpop.f32.mrf.mxu1 }
0x16e1   :  { %v2755_v5 = vpop.f32.mrf.mxu0 }
0x16e2   :  { %v2767_v55 = vadd.f32 %v5005_v54, %v2765_v35  ;;  %v2764_v1 = vmul.f32 0.35355338, %v2755_v5 }
0x16e4   :  { %v2766_v41 = vadd.f32 %v5012_v62, %v2764_v1  ;;  %v2771_v40 = vsel %vm402_vm2, %v2767_v55, -inf }
0x16e5   :  { %2772 = vmax.xlane.f32.xlu0 %v2771_v40 }
0x16e6   :  { %v2768_v39 = vsel %vm402_vm2, %v2766_v41, -inf }
0x16e7   :  { %2769 = vmax.xlane.f32.xlu1 %v2768_v39  ;;  %v4275_v7 = vpop.f32.mrf.mxu0 }
0x16e8   :  { %v3053_v52 = vmul.f32 0.35355338, %v4275_v7  ;;  %v3165_v7 = vld [vmem:[%s5290_s1 + $0x1e0] sm:$0xff] }
0x16e9   :  { %v3043_v12 = vpop.f32.mrf.mxu0 }
0x16ea   :  { %v3052_v15 = vmul.f32 0.35355338, %v3043_v12  ;;  %v3055_v53 = vadd.f32 %v5005_v54, %v3053_v52 }
0x16ec   :  { %v3054_v9 = vadd.f32 %v5012_v62, %v3052_v15  ;;  %v3059_v2 = vsel %vm402_vm2, %v3055_v53, -inf  ;;  %v2665_v15 = vadd.f32 %v2664_v32, %v5072_v30 }
0x16ee   :  { %v3056_v3 = vsel %vm402_vm2, %v3054_v9, -inf }
0x16f8   :  { %2792 = vrot.lane.b32.xlu1 %v4946_v33, %s4479_s21 }
0x171c   :  { %3057 = vmax.xlane.f32.xlu1 %v3056_v3 }
0x176e   :  { %v2773_v11 = vpop.xlane.xlu0 %2772 }
0x176f   :  { %v2775_v42 = vsub.f32 %v2767_v55, %v2773_v11 }
0x1770   :  { %v2770_v10 = vpop.xlane.xlu1 %2769 }
0x1771   :  { %v2778_v45 = vmul.f32 1.442695, %v2775_v42  ;;  %v2774_v47 = vsub.f32 %v2766_v41, %v2770_v10 }
0x1773   :  { %4413 = vpow2.f32 %v2778_v45  ;;  %v2776_v48 = vmul.f32 1.442695, %v2774_v47 }
0x1774   :  { %v2793_v49 = vpop.permute.xlu1 %2792 }
0x1775   :  { %4415 = vpow2.f32 %v2776_v48  ;;  %4257 = vmatprep.subr.mxu1 %v2793_v49  ;;  %v3254_v48 = vrot.slane %v4930_v57, %v4763_v26 }
0x1776   :  { %4258 = vmatpush3.msra.mxu1 %v2793_v49 }
0x1780   :  { %v4414_v59 = vpop.eup %4413 }
0x1781   :  { %v2783_v50 = vsel %vm402_vm2, %v4414_v59, 0.0 }
0x1782   :  { %v4416_v37 = vpop.eup %4415  ;;  %2784 = vadd.xlane.f32.xlu0 %v2783_v50 }
0x1783   :  { %v2780_v62 = vsel %vm402_vm2, %v4416_v37, 0.0 }
0x1786   :  { %2781 = vadd.xlane.f32.xlu0 %v2780_v62 }
0x179c   :  { %2790 = vrot.lane.b32.xlu0 %v4949_v38, %s4479_s21 }
0x17a5   :  { %v3058_v21 = vpop.xlane.xlu1 %3057 }
0x17a6   :  { %v3062_v24 = vsub.f32 %v3054_v9, %v3058_v21 }
0x17a8   :  { %v3064_v51 = vmul.f32 1.442695, %v3062_v24 }
0x17aa   :  { %4417 = vpow2.f32 %v3064_v51 }
0x17b7   :  { %v4418_v56 = vpop.eup %4417 }
0x17b8   :  { %v3068_v58 = vsel %vm402_vm2, %v4418_v56, 0.0 }
0x17b9   :  { %3069 = vadd.xlane.f32.xlu1 %v3068_v58 }
0x17bb   :  { %3060 = vmax.xlane.f32.xlu0 %v3059_v2 }
0x17ca   :  { %3080 = vrot.lane.b32.xlu1 %v4946_v33, %s4481_s27 }
0x180b   :  { %v2785_v61 = vpop.xlane.xlu0 %2784 }
0x180c   :  { %4419 = vrcp.f32 %v2785_v61  ;;  %v3298_v61 = vld [vmem:[%s5290_s1 + $0x220] sm:$0xff] }
0x180d   :  { %4288 = vmatprep.subr.mxu0 %v3298_v61 }
0x180e   :  { %4289 = vmatpush3.msra.mxu0 %v3298_v61 }
0x180f   :  { %v2782_v0 = vpop.xlane.xlu0 %2781 }
0x1810   :  { %4421 = vrcp.f32 %v2782_v0  ;;  %v3297_v0 = vld [vmem:[%s5290_s1 + $0x210] sm:$0xff] }
0x1811   :  { %4290 = vmatprep.subr.mxu0 %v3297_v0 }
0x1812   :  { %4291 = vmatpush3.msra.mxu0 %v3297_v0 }
0x1813   :  { %v2791_v6 = vpop.permute.xlu0 %2790 }
0x1814   :  { %4259 = vmatprep.subr.mxu1 %v2791_v6 }
0x1815   :  { %4260 = vmatpush3.msra.mxu1 %v2791_v6  ;;  %v3296_v6 = vld [vmem:[%s5290_s1 + $0x200] sm:$0xff] }
0x1816   :  { %4264 = vmatprep.subr.mxu1 %v2877_v34  ;;  %4292 = vmatprep.subr.mxu0 %v3296_v6 }
0x1817   :  { %4293 = vmatpush3.msra.mxu0 %v3296_v6 }
0x1819   :  { %v4420_v54 = vpop.eup %4419 }
0x181a   :  { %v2789_v13 = vmul.f32 %v4420_v54, %v4414_v59 }
0x181d   :  { %v4422_v8 = vpop.eup %4421 }
0x181e   :  { %v2788_v31 = vmul.f32 %v4422_v8, %v4416_v37 }
0x1820   :  { %4261 = vmatprep.mubr.msk.f32.mxu1 %vm402_vm2, %v2788_v31 }
0x1821   :  { %4262 = vmatmul.mubr.msk.f32.vlgmr.msra.gmra.mxu1 %vm402_vm2, %v2789_v13 }
0x1822   :  { %4265 = vmatpush3.msra.mxu1 %v2877_v34  ;;  %v3295_v34 = vld [vmem:[%s5290_s1 + $0x1f0] sm:$0xff] }
0x1823   :  { %4294 = vmatprep.subr.mxu0 %v3295_v34 }
0x1824   :  { %4295 = vmatpush3.msra.mxu0 %v3295_v34 }
0x1825   :  { %4323 = vmatprep.subr.mxu0 %v4472_v28 }
0x1842   :  { %v3070_v33 = vpop.xlane.xlu1 %3069 }
0x1844   :  { %v3061_v14 = vpop.xlane.xlu0 %3060 }
0x1845   :  { %v3063_v17 = vsub.f32 %v3055_v53, %v3061_v14 }
0x1846   :  { %v3081_v20 = vpop.permute.xlu1 %3080 }
0x1847   :  { %v3066_v22 = vmul.f32 1.442695, %v3063_v17  ;;  %4276 = vmatprep.subr.mxu1 %v3081_v20 }
0x1849   :  { %4423 = vpow2.f32 %v3066_v22 }
0x184a   :  { %4425 = vrcp.f32 %v3070_v33 }
0x1856   :  { %v4424_v43 = vpop.eup %4423 }
0x1857   :  { %v3071_v25 = vsel %vm402_vm2, %v4424_v43, 0.0  ;;  %v4426_v35 = vpop.eup %4425 }
0x1858   :  { %3072 = vadd.xlane.f32.xlu0 %v3071_v25  ;;  %v3076_v41 = vmul.f32 %v4426_v35, %v4418_v56  ;;  %v3292_v35 = vrot.slane %v4930_v57, %v4799_v63 }
0x186e   :  { %3078 = vrot.lane.b32.xlu0 %v4949_v38, %s4481_s27 }
0x18e1   :  { %v3073_v5 = vpop.xlane.xlu0 %3072  ;;  %v4263_v55 = vpop.f32.mrf.mxu1 }
0x18e2   :  { %4427 = vrcp.f32 %v3073_v5 }
0x18e3   :  { %v2868_v1 = vpop.f32.mrf.mxu1 }
0x18e4   :  { %4266 = vmatprep.mubr.msk.f32.mxu1 %vm30_vm0, %v2868_v1 }
0x18e5   :  { %v3079_v40 = vpop.permute.xlu0 %3078  ;;  %4267 = vmatmul.mubr.msk.f32.vlgmr.msra.gmra.mxu1 %vm30_vm0, %v4263_v55 }
0x18e6   :  { %4277 = vmatpush3.msra.mxu1 %v3081_v20  ;;  %4280 = vmatprep.mubr.msk.f32.mxu1 %vm402_vm2, %v3076_v41  ;;  %v3286_v20 = vrot.slane %v4930_v57, %v4794_v60 }
0x18e7   :  { %4278 = vmatprep.subr.mxu1 %v3079_v40 }
0x18e8   :  { %4279 = vmatpush3.msra.mxu1 %v3079_v40 }
0x18e9   :  { %4283 = vmatprep.subr.mxu1 %v3165_v7 }
0x18ef   :  { %v4428_v39 = vpop.eup %4427 }
0x18f0   :  { %v3077_v38 = vmul.f32 %v4428_v39, %v4424_v43 }
0x18f2   :  { %4281 = vmatmul.mubr.msk.f32.vlgmr.msra.gmra.mxu1 %vm402_vm2, %v3077_v38 }
0x18f3   :  { %4284 = vmatpush3.msra.mxu1 %v3165_v7 }
0x18f4   :  { %4299 = vmatprep.subr.msk.mxu1 %vm1761_vm15, %v4846_v46 }
0x19a5   :  { %v4268_v12 = vpop.f32.mrf.mxu1 }
0x19a6   :  { %v2960_v9 = vadd.f32 %v4268_v12, %v5070_v29 }
0x19a7   :  { %v2950_v3 = vpop.f32.mrf.mxu1 }
0x19a8   :  { %v2959_v11 = vadd.f32 %v2950_v3, %v2665_v15 }
0x19b2   :  { %v4282_v42 = vpop.f32.mrf.mxu1 }
0x19b4   :  { %v3156_v10 = vpop.f32.mrf.mxu1 }
0x19b5   :  { %4285 = vmatprep.mubr.msk.f32.mxu1 %vm30_vm0, %v3156_v10 }
0x19b6   :  { %4286 = vmatmul.mubr.msk.f32.vlgmr.msra.gmra.mxu1 %vm30_vm0, %v4282_v42 }
0x19b7   :  { %4300 = vmatpush3.msk.msra.mxu1 %vm1761_vm15, %v4846_v46 }
0x1a76   :  { %v4287_v45 = vpop.f32.mrf.mxu1 }
0x1a77   :  { %v3248_v47 = vadd.f32 %v4287_v45, %v2960_v9 }
0x1a78   :  { %v3238_v49 = vpop.f32.mrf.mxu1 }
0x1a79   :  { %v3250_v30 = vadd.f32 %v3248_v47, %v4890_v23  ;;  %v3247_v29 = vadd.f32 %v3238_v49, %v2959_v11 }
0x1a7b   :  { %v5117_v59 = vadd.f32 %v3254_v48, %v3250_v30  ;;  %v3249_v50 = vadd.f32 %v3247_v29, %v4893_v27 }
0x1a7d   :  { %v5120_v37 = vadd.f32 %v3254_v48, %v3249_v50  ;;  %v3260_v62 = vsel %vm113_vm1, %v5117_v59, 0.0 }
0x1a7e   :  { %3261 = vadd.xlane.f32.xlu0 %v3260_v62 }
0x1a7f   :  { %v3257_v46 = vsel %vm113_vm1, %v5120_v37, 0.0 }
0x1a80   :  { %3258 = vadd.xlane.f32.xlu1 %v3257_v46 }
0x1b07   :  { %v3262_v21 = vpop.xlane.xlu0 %3261 }
0x1b08   :  { %v3264_v24 = vmul.f32 0.03125, %v3262_v21 }
0x1b09   :  { %v3259_v51 = vpop.xlane.xlu1 %3258 }
0x1b0a   :  { %v3266_v23 = vsub.f32 %v5117_v59, %v3264_v24  ;;  %v3263_v52 = vmul.f32 0.03125, %v3259_v51 }
0x1b0c   :  { %v3265_v53 = vsub.f32 %v5120_v37, %v3263_v52  ;;  %v3268_v56 = vmul.f32 %v3266_v23, %v3266_v23 }
0x1b0e   :  { %v3272_v27 = vsel %vm113_vm1, %v3268_v56, 0.0  ;;  %v3267_v58 = vmul.f32 %v3265_v53, %v3265_v53 }
0x1b0f   :  { %3273 = vadd.xlane.f32.xlu0 %v3272_v27 }
0x1b10   :  { %v3269_v2 = vsel %vm113_vm1, %v3267_v58, 0.0 }
0x1b11   :  { %3270 = vadd.xlane.f32.xlu1 %v3269_v2 }
0x1b98   :  { %v3274_v54 = vpop.xlane.xlu0 %3273 }
0x1b99   :  { %v3276_v8 = vmul.f32 0.03125, %v3274_v54 }
0x1b9a   :  { %v3271_v31 = vpop.xlane.xlu1 %3270 }
0x1b9b   :  { %v3278_v13 = vadd.f32 1e-05, %v3276_v8  ;;  %v3275_v33 = vmul.f32 0.03125, %v3271_v31 }
0x1b9d   :  { %4429 = vrsqrt.f32 %v3278_v13  ;;  %v3277_v14 = vadd.f32 1e-05, %v3275_v33 }
0x1b9f   :  { %4431 = vrsqrt.f32 %v3277_v14 }
0x1baa   :  { %v4430_v17 = vpop.eup %4429 }
0x1bab   :  { %v3282_v22 = vmul.f32 %v4430_v17, %v3266_v23 }
0x1bac   :  { %v4432_v43 = vpop.eup %4431 }
0x1bad   :  { %v3281_v25 = vmul.f32 %v4432_v43, %v3265_v53  ;;  %v3288_v32 = vmul.f32 %v3286_v20, %v3282_v22 }
0x1baf   :  { %v3287_v5 = vmul.f32 %v3286_v20, %v3281_v25  ;;  %v3294_v1 = vadd.f32 %v3292_v35, %v3288_v32 }
0x1bb1   :  { %v3293_v55 = vadd.f32 %v3292_v35, %v3287_v5 }
0x1bb3   :  { %4296 = vmatprep.mubr.msk.f32.mxu0 %vm113_vm1, %v3293_v55 }
0x1bb4   :  { %4297 = vmatmul.mubr.msk.f32.vlgmr.msra.gmra.mxu0 %vm113_vm1, %v3294_v1 }
0x1c74   :  { %v5149_v41 = vpop.f32.mrf.mxu0 }
0x1c75   :  { %v3434_v40 = vsub.f32 0.0, %v5149_v41 }
0x1c76   :  { %v5152_v39 = vpop.f32.mrf.mxu0 }
0x1c77   :  { %v3437_v38 = vmul.f32 1.442695, %v3434_v40  ;;  %v3433_v7 = vsub.f32 0.0, %v5152_v39 }
0x1c79   :  { %4433 = vpow2.f32 %v3437_v38  ;;  %v3435_v12 = vmul.f32 1.442695, %v3433_v7 }
0x1c7b   :  { %4435 = vpow2.f32 %v3435_v12 }
0x1c86   :  { %v4434_v57 = vpop.eup %4433 }
0x1c87   :  { %v3440_v15 = vadd.f32 1.0, %v4434_v57 }
0x1c88   :  { %v4436_v9 = vpop.eup %4435 }
0x1c89   :  { %4437 = vrcp.f32 %v3440_v15  ;;  %v3439_v3 = vadd.f32 1.0, %v4436_v9 }
0x1c8b   :  { %4439 = vrcp.f32 %v3439_v3 }
0x1c96   :  { %v4438_v11 = vpop.eup %4437 }
0x1c97   :  { %v3448_v42 = vsel %vm1583_vm3, %v4438_v11, -inf }
0x1c98   :  { %v4440_v10 = vpop.eup %4439  ;;  %3449 = vmax.xlane.f32.xlu0 %v3448_v42 }
0x1c99   :  { %v3445_v45 = vsel %vm1583_vm3, %v4440_v10, -inf }
0x1c9a   :  { %3446 = vmax.xlane.f32.xlu1 %v3445_v45 }
0x1d21   :  { %v3450_v47 = vpop.xlane.xlu0 %3449 }
0x1d22   :  { %vm3452_vm0 = vcmp.eq.f32.partialorder %v4438_v11, %v3450_v47 }
0x1d23   :  { %v3454_v48 = vsel %vm3452_vm0, %v4820_v18, 4  ;;  %v3447_v49 = vpop.xlane.xlu1 %3446  ;;  %vm3765_vm0 = vcmask 254976  }
0x1d24   :  { %v3470_v30 = vsel %vm1583_vm3, %v3454_v48, 2147483647  ;;  %vm3451_vm2 = vcmp.eq.f32.partialorder %v4440_v10, %v3447_v49  ;;  %v3635_v48 = vld [vmem:[%s5290_s1 + $0x2a0] sm:$0xff] }
0x1d25   :  { %v3472_v29 = vshra.s32 %v3470_v30, 16  ;;  %v3453_v50 = vsel %vm3451_vm2, %v4820_v18, 4  ;;  %v3471_v51 = vand.u32 65535, %v3470_v30  ;;  %4304 = vmatprep.subr.mxu1 %v3635_v48  ;;  %vm4482_vm2 = vmmov 0  }
0x1d26   :  { %v3455_v62 = vsel %vm1583_vm3, %v3453_v50, 2147483647  ;;  %4331 = vmatprep.mubr.msk.f32.mxu0 %vm4482_vm2, %v4472_v28 }
0x1d27   :  { %v3457_v46 = vshra.s32 %v3455_v62, 16  ;;  %v3474_v21 = vcvt.s32.f32 %v3472_v29  ;;  %v3456_v23 = vand.u32 65535, %v3455_v62  ;;  %v3473_v53 = vcvt.s32.f32 %v3471_v51 }
0x1d29   :  { %3475 = vmin.xlane.f32.xlu0 %v3474_v21  ;;  %v3459_v24 = vcvt.s32.f32 %v3457_v46  ;;  %v3458_v58 = vcvt.s32.f32 %v3456_v23 }
0x1d2b   :  { %3460 = vmin.xlane.f32.xlu1 %v3459_v24 }
0x1db2   :  { %v3476_v52 = vpop.xlane.xlu0 %3475 }
0x1db3   :  { %vm3477_vm7 = vcmp.eq.f32.partialorder %v3474_v21, %v3476_v52  ;;  %v3482_v18 = vcvt.f32.s32 %v3476_v52 }
0x1db4   :  { %v3461_v56 = vpop.xlane.xlu1 %3460  ;;  %v3478_v27 = vsel %vm3477_vm7, %v3473_v53, inf }
0x1db5   :  { %vm3462_vm9 = vcmp.eq.f32.partialorder %v3459_v24, %v3461_v56  ;;  %3479 = vmin.xlane.f32.xlu0 %v3478_v27  ;;  %v3467_v61 = vcvt.f32.s32 %v3461_v56  ;;  %v3483_v6 = vshll.u32 %v3482_v18, 16  ;;  %v3631_v18 = vld [vmem:[%s5290_s1 + $0x260] sm:$0xff] }
0x1db6   :  { %v3463_v2 = vsel %vm3462_vm9, %v3458_v58, inf  ;;  %v3634_v58 = vld [vmem:[%s5290_s1 + $0x290] sm:$0xff] }
0x1db7   :  { %3464 = vmin.xlane.f32.xlu1 %v3463_v2  ;;  %v3468_v8 = vshll.u32 %v3467_v61, 16  ;;  %v3633_v2 = vld [vmem:[%s5290_s1 + $0x280] sm:$0xff]  ;;  %v3630_v61 = vld [vmem:[%s5290_s1 + $0x250] sm:$0xff] }
0x1dc8   :  { %3489 = vrot.lane.b32.xlu1 %v4440_v10, %s4474_s11 }
0x1dcb   :  { %3491 = vrot.lane.b32.xlu0 %v4438_v11, %s4474_s11 }
0x1e3e   :  { %v3480_v0 = vpop.xlane.xlu0 %3479 }
0x1e3f   :  { %v3481_v34 = vcvt.f32.s32 %v3480_v0  ;;  %v3629_v0 = vld [vmem:[%s5290_s1 + $0x240] sm:$0xff] }
0x1e40   :  { %v3465_v54 = vpop.xlane.xlu1 %3464 }
0x1e41   :  { %v3484_v31 = vadd.s32 %v3483_v6, %v3481_v34  ;;  %v3466_v13 = vcvt.f32.s32 %v3465_v54  ;;  %v3628_v6 = vld [vmem:[%s5290_s1 + $0x230] sm:$0xff]  ;;  %v3543_v54 = vmax.f32 %v5152_v39, 0.0 }
0x1e42   :  { %v3492_v33 = vpop.permute.xlu0 %3491 }
0x1e43   :  { %v3469_v14 = vadd.s32 %v3468_v8, %v3466_v13  ;;  %vm3486_vm10 = vcmp.eq.s32.totalorder %v4815_v36, %v3484_v31  ;;  %v3544_v8 = vmax.f32 %v5149_v41, 0.0 }
0x1e44   :  { %v3490_v17 = vpop.permute.xlu1 %3489  ;;  %v3498_v20 = vsel %vm3486_vm10, -1e+30, %v3492_v33  ;;  %v3496_v53 = vsel %vm3486_vm10, %v3492_v33, 0.0 }
0x1e45   :  { %vm3485_vm11 = vcmp.eq.s32.totalorder %v4815_v36, %v3469_v14  ;;  %v3502_v22 = vsel %vm1604_vm8, %v3498_v20, -inf }
0x1e46   :  { %3503 = vmax.xlane.f32.xlu0 %v3502_v22  ;;  %v3497_v43 = vsel %vm3485_vm11, -1e+30, %v3490_v17  ;;  %v3495_v52 = vsel %vm3485_vm11, %v3490_v17, 0.0 }
0x1e47   :  { %v3499_v25 = vsel %vm1604_vm8, %v3497_v43, -inf }
0x1e48   :  { %3500 = vmax.xlane.f32.xlu1 %v3499_v25 }
0x1ecf   :  { %v3504_v32 = vpop.xlane.xlu0 %3503 }
0x1ed0   :  { %vm3506_vm12 = vcmp.eq.f32.partialorder %v3498_v20, %v3504_v32 }
0x1ed1   :  { %v3508_v35 = vsel %vm3506_vm12, %v4815_v36, 4  ;;  %v3501_v5 = vpop.xlane.xlu1 %3500 }
0x1ed2   :  { %v3524_v55 = vsel %vm1604_vm8, %v3508_v35, 2147483647  ;;  %vm3505_vm13 = vcmp.eq.f32.partialorder %v3497_v43, %v3501_v5 }
0x1ed3   :  { %v3526_v1 = vshra.s32 %v3524_v55, 16  ;;  %v3507_v40 = vsel %vm3505_vm13, %v4815_v36, 4  ;;  %v3525_v15 = vand.u32 65535, %v3524_v55 }
0x1ed4   :  { %v3509_v38 = vsel %vm1604_vm8, %v3507_v40, 2147483647 }
0x1ed5   :  { %v3511_v7 = vshra.s32 %v3509_v38, 16  ;;  %v3528_v12 = vcvt.s32.f32 %v3526_v1  ;;  %v3510_v9 = vand.u32 65535, %v3509_v38  ;;  %v3527_v11 = vcvt.s32.f32 %v3525_v15 }
0x1ed6   :  { %v3383_v15 = vsel %vm1583_vm3, %v5149_v41, -inf }
0x1ed7   :  { %3529 = vmin.xlane.f32.xlu0 %v3528_v12  ;;  %v3513_v57 = vcvt.s32.f32 %v3511_v7  ;;  %v3512_v45 = vcvt.s32.f32 %v3510_v9  ;;  %v3380_v9 = vsel %vm1583_vm3, %v5152_v39, -inf }
0x1ed9   :  { %3514 = vmin.xlane.f32.xlu1 %v3513_v57 }
0x1f60   :  { %v3530_v3 = vpop.xlane.xlu0 %3529 }
0x1f61   :  { %vm3531_vm14 = vcmp.eq.f32.partialorder %v3528_v12, %v3530_v3  ;;  %v3536_v49 = vcvt.f32.s32 %v3530_v3 }
0x1f62   :  { %v3515_v42 = vpop.xlane.xlu1 %3514  ;;  %v3532_v10 = vsel %vm3531_vm14, %v3527_v11, inf }
0x1f63   :  { %vm3516_vm15 = vcmp.eq.f32.partialorder %v3513_v57, %v3515_v42  ;;  %3533 = vmin.xlane.f32.xlu0 %v3532_v10  ;;  %v3521_v30 = vcvt.f32.s32 %v3515_v42  ;;  %v3537_v50 = vshll.u32 %v3536_v49, 16  ;;  %v1584_v57 = vsel %vm1583_vm3, %v4809_v19, -inf }
0x1f64   :  { %v3517_v47 = vsel %vm3516_vm15, %v3512_v45, inf }
0x1f65   :  { %3518 = vmin.xlane.f32.xlu1 %v3517_v47  ;;  %v3522_v21 = vshll.u32 %v3521_v30, 16 }
0x1fec   :  { %v3534_v29 = vpop.xlane.xlu0 %3533 }
0x1fed   :  { %v3535_v62 = vcvt.f32.s32 %v3534_v29  ;;  %v5229_v29 = vld [vmem:[%s5290_s1 + $0x2d0] sm:$0xff] }
0x1fee   :  { %v3519_v46 = vpop.xlane.xlu1 %3518 }
0x1fef   :  { %v3538_v24 = vadd.s32 %v3537_v50, %v3535_v62  ;;  %v3520_v51 = vcvt.f32.s32 %v3519_v46  ;;  %v3748_v50 = vrot.slane %v5229_v29, %v4581_v44 }
0x1ff1   :  { %v3523_v23 = vadd.s32 %v3522_v21, %v3520_v51  ;;  %vm3540_vm4 = vcmp.eq.s32.totalorder %v4815_v36, %v3538_v24  ;;  %v3754_v21 = vrot.slane %v5229_v29, %v4763_v26 }
0x1ff2   :  { %v3542_v27 = vsel %vm3540_vm4, %v3492_v33, %v3496_v53 }
0x1ff3   :  { %vm3539_vm5 = vcmp.eq.s32.totalorder %v4815_v36, %v3523_v23  ;;  %v3632_v36 = vld [vmem:[%s5290_s1 + $0x270] sm:$0xff] }
0x1ff4   :  { %v3541_v56 = vsel %vm3539_vm5, %v3490_v17, %v3495_v52 }
0x1ff5   :  { %4301 = vmatprep.mubr.msk.f32.mxu1 %vm1604_vm8, %v3541_v56 }
0x1ff6   :  { %4302 = vmatmul.mubr.msk.f32.vlgmr.msra.gmra.mxu1 %vm1604_vm8, %v3542_v27 }
0x1ff7   :  { %4305 = vmatpush3.msra.mxu1 %v3635_v48 }
0x1ff8   :  { %4306 = vmatprep.subr.mxu1 %v3634_v58 }
0x1ff9   :  { %4307 = vmatpush3.msra.mxu1 %v3634_v58 }
0x1ffa   :  { %4308 = vmatprep.subr.mxu1 %v3633_v2 }
0x1ffb   :  { %4309 = vmatpush3.msra.mxu1 %v3633_v2 }
0x1ffc   :  { %4310 = vmatprep.subr.mxu1 %v3632_v36 }
0x1ffd   :  { %4311 = vmatpush3.msra.mxu1 %v3632_v36 }
0x1ffe   :  { %4312 = vmatprep.subr.mxu1 %v3631_v18 }
0x1fff   :  { %4313 = vmatpush3.msra.mxu1 %v3631_v18 }
0x2000   :  { %4314 = vmatprep.subr.mxu1 %v3630_v61 }
0x2001   :  { %4315 = vmatpush3.msra.mxu1 %v3630_v61 }
0x2002   :  { %4316 = vmatprep.subr.mxu1 %v3629_v0 }
0x2003   :  { %4317 = vmatpush3.msra.mxu1 %v3629_v0 }
0x2004   :  { %4318 = vmatprep.subr.mxu1 %v3628_v6 }
0x2005   :  { %4319 = vmatpush3.msra.mxu1 %v3628_v6 }
0x20b6   :  { %v4303_v34 = vpop.f32.mrf.mxu1 }
0x20b7   :  { %v3627_v33 = vmul.f32 %v4303_v34, %v3544_v8 }
0x20b8   :  { %v3617_v31 = vpop.f32.mrf.mxu1 }
0x20b9   :  { %v3626_v13 = vmul.f32 %v3617_v31, %v3543_v54 }
0x20bb   :  { %4320 = vmatprep.mubr.msk.f32.mxu1 %vm1850_vm6, %v3626_v13 }
0x20bc   :  { %4321 = vmatmul.mubr.msk.f32.vlgmr.msra.gmra.mxu1 %vm1850_vm6, %v3627_v33  ;;  %vm3763_vm6 = vcmask 1040384  }
0x217c   :  { %v4322_v14 = vpop.f32.mrf.mxu1 }
0x217d   :  { %v3718_v17 = vadd.f32 %v4322_v14, %v5117_v59 }
0x217e   :  { %v3708_v20 = vpop.f32.mrf.mxu1 }
0x217f   :  { %v3717_v22 = vadd.f32 %v3708_v20, %v5120_v37  ;;  %v3722_v43 = vsel %vm113_vm1, %v3718_v17, 0.0  ;;  %v1587_v37 = vsel %vm1583_vm3, %v4806_v16, -inf }
0x2180   :  { %3723 = vadd.xlane.f32.xlu0 %v3722_v43 }
0x2181   :  { %v3719_v25 = vsel %vm113_vm1, %v3717_v22, 0.0 }
0x2182   :  { %3720 = vadd.xlane.f32.xlu1 %v3719_v25 }
0x2209   :  { %v3724_v32 = vpop.xlane.xlu0 %3723 }
0x220a   :  { %v3726_v35 = vmul.f32 0.03125, %v3724_v32 }
0x220b   :  { %v3721_v5 = vpop.xlane.xlu1 %3720 }
0x220c   :  { %v3728_v55 = vsub.f32 %v3718_v17, %v3726_v35  ;;  %v3725_v1 = vmul.f32 0.03125, %v3721_v5 }
0x220e   :  { %v3727_v40 = vsub.f32 %v3717_v22, %v3725_v1  ;;  %v3730_v38 = vmul.f32 %v3728_v55, %v3728_v55  ;;  %v16_v1 = vld [vmem:[%s5290_s1 + $0x310] sm:$0xff] }
0x220f   :  { %4324 = vmatpush3.msra.mxu0 %v16_v1 }
0x2210   :  { %v3734_v7 = vsel %vm113_vm1, %v3730_v38, 0.0  ;;  %v3729_v12 = vmul.f32 %v3727_v40, %v3727_v40  ;;  %4325 = vmatprep.subr.mxu0 %v4472_v28  ;;  %v14_v38 = vld [vmem:[%s5290_s1 + $0x2f0] sm:$0xff] }
0x2211   :  { %3735 = vadd.xlane.f32.xlu0 %v3734_v7  ;;  %v13_v7 = vld [vmem:[%s5290_s1 + $0x2e0] sm:$0xff] }
0x2212   :  { %v3731_v59 = vsel %vm113_vm1, %v3729_v12, 0.0 }
0x2213   :  { %3732 = vadd.xlane.f32.xlu1 %v3731_v59 }
0x2215   :  { %1588 = vmax.xlane.f32.xlu0 %v1587_v37 }
0x2217   :  { %1585 = vmax.xlane.f32.xlu1 %v1584_v57 }
0x2219   :  { %3384 = vmax.xlane.f32.xlu0 %v3383_v15 }
0x221b   :  { %3381 = vmax.xlane.f32.xlu1 %v3380_v9 }
0x229a   :  { %v3736_v3 = vpop.xlane.xlu0 %3735 }
0x229b   :  { %v3738_v11 = vmul.f32 0.03125, %v3736_v3 }
0x229c   :  { %v3733_v42 = vpop.xlane.xlu1 %3732 }
0x229d   :  { %v3740_v10 = vadd.f32 1e-05, %v3738_v11  ;;  %v3737_v45 = vmul.f32 0.03125, %v3733_v42  ;;  %v3782_v42 = vrot.slane %v5229_v29, %v4794_v60 }
0x229e   :  { %v1589_v52 = vpop.xlane.xlu0 %1588 }
0x229f   :  { %4441 = vrsqrt.f32 %v3740_v10  ;;  %v3739_v47 = vadd.f32 1e-05, %v3737_v45  ;;  %v1591_v58 = vsub.f32 %v4806_v16, %v1589_v52 }
0x22a0   :  { %v1586_v48 = vpop.xlane.xlu1 %1585 }
0x22a1   :  { %4443 = vrsqrt.f32 %v3739_v47  ;;  %v1590_v49 = vsub.f32 %v4809_v19, %v1586_v48  ;;  %v1594_v18 = vmul.f32 1.442695, %v1591_v58  ;;  %v3787_v48 = vrot.slane %v5229_v29, %v4799_v63 }
0x22a2   :  { %v3385_v6 = vpop.xlane.xlu0 %3384 }
0x22a3   :  { %v1592_v30 = vmul.f32 1.442695, %v1590_v49  ;;  %v3387_v34 = vsub.f32 %v5149_v41, %v3385_v6 }
0x22a4   :  { %v3382_v44 = vpop.xlane.xlu1 %3381 }
0x22a5   :  { %4445 = vpow2.f32 %v1592_v30  ;;  %v3386_v61 = vsub.f32 %v5152_v39, %v3382_v44  ;;  %v3390_v8 = vmul.f32 1.442695, %v3387_v34 }
0x22a6   :  { %4447 = vpow2.f32 %v1594_v18 }
0x22a7   :  { %v3388_v54 = vmul.f32 1.442695, %v3386_v61 }
0x22a9   :  { %4449 = vpow2.f32 %v3388_v54 }
0x22aa   :  { %4451 = vpow2.f32 %v3390_v8 }
0x22ac   :  { %v4442_v62 = vpop.eup %4441 }
0x22ad   :  { %v3744_v46 = vmul.f32 %v4442_v62, %v3728_v55 }
0x22ae   :  { %v4444_v24 = vpop.eup %4443 }
0x22af   :  { %v3743_v51 = vmul.f32 %v4444_v24, %v3727_v40  ;;  %v3750_v23 = vmul.f32 %v3748_v50, %v3744_v46  ;;  %v15_v40 = vld [vmem:[%s5290_s1 + $0x300] sm:$0xff] }
0x22b0   :  { %4326 = vmatpush3.msra.mxu0 %v15_v40 }
0x22b1   :  { %v3749_v19 = vmul.f32 %v3748_v50, %v3743_v51  ;;  %v3756_v53 = vadd.f32 %v3754_v21, %v3750_v23  ;;  %4327 = vmatprep.subr.mxu0 %v4472_v28 }
0x22b2   :  { %v5235_v56 = vpop.eup %4445  ;;  %4328 = vmatpush3.msra.mxu0 %v14_v38 }
0x22b3   :  { %1598 = vrot.lane.b32.xlu0 %v5235_v56, %s4474_s11  ;;  %v3755_v27 = vadd.f32 %v3754_v21, %v3749_v19  ;;  %v3761_v36 = vrot.slane %v3756_v53, 6  ;;  %v4448_v16 = vpop.eup %4447  ;;  %4329 = vmatprep.subr.mxu0 %v4472_v28 }
0x22b4   :  { %4330 = vmatpush3.msra.mxu0 %v13_v7 }
0x22b5   :  { %v3758_v2 = vrot.slane %v3755_v27, 7 }
0x22b6   :  { %v4450_v31 = vpop.eup %4449 }
0x22b7   :  { %v3764_v26 = vsel %vm3763_vm6, %v3758_v2, %v3761_v36  ;;  %v5245_v13 = vpop.eup %4451 }
0x22b8   :  { %v3766_v0 = vsel %vm3765_vm0, %v3764_v26, 0.0 }
0x22b9   :  { %3767 = vadd.xlane.f32.xlu1 %v3766_v0 }
0x22ca   :  { %1600 = vrot.lane.b32.xlu1 %v4448_v16, %s4474_s11 }
0x22ce   :  { %3394 = vrot.lane.b32.xlu1 %v4450_v31, %s4474_s11 }
0x22d2   :  { %3396 = vrot.lane.b32.xlu1 %v5245_v13, %s4474_s11 }
0x2325   :  { %v1599_v39 = vpop.permute.xlu0 %1598 }
0x2326   :  { %v1605_v33 = vsel %vm1604_vm8, %v1599_v39, 0.0 }
0x2327   :  { %1606 = vadd.xlane.f32.xlu1 %v1605_v33 }
0x2342   :  { %v3768_v41 = vpop.xlane.xlu1 %3767 }
0x2343   :  { %v3769_v14 = vmul.f32 0.03125, %v3768_v41 }
0x2345   :  { %v3770_v17 = vsub.f32 %v3764_v26, %v3769_v14 }
0x2346   :  { %v1601_v20 = vpop.permute.xlu1 %1600 }
0x2347   :  { %v3771_v22 = vmul.f32 %v3770_v17, %v3770_v17  ;;  %v1608_v32 = vsel %vm1604_vm8, %v1601_v20, 0.0 }
0x2349   :  { %v3772_v43 = vsel %vm3765_vm0, %v3771_v22, 0.0 }
0x234a   :  { %3773 = vadd.xlane.f32.xlu0 %v3772_v43  ;;  %v3395_v25 = vpop.permute.xlu1 %3394 }
0x234b   :  { %v3400_v35 = vsel %vm1604_vm8, %v3395_v25, 0.0 }
0x234e   :  { %1609 = vadd.xlane.f32.xlu0 %v1608_v32  ;;  %v3397_v5 = vpop.permute.xlu1 %3396 }
0x234f   :  { %v3403_v55 = vsel %vm1604_vm8, %v3397_v5, 0.0 }
0x2352   :  { %3401 = vadd.xlane.f32.xlu0 %v3400_v35  ;;  %v3791_v35 = vsub.s32 5, %v4510_v4 }
0x2356   :  { %3404 = vadd.xlane.f32.xlu0 %v3403_v55  ;;  %v3792_v55 = vrot.slane %v5229_v29, %v3791_v35 }
0x23b0   :  { %v1607_v12 = vpop.xlane.xlu1 %1606 }
0x23b1   :  { %4453 = vrcp.f32 %v1607_v12 }
0x23be   :  { %v4454_v11 = vpop.eup %4453 }
0x23bf   :  { %v1612_v45 = vmul.f32 %v4454_v11, %v5235_v56 }
0x23c1   :  { %v1615_v62 = vsel %vm1583_vm3, %v1612_v45, 0.0 }
0x23d3   :  { %v3774_v59 = vpop.xlane.xlu0 %3773 }
0x23d4   :  { %v3775_v37 = vmul.f32 0.03125, %v3774_v59 }
0x23d6   :  { %v3776_v57 = vadd.f32 1e-05, %v3775_v37 }
0x23d7   :  { %v1610_v15 = vpop.xlane.xlu0 %1609 }
0x23d8   :  { %4455 = vrsqrt.f32 %v3776_v57 }
0x23d9   :  { %4457 = vrcp.f32 %v1610_v15 }
0x23db   :  { %v3402_v9 = vpop.xlane.xlu0 %3401 }
0x23dc   :  { %4459 = vrcp.f32 %v3402_v9 }
0x23df   :  { %v3405_v3 = vpop.xlane.xlu0 %3404 }
0x23e0   :  { %4461 = vrcp.f32 %v3405_v3 }
0x23e5   :  { %v4456_v10 = vpop.eup %4455 }
0x23e6   :  { %v4458_v28 = vpop.eup %4457  ;;  %v3778_v47 = vmul.f32 %v4456_v10, %v3770_v17 }
0x23e7   :  { %v1614_v49 = vmul.f32 %v4458_v28, %v4448_v16 }
0x23e8   :  { %v3783_v30 = vmul.f32 %v3782_v42, %v3778_v47 }
0x23e9   :  { %v4460_v50 = vpop.eup %4459  ;;  %v1616_v46 = vsel %vm1583_vm3, %v1614_v49, 0.0 }
0x23ea   :  { %v3788_v21 = vadd.f32 %v3787_v48, %v3783_v30  ;;  %v1617_v24 = vadd.f32 %v1616_v46, %v1615_v62  ;;  %v3407_v51 = vmul.f32 %v4460_v50, %v4450_v31 }
0x23ec   :  { %4332 = vmatmul.mubr.msk.f32.vlgmr.msra.gmra.mxu0 %vm113_vm1, %v3788_v21  ;;  %v1618_v60 = vrot.slane %v1617_v24, 4  ;;  %v3410_v53 = vsel %vm1583_vm3, %v3407_v51, 0.0  ;;  %vm3867_vm1 = vcmask 15360  }
0x23ed   :  { %v4462_v23 = vpop.eup %4461 }
0x23ee   :  { %v3409_v52 = vmul.f32 %v4462_v23, %v5245_v13  ;;  %v1619_v19 = vadd.f32 %v1618_v60, %v1617_v24 }
0x23f0   :  { %v3411_v63 = vsel %vm1583_vm3, %v3409_v52, 0.0  ;;  %v1620_v56 = vrot.slane %v1619_v19, 2  ;;  %vm3869_vm3 = vcmask 17408  }
0x23f1   :  { %v3412_v27 = vadd.f32 %v3411_v63, %v3410_v53 }
0x23f2   :  { %v1621_v58 = vadd.f32 %v1620_v56, %v1619_v19 }
0x23f3   :  { %v3413_v44 = vrot.slane %v3412_v27, 4 }
0x23f4   :  { %v1622_v2 = vrot.slane %v1621_v58, 1 }
0x23f5   :  { %v3414_v36 = vadd.f32 %v3413_v44, %v3412_v27 }
0x23f6   :  { %v1623_v26 = vadd.f32 %v1622_v2, %v1621_v58 }
0x23f7   :  { %v3415_v18 = vrot.slane %v3414_v36, 2 }
0x23f8   :  { %v1625_v61 = vmul.f32 0.0625, %v1623_v26 }
0x23f9   :  { %v3416_v0 = vadd.f32 %v3415_v18, %v3414_v36 }
0x23fa   :  { %v1626_v6 = vadd.f32 1e-10, %v1625_v61 }
0x23fb   :  { %v3417_v34 = vrot.slane %v3416_v0, 1 }
0x23fc   :  { %4463 = vlog2.f32 %v1626_v6 }
0x23fd   :  { %v3418_v54 = vadd.f32 %v3417_v34, %v3416_v0 }
0x23ff   :  { %v3419_v8 = vmul.f32 0.0625, %v3418_v54 }
0x2401   :  { %v3420_v16 = vadd.f32 1e-10, %v3419_v8 }
0x2403   :  { %4465 = vlog2.f32 %v3420_v16 }
0x2409   :  { %v4464_v31 = vpop.eup %4463 }
0x240a   :  { %v1628_v13 = vmul.f32 0.6931472, %v4464_v31 }
0x240c   :  { %v1629_v39 = vmul.f32 %v1628_v13, %v1625_v61 }
0x240e   :  { %1631 = vrot.lane.b32.xlu1 %v1629_v39, %s4474_s11 }
0x2410   :  { %v4466_v33 = vpop.eup %4465 }
0x2411   :  { %v3422_v41 = vmul.f32 0.6931472, %v4466_v33 }
0x2413   :  { %v3423_v14 = vmul.f32 %v3422_v41, %v3419_v8 }
0x2415   :  { %3425 = vrot.lane.b32.xlu0 %v3423_v14, %s4474_s11 }
0x2480   :  { %v1632_v17 = vpop.permute.xlu1 %1631 }
0x2481   :  { %v1634_v20 = vsel %vm1604_vm8, %v1632_v17, 0.0 }
0x2482   :  { %1635 = vadd.xlane.f32.xlu1 %v1634_v20 }
0x2487   :  { %v3426_v22 = vpop.permute.xlu0 %3425 }
0x2488   :  { %v3428_v43 = vsel %vm1604_vm8, %v3426_v22, 0.0 }
0x2489   :  { %3429 = vadd.xlane.f32.xlu0 %v3428_v43 }
0x24ac   :  { %v3862_v25 = vpop.f32.mrf.mxu0 }
0x24ad   :  { %v3863_v7 = vadd.f32 %v3862_v25, %v3792_v55 }
0x24ae   :  { %v4333_v32 = vpop.f32.mrf.mxu0 }
0x250b   :  { %v1636_v5 = vpop.xlane.xlu1 %1635 }
0x250c   :  { %v1637_v40 = vmul.f32 0.01, %v1636_v5 }
0x2512   :  { %v3430_v1 = vpop.xlane.xlu0 %3429 }
0x2513   :  { %v3431_v38 = vmul.f32 0.01, %v3430_v1 }
0x2515   :  { %v3432_v12 = vadd.f32 %v3431_v38, %v1637_v40 }
0x2517   :  { %v3868_v59 = vsel %vm3867_vm1, %v3863_v7, %v3432_v12 }
0x2518   :  { %3870 = vst.msk [vmem:[%s5292_s2] sm:$0x3] %vm3869_vm3, %v3868_v59 }

</bundles_post_ra>
